<compile_context>
chip_gen: v6e
topology: v6e:2x2x1
jax: 0.10.0
libtpu: 0.0.40
codegen_flags: <defaults>
</compile_context>

<pallas_src>
import functools

import numpy as np
import jax
import jax.numpy as jnp
from jax import lax
from jax.experimental import pallas as pl
from jax.experimental.pallas import tpu as pltpu


# ------------------------- small in-kernel helpers ---------------------------


def _mm(a_bf16, b_bf16):
    """bf16 MXU matmul with f32 accumulation (operands already bf16)."""
    return jnp.dot(a_bf16, b_bf16, preferred_element_type=jnp.float32)


def _ln(x, g, b, eps):
    mu = jnp.mean(x, axis=-1, keepdims=True)
    xc = x - mu
    var = jnp.mean(xc * xc, axis=-1, keepdims=True)
    return xc * lax.rsqrt(var + eps) * g + b


def _conv3x3(x_f32, mask_ref, w_ref, W, HW):
    """3x3 same-padding conv on a row-major [H*W, Cin] feature map.

    Each tap: static circular sublane roll (XLU) + precomputed 0/1 edge mask (VPU),
    then one [HW, Cin] @ [Cin, Cout] matmul (MXU).  No gather matrices.
    """
    acc = None
    for k in range(9):
        dy, dx = k // 3 - 1, k % 3 - 1
        shift = (-(dy * W + dx)) % HW
        tap = pltpu.roll(x_f32, shift=shift, axis=0) if shift else x_f32
        tap = (tap * mask_ref[k]).astype(jnp.bfloat16)
        term = jnp.dot(tap, w_ref[k], preferred_element_type=jnp.float32)
        acc = term if acc is None else acc + term
    return acc


def _upsample2x(x, H, W):
    """2x nearest-neighbor upsample of a row-major [H*W, C] map -> [4*H*W, C].

    Broadcast / concat row expansion only (VPU + layout work, no MXU).
    TODO(synk): at real SAM grid sizes replace this static unroll with a
    reshape/strided expansion (or fold it into the following conv's taps).
    """
    C = x.shape[-1]

    def wdup(i):  # width-duplicated image row i -> [2W, C]
        return jnp.concatenate(
            [jnp.broadcast_to(x[i * W + j:i * W + j + 1, :], (2, C)) for j in range(W)],
            axis=0)

    rows = [wdup(i) for i in range(H)]
    return jnp.concatenate([rows[fi // 2] for fi in range(2 * H)], axis=0)


# ------------------------------ fused kernel ----------------------------------


def _sam_feat_seg_kernel(px_ref, pew_ref, peb_ref, pos_ref,
                         ln1g_ref, ln1b_ref, qkvw_ref, qkvb_ref,
                         projw_ref, projb_ref, ln2g_ref, ln2b_ref,
                         fc1w_ref, fc1b_ref, fc2w_ref, fc2b_ref,
                         n1w_ref, n1g_ref, n1b_ref,
                         m1_ref, n2w_ref, n2g_ref, n2b_ref,
                         d1w_ref, d1b_ref, m2_ref, d2w_ref, d2b_ref,
                         hw_ref, hb_ref, o_ref,
                         *, depth, num_heads, Hp, Wp, eps):
    C = pos_ref.shape[-1]
    dh = C // num_heads
    scale = 1.0 / float(dh) ** 0.5
    HW1 = Hp * Wp
    W2 = 2 * Wp
    HW2 = (2 * Hp) * (2 * Wp)

    # ---------------- patch embed + positional embedding ----------------
    x = _mm(px_ref[0].astype(jnp.bfloat16), pew_ref[...]) + peb_ref[...] + pos_ref[...]

    # ---------------- transformer blocks ----------------
    # TODO(synk): real SAM uses windowed attention + decomposed rel-pos on most blocks
    # and needs flash-style KV tiling at T=4096; global [T,T] attention is used here.
    # TODO(synk): at real depth (12-32) switch this unrolled loop to lax.fori_loop over
    # the stacked [depth, ...] weight refs (dynamic ref[d]) to bound vreg live ranges.
    for d in range(depth):
        h = _ln(x, ln1g_ref[d], ln1b_ref[d], eps).astype(jnp.bfloat16)
        qkv = (_mm(h, qkvw_ref[d]) + qkvb_ref[d]).astype(jnp.bfloat16)   # [T, 3C]
        heads = []
        for n in range(num_heads):
            q = qkv[:, n * dh:(n + 1) * dh]
            k = qkv[:, C + n * dh:C + (n + 1) * dh]
            v = qkv[:, 2 * C + n * dh:2 * C + (n + 1) * dh]
            s = lax.dot_general(q, k, (((1,), (1,)), ((), ())),
                                preferred_element_type=jnp.float32) * scale   # [T, T]
            s = s - jnp.max(s, axis=-1, keepdims=True)
            p = jnp.exp(s)
            p = p * pl.reciprocal(jnp.sum(p, axis=-1, keepdims=True), approx=True)
            heads.append(_mm(p.astype(jnp.bfloat16), v))                 # [T, dh]
        attn = jnp.concatenate(heads, axis=-1).astype(jnp.bfloat16)      # [T, C]
        x = x + _mm(attn, projw_ref[d]) + projb_ref[d]

        h = _ln(x, ln2g_ref[d], ln2b_ref[d], eps).astype(jnp.bfloat16)
        # tanh-approx GELU (nn.GELU default is exact erf; difference ~1e-3)
        h1 = jax.nn.gelu(_mm(h, fc1w_ref[d]) + fc1b_ref[d], approximate=True)
        x = x + _mm(h1.astype(jnp.bfloat16), fc2w_ref[d]) + fc2b_ref[d]

    # ---------------- neck: 1x1 conv -> LN -> 3x3 conv -> LN ----------------
    t = _mm(x.astype(jnp.bfloat16), n1w_ref[...])                        # [HW1, Cn]
    t = _ln(t, n1g_ref[...], n1b_ref[...], eps)
    u = _conv3x3(t, m1_ref, n2w_ref, Wp, HW1)                            # bias-free
    u = _ln(u, n2g_ref[...], n2b_ref[...], eps)

    # ---------------- decoder ----------------
    y = jnp.maximum(_conv3x3(u, m1_ref, d1w_ref, Wp, HW1) + d1b_ref[...], 0.0)
    y2 = _upsample2x(y, Hp, Wp)                                          # [HW2, Cd]
    z = jnp.maximum(_conv3x3(y2, m2_ref, d2w_ref, W2, HW2) + d2b_ref[...], 0.0)

    # lane-padded (128-wide) 1x1 class head on the 2Hp x 2Wp grid; the final 2x nearest
    # upsample commutes with the 1x1 head and is applied in the wrapper.
    o_ref[0] = (_mm(z.astype(jnp.bfloat16), hw_ref[...]) + hb_ref[...]).astype(o_ref.dtype)


# ------------------------------ pallas_call glue -------------------------------


_REP_ORDER = ("pe_w", "pe_b", "pos",
              "ln1_g", "ln1_b", "qkv_w", "qkv_b", "proj_w", "proj_b",
              "ln2_g", "ln2_b", "fc1_w", "fc1_b", "fc2_w", "fc2_b",
              "neck1_w", "nln1_g", "nln1_b",
              "mask1", "neck2_w", "nln2_g", "nln2_b",
              "dec1_w", "dec1_b", "mask2", "dec2_w", "dec2_b",
              "head_w", "head_b")


def _rep_spec(a):
    zeros = (0,) * a.ndim
    return pl.BlockSpec(a.shape, lambda b, _z=zeros: _z)


def sam_feat_seg_forward(x_nchw, dp):
    B, Cin, Hi, Wi = x_nchw.shape
    patch = dp["patch"]
    Hp, Wp = Hi // patch, Wi // patch
    T = Hp * Wp
    HW2 = (2 * Hp) * (2 * Wp)
    nc = dp["num_classes"]

    # patch extraction (layout glue; the stride-`patch` conv itself runs in-kernel)
    x = x_nchw.transpose(0, 2, 3, 1)
    x = x.reshape(B, Hp, patch, Wp, patch, Cin).transpose(0, 1, 3, 2, 4, 5)
    px = x.reshape(B, T, patch * patch * Cin)

    rep = [dp[k] for k in _REP_ORDER]
    kern = functools.partial(_sam_feat_seg_kernel, depth=dp["depth"],
                             num_heads=dp["num_heads"], Hp=Hp, Wp=Wp, eps=1e-6)

    logits = pl.pallas_call(
        kern,
        out_shape=jax.ShapeDtypeStruct((B, HW2, 128), jnp.float32),
        grid_spec=pltpu.PrefetchScalarGridSpec(
            num_scalar_prefetch=0,
            grid=(B,),
            in_specs=[pl.BlockSpec((1, T, px.shape[-1]), lambda b: (b, 0, 0))]
                     + [_rep_spec(a) for a in rep],
            out_specs=pl.BlockSpec((1, HW2, 128), lambda b: (b, 0, 0)),
        ),
        # grid=(B,) "parallel": v7x's two TensorCores each take a batch element (B>=2);
        # on single-TC v5e/v6e it is a tiny serial loop (~0.35us/step overhead).
        compiler_params=pltpu.CompilerParams(
            dimension_semantics=("parallel",),
            vmem_limit_bytes=32 * 1024 * 1024,
        ),
    )(px, *rep)

    # final 2x nearest upsample (commuted past the 1x1 head, exact) + bilinear resize
    # to the input resolution (F.interpolate(mode="bilinear", align_corners=False)).
    g = logits[:, :, :nc].reshape(B, 2 * Hp, 2 * Wp, nc)
    g = jnp.repeat(jnp.repeat(g, 2, axis=1), 2, axis=2)                 # nearest 2x
    g = jax.image.resize(g, (B, Hi, Wi, nc), method="bilinear")
    return g.transpose(0, 3, 1, 2)                                      # back to NCHW


# -------------------------- constant edge masks --------------------------------


def _conv_edge_masks(H, W):
    """[9, H*W, 1] 0/1 masks: tap k=(dy,dx) is valid where 0<=i+dy<H and 0<=j+dx<W."""
    m = np.zeros((9, H * W, 1), np.float32)
    for k in range(9):
        dy, dx = k // 3 - 1, k % 3 - 1
        for i in range(H):
            for j in range(W):
                if 0 <= i + dy < H and 0 <= j + dx < W:
                    m[k, i * W + j, 0] = 1.0
    return m


# ----------------------------- parameter setup ---------------------------------


def make_params(key, *, in_chans=3, patch=8, embed=32, depth=2, heads=2,
                mlp_ratio=4, neck_chans=32, dec_chans=16, num_classes=4, hw_tokens=4):
    ks = iter(jax.random.split(key, 64))

    def w(shape, scale=0.02):
        return scale * jax.random.normal(next(ks), shape, dtype=jnp.float32)

    def zeros(shape):
        return jnp.zeros(shape, jnp.float32)

    def ones(shape):
        return jnp.ones(shape, jnp.float32)

    mlp = embed * mlp_ratio
    blocks = []
    for _ in range(depth):
        blocks.append(dict(
            num_heads=heads,
            ln1_g=ones((embed,)), ln1_b=zeros((embed,)),
            qkv_w=w((embed, 3 * embed)), qkv_b=zeros((3 * embed,)),
            proj_w=w((embed, embed)), proj_b=zeros((embed,)),
            ln2_g=ones((embed,)), ln2_b=zeros((embed,)),
            fc1_w=w((embed, mlp)), fc1_b=zeros((mlp,)),
            fc2_w=w((mlp, embed)), fc2_b=zeros((embed,)),
        ))
    return dict(
        patch=patch,
        pe_w=w((patch * patch * in_chans, embed)), pe_b=zeros((embed,)),
        pos_embed=w((1, hw_tokens, hw_tokens, embed)),
        blocks=blocks,
        neck_conv1_w=w((embed, neck_chans)),
        neck_ln1_g=ones((neck_chans,)), neck_ln1_b=zeros((neck_chans,)),
        neck_conv2_w=w((3, 3, neck_chans, neck_chans)),
        neck_ln2_g=ones((neck_chans,)), neck_ln2_b=zeros((neck_chans,)),
        dec1_w=w((3, 3, neck_chans, dec_chans)), dec1_b=zeros((dec_chans,)),
        dec2_w=w((3, 3, dec_chans, dec_chans)), dec2_b=zeros((dec_chans,)),
        head_w=w((dec_chans, num_classes)), head_b=zeros((num_classes,)),
    )


def prepare_params(params, *, num_classes):
    """Repack PyTorch-style params into kernel-friendly (bf16 / stacked / padded) form."""
    bf = lambda a: a.astype(jnp.bfloat16)
    blocks = params["blocks"]
    depth = len(blocks)
    heads = blocks[0]["num_heads"]
    C = params["pe_w"].shape[1]
    Hp, Wp = params["pos_embed"].shape[1], params["pos_embed"].shape[2]

    stk = lambda name: jnp.stack([b[name] for b in blocks])
    stk_v = lambda name: jnp.stack([b[name].reshape(1, -1) for b in blocks])

    neck = params["neck_conv2_w"].shape[-1]
    dec = params["dec1_w"].shape[-1]

    head_w = np.zeros((dec, 128), np.float32)                 # lane-pad head to 128
    head_w[:, :num_classes] = np.asarray(params["head_w"])
    head_b = np.zeros((1, 128), np.float32)
    head_b[0, :num_classes] = np.asarray(params["head_b"])

    return dict(
        patch=params["patch"], depth=depth, num_heads=heads, num_classes=num_classes,
        pe_w=bf(params["pe_w"]), pe_b=params["pe_b"].reshape(1, -1),
        pos=params["pos_embed"].reshape(Hp * Wp, C),
        ln1_g=stk_v("ln1_g"), ln1_b=stk_v("ln1_b"),
        qkv_w=bf(stk("qkv_w")), qkv_b=stk_v("qkv_b"),
        proj_w=bf(stk("proj_w")), proj_b=stk_v("proj_b"),
        ln2_g=stk_v("ln2_g"), ln2_b=stk_v("ln2_b"),
        fc1_w=bf(stk("fc1_w")), fc1_b=stk_v("fc1_b"),
        fc2_w=bf(stk("fc2_w")), fc2_b=stk_v("fc2_b"),
        neck1_w=bf(params["neck_conv1_w"]),
        nln1_g=params["neck_ln1_g"].reshape(1, -1),
        nln1_b=params["neck_ln1_b"].reshape(1, -1),
        mask1=jnp.asarray(_conv_edge_masks(Hp, Wp)),
        neck2_w=bf(params["neck_conv2_w"].reshape(9, neck, neck)),
        nln2_g=params["neck_ln2_g"].reshape(1, -1),
        nln2_b=params["neck_ln2_b"].reshape(1, -1),
        dec1_w=bf(params["dec1_w"].reshape(9, neck, dec)),
        dec1_b=params["dec1_b"].reshape(1, -1),
        mask2=jnp.asarray(_conv_edge_masks(2 * Hp, 2 * Wp)),
        dec2_w=bf(params["dec2_w"].reshape(9, dec, dec)),
        dec2_b=params["dec2_b"].reshape(1, -1),
        head_w=jnp.asarray(head_w, jnp.bfloat16),
        head_b=jnp.asarray(head_b),
    )


# ----------------------------------- main ---------------------------------------

if __name__ == "__main__":
    key = jax.random.PRNGKey(0)
    kp, kx = jax.random.split(key)

    B, Cin, S = 2, 3, 32          # small SAM-style input (NCHW)
    num_classes = 4
    patch = 8
    params = make_params(kp, in_chans=Cin, patch=patch, num_classes=num_classes,
                         hw_tokens=S // patch)
    dp = prepare_params(params, num_classes=num_classes)
    x = jax.random.normal(kx, (B, Cin, S, S), dtype=jnp.float32)

    fwd = jax.jit(functools.partial(sam_feat_seg_forward, dp=dp))
    out = fwd(x)
    jax.block_until_ready(out)

    assert out.shape == (B, num_classes, S, S), out.shape
    assert bool(jnp.all(jnp.isfinite(out)))
    print("KERNEL_OK")
</pallas_src>

<mosaic_0001>
module attributes {stable_mosaic.version = 11 : i64} {
  func.func @_sam_feat_seg_kernel(%arg0: i32, %arg1: memref<1x16x192xf32, #tpu.memory_space<vmem>>, %arg2: memref<192x32xbf16, #tpu.memory_space<vmem>>, %arg3: memref<1x32xf32, #tpu.memory_space<vmem>>, %arg4: memref<16x32xf32, #tpu.memory_space<vmem>>, %arg5: memref<2x1x32xf32, #tpu.memory_space<vmem>>, %arg6: memref<2x1x32xf32, #tpu.memory_space<vmem>>, %arg7: memref<2x32x96xbf16, #tpu.memory_space<vmem>>, %arg8: memref<2x1x96xf32, #tpu.memory_space<vmem>>, %arg9: memref<2x32x32xbf16, #tpu.memory_space<vmem>>, %arg10: memref<2x1x32xf32, #tpu.memory_space<vmem>>, %arg11: memref<2x1x32xf32, #tpu.memory_space<vmem>>, %arg12: memref<2x1x32xf32, #tpu.memory_space<vmem>>, %arg13: memref<2x32x128xbf16, #tpu.memory_space<vmem>>, %arg14: memref<2x1x128xf32, #tpu.memory_space<vmem>>, %arg15: memref<2x128x32xbf16, #tpu.memory_space<vmem>>, %arg16: memref<2x1x32xf32, #tpu.memory_space<vmem>>, %arg17: memref<32x32xbf16, #tpu.memory_space<vmem>>, %arg18: memref<1x32xf32, #tpu.memory_space<vmem>>, %arg19: memref<1x32xf32, #tpu.memory_space<vmem>>, %arg20: memref<9x16x1xf32, #tpu.memory_space<vmem>>, %arg21: memref<9x32x32xbf16, #tpu.memory_space<vmem>>, %arg22: memref<1x32xf32, #tpu.memory_space<vmem>>, %arg23: memref<1x32xf32, #tpu.memory_space<vmem>>, %arg24: memref<9x32x16xbf16, #tpu.memory_space<vmem>>, %arg25: memref<1x16xf32, #tpu.memory_space<vmem>>, %arg26: memref<9x64x1xf32, #tpu.memory_space<vmem>>, %arg27: memref<9x16x16xbf16, #tpu.memory_space<vmem>>, %arg28: memref<1x16xf32, #tpu.memory_space<vmem>>, %arg29: memref<16x128xbf16, #tpu.memory_space<vmem>>, %arg30: memref<1x128xf32, #tpu.memory_space<vmem>>, %arg31: memref<1x64x128xf32, #tpu.memory_space<vmem>>) attributes {dimension_semantics = [#tpu.dimension_semantics<parallel>], iteration_bounds = array<i64: 2>, scalar_prefetch = 0 : i64, scratch_operands = 0 : i64, tpu.core_type = #tpu.core_type<tc>, window_params = [{transform_indices = @transform_0, window_bounds = array<i64: 1, 16, 192>}, {pipeline_mode = #tpu.pipeline_mode<synchronous>, transform_indices = @transform_1, window_bounds = array<i64: 192, 32>}, {pipeline_mode = #tpu.pipeline_mode<synchronous>, transform_indices = @transform_2, window_bounds = array<i64: 1, 32>}, {pipeline_mode = #tpu.pipeline_mode<synchronous>, transform_indices = @transform_3, window_bounds = array<i64: 16, 32>}, {pipeline_mode = #tpu.pipeline_mode<synchronous>, transform_indices = @transform_4, window_bounds = array<i64: 2, 1, 32>}, {pipeline_mode = #tpu.pipeline_mode<synchronous>, transform_indices = @transform_5, window_bounds = array<i64: 2, 1, 32>}, {pipeline_mode = #tpu.pipeline_mode<synchronous>, transform_indices = @transform_6, window_bounds = array<i64: 2, 32, 96>}, {pipeline_mode = #tpu.pipeline_mode<synchronous>, transform_indices = @transform_7, window_bounds = array<i64: 2, 1, 96>}, {pipeline_mode = #tpu.pipeline_mode<synchronous>, transform_indices = @transform_8, window_bounds = array<i64: 2, 32, 32>}, {pipeline_mode = #tpu.pipeline_mode<synchronous>, transform_indices = @transform_9, window_bounds = array<i64: 2, 1, 32>}, {pipeline_mode = #tpu.pipeline_mode<synchronous>, transform_indices = @transform_10, window_bounds = array<i64: 2, 1, 32>}, {pipeline_mode = #tpu.pipeline_mode<synchronous>, transform_indices = @transform_11, window_bounds = array<i64: 2, 1, 32>}, {pipeline_mode = #tpu.pipeline_mode<synchronous>, transform_indices = @transform_12, window_bounds = array<i64: 2, 32, 128>}, {pipeline_mode = #tpu.pipeline_mode<synchronous>, transform_indices = @transform_13, window_bounds = array<i64: 2, 1, 128>}, {pipeline_mode = #tpu.pipeline_mode<synchronous>, transform_indices = @transform_14, window_bounds = array<i64: 2, 128, 32>}, {pipeline_mode = #tpu.pipeline_mode<synchronous>, transform_indices = @transform_15, window_bounds = array<i64: 2, 1, 32>}, {pipeline_mode = #tpu.pipeline_mode<synchronous>, transform_indices = @transform_16, window_bounds = array<i64: 32, 32>}, {pipeline_mode = #tpu.pipeline_mode<synchronous>, transform_indices = @transform_17, window_bounds = array<i64: 1, 32>}, {pipeline_mode = #tpu.pipeline_mode<synchronous>, transform_indices = @transform_18, window_bounds = array<i64: 1, 32>}, {pipeline_mode = #tpu.pipeline_mode<synchronous>, transform_indices = @transform_19, window_bounds = array<i64: 9, 16, 1>}, {pipeline_mode = #tpu.pipeline_mode<synchronous>, transform_indices = @transform_20, window_bounds = array<i64: 9, 32, 32>}, {pipeline_mode = #tpu.pipeline_mode<synchronous>, transform_indices = @transform_21, window_bounds = array<i64: 1, 32>}, {pipeline_mode = #tpu.pipeline_mode<synchronous>, transform_indices = @transform_22, window_bounds = array<i64: 1, 32>}, {pipeline_mode = #tpu.pipeline_mode<synchronous>, transform_indices = @transform_23, window_bounds = array<i64: 9, 32, 16>}, {pipeline_mode = #tpu.pipeline_mode<synchronous>, transform_indices = @transform_24, window_bounds = array<i64: 1, 16>}, {pipeline_mode = #tpu.pipeline_mode<synchronous>, transform_indices = @transform_25, window_bounds = array<i64: 9, 64, 1>}, {pipeline_mode = #tpu.pipeline_mode<synchronous>, transform_indices = @transform_26, window_bounds = array<i64: 9, 16, 16>}, {pipeline_mode = #tpu.pipeline_mode<synchronous>, transform_indices = @transform_27, window_bounds = array<i64: 1, 16>}, {pipeline_mode = #tpu.pipeline_mode<synchronous>, transform_indices = @transform_28, window_bounds = array<i64: 16, 128>}, {pipeline_mode = #tpu.pipeline_mode<synchronous>, transform_indices = @transform_29, window_bounds = array<i64: 1, 128>}, {transform_indices = @transform_30, window_bounds = array<i64: 1, 64, 128>}]} {
    %c0 = arith.constant 0 : index
    %c0_0 = arith.constant 0 : index
    %c0_1 = arith.constant 0 : index
    %0 = vector.load %arg1[%c0, %c0_0, %c0_1] : memref<1x16x192xf32, #tpu.memory_space<vmem>>, vector<1x16x192xf32>
    %1 = vector.shape_cast %0 : vector<1x16x192xf32> to vector<16x192xf32>
    %2 = arith.truncf %1 : vector<16x192xf32> to vector<16x192xbf16>
    %c0_2 = arith.constant 0 : index
    %c0_3 = arith.constant 0 : index
    %3 = vector.load %arg2[%c0_2, %c0_3] : memref<192x32xbf16, #tpu.memory_space<vmem>>, vector<192x32xbf16>
    %cst = arith.constant dense<0.000000e+00> : vector<16x32xf32>
    %4 = tpu.matmul %2, %3, %cst {dimension_numbers = #tpu.dot_dimension_numbers<[1], [0], [0], [1], [0, 0, 1, 1], [], []>} : vector<16x192xbf16>, vector<192x32xbf16>, vector<16x32xf32> -> vector<16x32xf32>
    %c0_4 = arith.constant 0 : index
    %c0_5 = arith.constant 0 : index
    %5 = vector.load %arg3[%c0_4, %c0_5] : memref<1x32xf32, #tpu.memory_space<vmem>>, vector<1x32xf32>
    %6 = vector.broadcast %5 : vector<1x32xf32> to vector<16x32xf32>
    %7 = arith.addf %4, %6 : vector<16x32xf32>
    %c0_6 = arith.constant 0 : index
    %c0_7 = arith.constant 0 : index
    %8 = vector.load %arg4[%c0_6, %c0_7] : memref<16x32xf32, #tpu.memory_space<vmem>>, vector<16x32xf32>
    %9 = arith.addf %7, %8 : vector<16x32xf32>
    %c0_8 = arith.constant 0 : index
    %c0_9 = arith.constant 0 : index
    %c0_10 = arith.constant 0 : index
    %10 = vector.load %arg5[%c0_8, %c0_9, %c0_10] : memref<2x1x32xf32, #tpu.memory_space<vmem>>, vector<1x1x32xf32>
    %11 = vector.shape_cast %10 : vector<1x1x32xf32> to vector<1x32xf32>
    %c0_11 = arith.constant 0 : index
    %c0_12 = arith.constant 0 : index
    %c0_13 = arith.constant 0 : index
    %12 = vector.load %arg6[%c0_11, %c0_12, %c0_13] : memref<2x1x32xf32, #tpu.memory_space<vmem>>, vector<1x1x32xf32>
    %13 = vector.shape_cast %12 : vector<1x1x32xf32> to vector<1x32xf32>
    %cst_14 = arith.constant dense<0.000000e+00> : vector<16xf32>
    %14 = vector.multi_reduction <add>, %9, %cst_14 [1] : vector<16x32xf32> to vector<16xf32>
    %15 = vector.shape_cast %14 : vector<16xf32> to vector<16x1xf32>
    %cst_15 = arith.constant 3.200000e+01 : f32
    %16 = vector.broadcast %cst_15 : f32 to vector<16x1xf32>
    %17 = arith.divf %15, %16 : vector<16x1xf32>
    %18 = vector.broadcast %17 : vector<16x1xf32> to vector<16x32xf32>
    %19 = arith.subf %9, %18 : vector<16x32xf32>
    %20 = arith.mulf %19, %19 : vector<16x32xf32>
    %cst_16 = arith.constant dense<0.000000e+00> : vector<16xf32>
    %21 = vector.multi_reduction <add>, %20, %cst_16 [1] : vector<16x32xf32> to vector<16xf32>
    %22 = vector.shape_cast %21 : vector<16xf32> to vector<16x1xf32>
    %cst_17 = arith.constant 3.200000e+01 : f32
    %23 = vector.broadcast %cst_17 : f32 to vector<16x1xf32>
    %24 = arith.divf %22, %23 : vector<16x1xf32>
    %cst_18 = arith.constant 9.99999997E-7 : f32
    %25 = vector.broadcast %cst_18 : f32 to vector<16x1xf32>
    %26 = arith.addf %24, %25 : vector<16x1xf32>
    %27 = math.rsqrt %26 : vector<16x1xf32>
    %28 = vector.broadcast %27 : vector<16x1xf32> to vector<16x32xf32>
    %29 = arith.mulf %19, %28 : vector<16x32xf32>
    %30 = vector.broadcast %11 : vector<1x32xf32> to vector<16x32xf32>
    %31 = arith.mulf %29, %30 : vector<16x32xf32>
    %32 = vector.broadcast %13 : vector<1x32xf32> to vector<16x32xf32>
    %33 = arith.addf %31, %32 : vector<16x32xf32>
    %34 = arith.truncf %33 : vector<16x32xf32> to vector<16x32xbf16>
    %c0_19 = arith.constant 0 : index
    %c0_20 = arith.constant 0 : index
    %c0_21 = arith.constant 0 : index
    %35 = vector.load %arg7[%c0_19, %c0_20, %c0_21] : memref<2x32x96xbf16, #tpu.memory_space<vmem>>, vector<1x32x96xbf16>
    %36 = vector.shape_cast %35 : vector<1x32x96xbf16> to vector<32x96xbf16>
    %cst_22 = arith.constant dense<0.000000e+00> : vector<16x96xf32>
    %37 = tpu.matmul %34, %36, %cst_22 {dimension_numbers = #tpu.dot_dimension_numbers<[1], [0], [0], [1], [0, 0, 1, 1], [], []>} : vector<16x32xbf16>, vector<32x96xbf16>, vector<16x96xf32> -> vector<16x96xf32>
    %c0_23 = arith.constant 0 : index
    %c0_24 = arith.constant 0 : index
    %c0_25 = arith.constant 0 : index
    %38 = vector.load %arg8[%c0_23, %c0_24, %c0_25] : memref<2x1x96xf32, #tpu.memory_space<vmem>>, vector<1x1x96xf32>
    %39 = vector.shape_cast %38 : vector<1x1x96xf32> to vector<1x96xf32>
    %40 = vector.broadcast %39 : vector<1x96xf32> to vector<16x96xf32>
    %41 = arith.addf %37, %40 : vector<16x96xf32>
    %42 = arith.truncf %41 : vector<16x96xf32> to vector<16x96xbf16>
    %43 = vector.extract_strided_slice %42 {offsets = [0, 0], sizes = [16, 16], strides = [1, 1]} : vector<16x96xbf16> to vector<16x16xbf16>
    %44 = vector.extract_strided_slice %42 {offsets = [0, 32], sizes = [16, 16], strides = [1, 1]} : vector<16x96xbf16> to vector<16x16xbf16>
    %45 = vector.extract_strided_slice %42 {offsets = [0, 64], sizes = [16, 16], strides = [1, 1]} : vector<16x96xbf16> to vector<16x16xbf16>
    %cst_26 = arith.constant dense<0.000000e+00> : vector<16x16xf32>
    %46 = tpu.matmul %43, %44, %cst_26 {dimension_numbers = #tpu.dot_dimension_numbers<[1], [1], [0], [0], [0, 0, 1, 0], [], []>} : vector<16x16xbf16>, vector<16x16xbf16>, vector<16x16xf32> -> vector<16x16xf32>
    %cst_27 = arith.constant 2.500000e-01 : f32
    %47 = vector.broadcast %cst_27 : f32 to vector<16x16xf32>
    %48 = arith.mulf %46, %47 : vector<16x16xf32>
    %cst_28 = arith.constant dense<0xFF800000> : vector<16xf32>
    %49 = vector.multi_reduction <maximumf>, %48, %cst_28 [1] : vector<16x16xf32> to vector<16xf32>
    %50 = vector.shape_cast %49 : vector<16xf32> to vector<16x1xf32>
    %51 = vector.broadcast %50 : vector<16x1xf32> to vector<16x16xf32>
    %52 = arith.subf %48, %51 : vector<16x16xf32>
    %53 = math.exp %52 : vector<16x16xf32>
    %cst_29 = arith.constant dense<0.000000e+00> : vector<16xf32>
    %54 = vector.multi_reduction <add>, %53, %cst_29 [1] : vector<16x16xf32> to vector<16xf32>
    %55 = vector.shape_cast %54 : vector<16xf32> to vector<16x1xf32>
    %56 = tpu.reciprocal %55 {approx = true} : vector<16x1xf32> -> vector<16x1xf32>
    %57 = vector.broadcast %56 : vector<16x1xf32> to vector<16x16xf32>
    %58 = arith.mulf %53, %57 : vector<16x16xf32>
    %59 = arith.truncf %58 : vector<16x16xf32> to vector<16x16xbf16>
    %cst_30 = arith.constant dense<0.000000e+00> : vector<16x16xf32>
    %60 = tpu.matmul %59, %45, %cst_30 {dimension_numbers = #tpu.dot_dimension_numbers<[1], [0], [0], [1], [0, 0, 1, 1], [], []>} : vector<16x16xbf16>, vector<16x16xbf16>, vector<16x16xf32> -> vector<16x16xf32>
    %61 = vector.extract_strided_slice %42 {offsets = [0, 16], sizes = [16, 16], strides = [1, 1]} : vector<16x96xbf16> to vector<16x16xbf16>
    %62 = vector.extract_strided_slice %42 {offsets = [0, 48], sizes = [16, 16], strides = [1, 1]} : vector<16x96xbf16> to vector<16x16xbf16>
    %63 = vector.extract_strided_slice %42 {offsets = [0, 80], sizes = [16, 16], strides = [1, 1]} : vector<16x96xbf16> to vector<16x16xbf16>
    %cst_31 = arith.constant dense<0.000000e+00> : vector<16x16xf32>
    %64 = tpu.matmul %61, %62, %cst_31 {dimension_numbers = #tpu.dot_dimension_numbers<[1], [1], [0], [0], [0, 0, 1, 0], [], []>} : vector<16x16xbf16>, vector<16x16xbf16>, vector<16x16xf32> -> vector<16x16xf32>
    %cst_32 = arith.constant 2.500000e-01 : f32
    %65 = vector.broadcast %cst_32 : f32 to vector<16x16xf32>
    %66 = arith.mulf %64, %65 : vector<16x16xf32>
    %cst_33 = arith.constant dense<0xFF800000> : vector<16xf32>
    %67 = vector.multi_reduction <maximumf>, %66, %cst_33 [1] : vector<16x16xf32> to vector<16xf32>
    %68 = vector.shape_cast %67 : vector<16xf32> to vector<16x1xf32>
    %69 = vector.broadcast %68 : vector<16x1xf32> to vector<16x16xf32>
    %70 = arith.subf %66, %69 : vector<16x16xf32>
    %71 = math.exp %70 : vector<16x16xf32>
    %cst_34 = arith.constant dense<0.000000e+00> : vector<16xf32>
    %72 = vector.multi_reduction <add>, %71, %cst_34 [1] : vector<16x16xf32> to vector<16xf32>
    %73 = vector.shape_cast %72 : vector<16xf32> to vector<16x1xf32>
    %74 = tpu.reciprocal %73 {approx = true} : vector<16x1xf32> -> vector<16x1xf32>
    %75 = vector.broadcast %74 : vector<16x1xf32> to vector<16x16xf32>
    %76 = arith.mulf %71, %75 : vector<16x16xf32>
    %77 = arith.truncf %76 : vector<16x16xf32> to vector<16x16xbf16>
    %cst_35 = arith.constant dense<0.000000e+00> : vector<16x16xf32>
    %78 = tpu.matmul %77, %63, %cst_35 {dimension_numbers = #tpu.dot_dimension_numbers<[1], [0], [0], [1], [0, 0, 1, 1], [], []>} : vector<16x16xbf16>, vector<16x16xbf16>, vector<16x16xf32> -> vector<16x16xf32>
    %79 = tpu.concatenate %60, %78 in 1 : vector<16x16xf32>, vector<16x16xf32> -> vector<16x32xf32>
    %80 = arith.truncf %79 : vector<16x32xf32> to vector<16x32xbf16>
    %c0_36 = arith.constant 0 : index
    %c0_37 = arith.constant 0 : index
    %c0_38 = arith.constant 0 : index
    %81 = vector.load %arg9[%c0_36, %c0_37, %c0_38] : memref<2x32x32xbf16, #tpu.memory_space<vmem>>, vector<1x32x32xbf16>
    %82 = vector.shape_cast %81 : vector<1x32x32xbf16> to vector<32x32xbf16>
    %cst_39 = arith.constant dense<0.000000e+00> : vector<16x32xf32>
    %83 = tpu.matmul %80, %82, %cst_39 {dimension_numbers = #tpu.dot_dimension_numbers<[1], [0], [0], [1], [0, 0, 1, 1], [], []>} : vector<16x32xbf16>, vector<32x32xbf16>, vector<16x32xf32> -> vector<16x32xf32>
    %84 = arith.addf %9, %83 : vector<16x32xf32>
    %c0_40 = arith.constant 0 : index
    %c0_41 = arith.constant 0 : index
    %c0_42 = arith.constant 0 : index
    %85 = vector.load %arg10[%c0_40, %c0_41, %c0_42] : memref<2x1x32xf32, #tpu.memory_space<vmem>>, vector<1x1x32xf32>
    %86 = vector.shape_cast %85 : vector<1x1x32xf32> to vector<1x32xf32>
    %87 = vector.broadcast %86 : vector<1x32xf32> to vector<16x32xf32>
    %88 = arith.addf %84, %87 : vector<16x32xf32>
    %c0_43 = arith.constant 0 : index
    %c0_44 = arith.constant 0 : index
    %c0_45 = arith.constant 0 : index
    %89 = vector.load %arg11[%c0_43, %c0_44, %c0_45] : memref<2x1x32xf32, #tpu.memory_space<vmem>>, vector<1x1x32xf32>
    %90 = vector.shape_cast %89 : vector<1x1x32xf32> to vector<1x32xf32>
    %c0_46 = arith.constant 0 : index
    %c0_47 = arith.constant 0 : index
    %c0_48 = arith.constant 0 : index
    %91 = vector.load %arg12[%c0_46, %c0_47, %c0_48] : memref<2x1x32xf32, #tpu.memory_space<vmem>>, vector<1x1x32xf32>
    %92 = vector.shape_cast %91 : vector<1x1x32xf32> to vector<1x32xf32>
    %cst_49 = arith.constant dense<0.000000e+00> : vector<16xf32>
    %93 = vector.multi_reduction <add>, %88, %cst_49 [1] : vector<16x32xf32> to vector<16xf32>
    %94 = vector.shape_cast %93 : vector<16xf32> to vector<16x1xf32>
    %cst_50 = arith.constant 3.200000e+01 : f32
    %95 = vector.broadcast %cst_50 : f32 to vector<16x1xf32>
    %96 = arith.divf %94, %95 : vector<16x1xf32>
    %97 = vector.broadcast %96 : vector<16x1xf32> to vector<16x32xf32>
    %98 = arith.subf %88, %97 : vector<16x32xf32>
    %99 = arith.mulf %98, %98 : vector<16x32xf32>
    %cst_51 = arith.constant dense<0.000000e+00> : vector<16xf32>
    %100 = vector.multi_reduction <add>, %99, %cst_51 [1] : vector<16x32xf32> to vector<16xf32>
    %101 = vector.shape_cast %100 : vector<16xf32> to vector<16x1xf32>
    %cst_52 = arith.constant 3.200000e+01 : f32
    %102 = vector.broadcast %cst_52 : f32 to vector<16x1xf32>
    %103 = arith.divf %101, %102 : vector<16x1xf32>
    %cst_53 = arith.constant 9.99999997E-7 : f32
    %104 = vector.broadcast %cst_53 : f32 to vector<16x1xf32>
    %105 = arith.addf %103, %104 : vector<16x1xf32>
    %106 = math.rsqrt %105 : vector<16x1xf32>
    %107 = vector.broadcast %106 : vector<16x1xf32> to vector<16x32xf32>
    %108 = arith.mulf %98, %107 : vector<16x32xf32>
    %109 = vector.broadcast %90 : vector<1x32xf32> to vector<16x32xf32>
    %110 = arith.mulf %108, %109 : vector<16x32xf32>
    %111 = vector.broadcast %92 : vector<1x32xf32> to vector<16x32xf32>
    %112 = arith.addf %110, %111 : vector<16x32xf32>
    %113 = arith.truncf %112 : vector<16x32xf32> to vector<16x32xbf16>
    %c0_54 = arith.constant 0 : index
    %c0_55 = arith.constant 0 : index
    %c0_56 = arith.constant 0 : index
    %114 = vector.load %arg13[%c0_54, %c0_55, %c0_56] : memref<2x32x128xbf16, #tpu.memory_space<vmem>>, vector<1x32x128xbf16>
    %115 = vector.shape_cast %114 : vector<1x32x128xbf16> to vector<32x128xbf16>
    %cst_57 = arith.constant dense<0.000000e+00> : vector<16x128xf32>
    %116 = tpu.matmul %113, %115, %cst_57 {dimension_numbers = #tpu.dot_dimension_numbers<[1], [0], [0], [1], [0, 0, 1, 1], [], []>} : vector<16x32xbf16>, vector<32x128xbf16>, vector<16x128xf32> -> vector<16x128xf32>
    %c0_58 = arith.constant 0 : index
    %c0_59 = arith.constant 0 : index
    %c0_60 = arith.constant 0 : index
    %117 = vector.load %arg14[%c0_58, %c0_59, %c0_60] : memref<2x1x128xf32, #tpu.memory_space<vmem>>, vector<1x1x128xf32>
    %118 = vector.shape_cast %117 : vector<1x1x128xf32> to vector<1x128xf32>
    %119 = vector.broadcast %118 : vector<1x128xf32> to vector<16x128xf32>
    %120 = arith.addf %116, %119 : vector<16x128xf32>
    %121 = arith.mulf %120, %120 : vector<16x128xf32>
    %122 = arith.mulf %120, %121 : vector<16x128xf32>
    %cst_61 = arith.constant 4.471500e-02 : f32
    %123 = vector.broadcast %cst_61 : f32 to vector<16x128xf32>
    %124 = arith.mulf %123, %122 : vector<16x128xf32>
    %125 = arith.addf %120, %124 : vector<16x128xf32>
    %cst_62 = arith.constant 0.797884583 : f32
    %126 = vector.broadcast %cst_62 : f32 to vector<16x128xf32>
    %127 = arith.mulf %126, %125 : vector<16x128xf32>
    %128 = math.tanh %127 : vector<16x128xf32>
    %cst_63 = arith.constant 1.000000e+00 : f32
    %129 = vector.broadcast %cst_63 : f32 to vector<16x128xf32>
    %130 = arith.addf %129, %128 : vector<16x128xf32>
    %cst_64 = arith.constant 5.000000e-01 : f32
    %131 = vector.broadcast %cst_64 : f32 to vector<16x128xf32>
    %132 = arith.mulf %131, %130 : vector<16x128xf32>
    %133 = arith.mulf %120, %132 : vector<16x128xf32>
    %134 = arith.truncf %133 : vector<16x128xf32> to vector<16x128xbf16>
    %c0_65 = arith.constant 0 : index
    %c0_66 = arith.constant 0 : index
    %c0_67 = arith.constant 0 : index
    %135 = vector.load %arg15[%c0_65, %c0_66, %c0_67] : memref<2x128x32xbf16, #tpu.memory_space<vmem>>, vector<1x128x32xbf16>
    %136 = vector.shape_cast %135 : vector<1x128x32xbf16> to vector<128x32xbf16>
    %cst_68 = arith.constant dense<0.000000e+00> : vector<16x32xf32>
    %137 = tpu.matmul %134, %136, %cst_68 {dimension_numbers = #tpu.dot_dimension_numbers<[1], [0], [0], [1], [0, 0, 1, 1], [], []>} : vector<16x128xbf16>, vector<128x32xbf16>, vector<16x32xf32> -> vector<16x32xf32>
    %138 = arith.addf %88, %137 : vector<16x32xf32>
    %c0_69 = arith.constant 0 : index
    %c0_70 = arith.constant 0 : index
    %c0_71 = arith.constant 0 : index
    %139 = vector.load %arg16[%c0_69, %c0_70, %c0_71] : memref<2x1x32xf32, #tpu.memory_space<vmem>>, vector<1x1x32xf32>
    %140 = vector.shape_cast %139 : vector<1x1x32xf32> to vector<1x32xf32>
    %141 = vector.broadcast %140 : vector<1x32xf32> to vector<16x32xf32>
    %142 = arith.addf %138, %141 : vector<16x32xf32>
    %c1 = arith.constant 1 : index
    %c0_72 = arith.constant 0 : index
    %c0_73 = arith.constant 0 : index
    %143 = vector.load %arg5[%c1, %c0_72, %c0_73] : memref<2x1x32xf32, #tpu.memory_space<vmem>>, vector<1x1x32xf32>
    %144 = vector.shape_cast %143 : vector<1x1x32xf32> to vector<1x32xf32>
    %c1_74 = arith.constant 1 : index
    %c0_75 = arith.constant 0 : index
    %c0_76 = arith.constant 0 : index
    %145 = vector.load %arg6[%c1_74, %c0_75, %c0_76] : memref<2x1x32xf32, #tpu.memory_space<vmem>>, vector<1x1x32xf32>
    %146 = vector.shape_cast %145 : vector<1x1x32xf32> to vector<1x32xf32>
    %cst_77 = arith.constant dense<0.000000e+00> : vector<16xf32>
    %147 = vector.multi_reduction <add>, %142, %cst_77 [1] : vector<16x32xf32> to vector<16xf32>
    %148 = vector.shape_cast %147 : vector<16xf32> to vector<16x1xf32>
    %cst_78 = arith.constant 3.200000e+01 : f32
    %149 = vector.broadcast %cst_78 : f32 to vector<16x1xf32>
    %150 = arith.divf %148, %149 : vector<16x1xf32>
    %151 = vector.broadcast %150 : vector<16x1xf32> to vector<16x32xf32>
    %152 = arith.subf %142, %151 : vector<16x32xf32>
    %153 = arith.mulf %152, %152 : vector<16x32xf32>
    %cst_79 = arith.constant dense<0.000000e+00> : vector<16xf32>
    %154 = vector.multi_reduction <add>, %153, %cst_79 [1] : vector<16x32xf32> to vector<16xf32>
    %155 = vector.shape_cast %154 : vector<16xf32> to vector<16x1xf32>
    %cst_80 = arith.constant 3.200000e+01 : f32
    %156 = vector.broadcast %cst_80 : f32 to vector<16x1xf32>
    %157 = arith.divf %155, %156 : vector<16x1xf32>
    %cst_81 = arith.constant 9.99999997E-7 : f32
    %158 = vector.broadcast %cst_81 : f32 to vector<16x1xf32>
    %159 = arith.addf %157, %158 : vector<16x1xf32>
    %160 = math.rsqrt %159 : vector<16x1xf32>
    %161 = vector.broadcast %160 : vector<16x1xf32> to vector<16x32xf32>
    %162 = arith.mulf %152, %161 : vector<16x32xf32>
    %163 = vector.broadcast %144 : vector<1x32xf32> to vector<16x32xf32>
    %164 = arith.mulf %162, %163 : vector<16x32xf32>
    %165 = vector.broadcast %146 : vector<1x32xf32> to vector<16x32xf32>
    %166 = arith.addf %164, %165 : vector<16x32xf32>
    %167 = arith.truncf %166 : vector<16x32xf32> to vector<16x32xbf16>
    %c1_82 = arith.constant 1 : index
    %c0_83 = arith.constant 0 : index
    %c0_84 = arith.constant 0 : index
    %168 = vector.load %arg7[%c1_82, %c0_83, %c0_84] : memref<2x32x96xbf16, #tpu.memory_space<vmem>>, vector<1x32x96xbf16>
    %169 = vector.shape_cast %168 : vector<1x32x96xbf16> to vector<32x96xbf16>
    %cst_85 = arith.constant dense<0.000000e+00> : vector<16x96xf32>
    %170 = tpu.matmul %167, %169, %cst_85 {dimension_numbers = #tpu.dot_dimension_numbers<[1], [0], [0], [1], [0, 0, 1, 1], [], []>} : vector<16x32xbf16>, vector<32x96xbf16>, vector<16x96xf32> -> vector<16x96xf32>
    %c1_86 = arith.constant 1 : index
    %c0_87 = arith.constant 0 : index
    %c0_88 = arith.constant 0 : index
    %171 = vector.load %arg8[%c1_86, %c0_87, %c0_88] : memref<2x1x96xf32, #tpu.memory_space<vmem>>, vector<1x1x96xf32>
    %172 = vector.shape_cast %171 : vector<1x1x96xf32> to vector<1x96xf32>
    %173 = vector.broadcast %172 : vector<1x96xf32> to vector<16x96xf32>
    %174 = arith.addf %170, %173 : vector<16x96xf32>
    %175 = arith.truncf %174 : vector<16x96xf32> to vector<16x96xbf16>
    %176 = vector.extract_strided_slice %175 {offsets = [0, 0], sizes = [16, 16], strides = [1, 1]} : vector<16x96xbf16> to vector<16x16xbf16>
    %177 = vector.extract_strided_slice %175 {offsets = [0, 32], sizes = [16, 16], strides = [1, 1]} : vector<16x96xbf16> to vector<16x16xbf16>
    %178 = vector.extract_strided_slice %175 {offsets = [0, 64], sizes = [16, 16], strides = [1, 1]} : vector<16x96xbf16> to vector<16x16xbf16>
    %cst_89 = arith.constant dense<0.000000e+00> : vector<16x16xf32>
    %179 = tpu.matmul %176, %177, %cst_89 {dimension_numbers = #tpu.dot_dimension_numbers<[1], [1], [0], [0], [0, 0, 1, 0], [], []>} : vector<16x16xbf16>, vector<16x16xbf16>, vector<16x16xf32> -> vector<16x16xf32>
    %cst_90 = arith.constant 2.500000e-01 : f32
    %180 = vector.broadcast %cst_90 : f32 to vector<16x16xf32>
    %181 = arith.mulf %179, %180 : vector<16x16xf32>
    %cst_91 = arith.constant dense<0xFF800000> : vector<16xf32>
    %182 = vector.multi_reduction <maximumf>, %181, %cst_91 [1] : vector<16x16xf32> to vector<16xf32>
    %183 = vector.shape_cast %182 : vector<16xf32> to vector<16x1xf32>
    %184 = vector.broadcast %183 : vector<16x1xf32> to vector<16x16xf32>
    %185 = arith.subf %181, %184 : vector<16x16xf32>
    %186 = math.exp %185 : vector<16x16xf32>
    %cst_92 = arith.constant dense<0.000000e+00> : vector<16xf32>
    %187 = vector.multi_reduction <add>, %186, %cst_92 [1] : vector<16x16xf32> to vector<16xf32>
    %188 = vector.shape_cast %187 : vector<16xf32> to vector<16x1xf32>
    %189 = tpu.reciprocal %188 {approx = true} : vector<16x1xf32> -> vector<16x1xf32>
    %190 = vector.broadcast %189 : vector<16x1xf32> to vector<16x16xf32>
    %191 = arith.mulf %186, %190 : vector<16x16xf32>
    %192 = arith.truncf %191 : vector<16x16xf32> to vector<16x16xbf16>
    %cst_93 = arith.constant dense<0.000000e+00> : vector<16x16xf32>
    %193 = tpu.matmul %192, %178, %cst_93 {dimension_numbers = #tpu.dot_dimension_numbers<[1], [0], [0], [1], [0, 0, 1, 1], [], []>} : vector<16x16xbf16>, vector<16x16xbf16>, vector<16x16xf32> -> vector<16x16xf32>
    %194 = vector.extract_strided_slice %175 {offsets = [0, 16], sizes = [16, 16], strides = [1, 1]} : vector<16x96xbf16> to vector<16x16xbf16>
    %195 = vector.extract_strided_slice %175 {offsets = [0, 48], sizes = [16, 16], strides = [1, 1]} : vector<16x96xbf16> to vector<16x16xbf16>
    %196 = vector.extract_strided_slice %175 {offsets = [0, 80], sizes = [16, 16], strides = [1, 1]} : vector<16x96xbf16> to vector<16x16xbf16>
    %cst_94 = arith.constant dense<0.000000e+00> : vector<16x16xf32>
    %197 = tpu.matmul %194, %195, %cst_94 {dimension_numbers = #tpu.dot_dimension_numbers<[1], [1], [0], [0], [0, 0, 1, 0], [], []>} : vector<16x16xbf16>, vector<16x16xbf16>, vector<16x16xf32> -> vector<16x16xf32>
    %cst_95 = arith.constant 2.500000e-01 : f32
    %198 = vector.broadcast %cst_95 : f32 to vector<16x16xf32>
    %199 = arith.mulf %197, %198 : vector<16x16xf32>
    %cst_96 = arith.constant dense<0xFF800000> : vector<16xf32>
    %200 = vector.multi_reduction <maximumf>, %199, %cst_96 [1] : vector<16x16xf32> to vector<16xf32>
    %201 = vector.shape_cast %200 : vector<16xf32> to vector<16x1xf32>
    %202 = vector.broadcast %201 : vector<16x1xf32> to vector<16x16xf32>
    %203 = arith.subf %199, %202 : vector<16x16xf32>
    %204 = math.exp %203 : vector<16x16xf32>
    %cst_97 = arith.constant dense<0.000000e+00> : vector<16xf32>
    %205 = vector.multi_reduction <add>, %204, %cst_97 [1] : vector<16x16xf32> to vector<16xf32>
    %206 = vector.shape_cast %205 : vector<16xf32> to vector<16x1xf32>
    %207 = tpu.reciprocal %206 {approx = true} : vector<16x1xf32> -> vector<16x1xf32>
    %208 = vector.broadcast %207 : vector<16x1xf32> to vector<16x16xf32>
    %209 = arith.mulf %204, %208 : vector<16x16xf32>
    %210 = arith.truncf %209 : vector<16x16xf32> to vector<16x16xbf16>
    %cst_98 = arith.constant dense<0.000000e+00> : vector<16x16xf32>
    %211 = tpu.matmul %210, %196, %cst_98 {dimension_numbers = #tpu.dot_dimension_numbers<[1], [0], [0], [1], [0, 0, 1, 1], [], []>} : vector<16x16xbf16>, vector<16x16xbf16>, vector<16x16xf32> -> vector<16x16xf32>
    %212 = tpu.concatenate %193, %211 in 1 : vector<16x16xf32>, vector<16x16xf32> -> vector<16x32xf32>
    %213 = arith.truncf %212 : vector<16x32xf32> to vector<16x32xbf16>
    %c1_99 = arith.constant 1 : index
    %c0_100 = arith.constant 0 : index
    %c0_101 = arith.constant 0 : index
    %214 = vector.load %arg9[%c1_99, %c0_100, %c0_101] : memref<2x32x32xbf16, #tpu.memory_space<vmem>>, vector<1x32x32xbf16>
    %215 = vector.shape_cast %214 : vector<1x32x32xbf16> to vector<32x32xbf16>
    %cst_102 = arith.constant dense<0.000000e+00> : vector<16x32xf32>
    %216 = tpu.matmul %213, %215, %cst_102 {dimension_numbers = #tpu.dot_dimension_numbers<[1], [0], [0], [1], [0, 0, 1, 1], [], []>} : vector<16x32xbf16>, vector<32x32xbf16>, vector<16x32xf32> -> vector<16x32xf32>
    %217 = arith.addf %142, %216 : vector<16x32xf32>
    %c1_103 = arith.constant 1 : index
    %c0_104 = arith.constant 0 : index
    %c0_105 = arith.constant 0 : index
    %218 = vector.load %arg10[%c1_103, %c0_104, %c0_105] : memref<2x1x32xf32, #tpu.memory_space<vmem>>, vector<1x1x32xf32>
    %219 = vector.shape_cast %218 : vector<1x1x32xf32> to vector<1x32xf32>
    %220 = vector.broadcast %219 : vector<1x32xf32> to vector<16x32xf32>
    %221 = arith.addf %217, %220 : vector<16x32xf32>
    %c1_106 = arith.constant 1 : index
    %c0_107 = arith.constant 0 : index
    %c0_108 = arith.constant 0 : index
    %222 = vector.load %arg11[%c1_106, %c0_107, %c0_108] : memref<2x1x32xf32, #tpu.memory_space<vmem>>, vector<1x1x32xf32>
    %223 = vector.shape_cast %222 : vector<1x1x32xf32> to vector<1x32xf32>
    %c1_109 = arith.constant 1 : index
    %c0_110 = arith.constant 0 : index
    %c0_111 = arith.constant 0 : index
    %224 = vector.load %arg12[%c1_109, %c0_110, %c0_111] : memref<2x1x32xf32, #tpu.memory_space<vmem>>, vector<1x1x32xf32>
    %225 = vector.shape_cast %224 : vector<1x1x32xf32> to vector<1x32xf32>
    %cst_112 = arith.constant dense<0.000000e+00> : vector<16xf32>
    %226 = vector.multi_reduction <add>, %221, %cst_112 [1] : vector<16x32xf32> to vector<16xf32>
    %227 = vector.shape_cast %226 : vector<16xf32> to vector<16x1xf32>
    %cst_113 = arith.constant 3.200000e+01 : f32
    %228 = vector.broadcast %cst_113 : f32 to vector<16x1xf32>
    %229 = arith.divf %227, %228 : vector<16x1xf32>
    %230 = vector.broadcast %229 : vector<16x1xf32> to vector<16x32xf32>
    %231 = arith.subf %221, %230 : vector<16x32xf32>
    %232 = arith.mulf %231, %231 : vector<16x32xf32>
    %cst_114 = arith.constant dense<0.000000e+00> : vector<16xf32>
    %233 = vector.multi_reduction <add>, %232, %cst_114 [1] : vector<16x32xf32> to vector<16xf32>
    %234 = vector.shape_cast %233 : vector<16xf32> to vector<16x1xf32>
    %cst_115 = arith.constant 3.200000e+01 : f32
    %235 = vector.broadcast %cst_115 : f32 to vector<16x1xf32>
    %236 = arith.divf %234, %235 : vector<16x1xf32>
    %cst_116 = arith.constant 9.99999997E-7 : f32
    %237 = vector.broadcast %cst_116 : f32 to vector<16x1xf32>
    %238 = arith.addf %236, %237 : vector<16x1xf32>
    %239 = math.rsqrt %238 : vector<16x1xf32>
    %240 = vector.broadcast %239 : vector<16x1xf32> to vector<16x32xf32>
    %241 = arith.mulf %231, %240 : vector<16x32xf32>
    %242 = vector.broadcast %223 : vector<1x32xf32> to vector<16x32xf32>
    %243 = arith.mulf %241, %242 : vector<16x32xf32>
    %244 = vector.broadcast %225 : vector<1x32xf32> to vector<16x32xf32>
    %245 = arith.addf %243, %244 : vector<16x32xf32>
    %246 = arith.truncf %245 : vector<16x32xf32> to vector<16x32xbf16>
    %c1_117 = arith.constant 1 : index
    %c0_118 = arith.constant 0 : index
    %c0_119 = arith.constant 0 : index
    %247 = vector.load %arg13[%c1_117, %c0_118, %c0_119] : memref<2x32x128xbf16, #tpu.memory_space<vmem>>, vector<1x32x128xbf16>
    %248 = vector.shape_cast %247 : vector<1x32x128xbf16> to vector<32x128xbf16>
    %cst_120 = arith.constant dense<0.000000e+00> : vector<16x128xf32>
    %249 = tpu.matmul %246, %248, %cst_120 {dimension_numbers = #tpu.dot_dimension_numbers<[1], [0], [0], [1], [0, 0, 1, 1], [], []>} : vector<16x32xbf16>, vector<32x128xbf16>, vector<16x128xf32> -> vector<16x128xf32>
    %c1_121 = arith.constant 1 : index
    %c0_122 = arith.constant 0 : index
    %c0_123 = arith.constant 0 : index
    %250 = vector.load %arg14[%c1_121, %c0_122, %c0_123] : memref<2x1x128xf32, #tpu.memory_space<vmem>>, vector<1x1x128xf32>
    %251 = vector.shape_cast %250 : vector<1x1x128xf32> to vector<1x128xf32>
    %252 = vector.broadcast %251 : vector<1x128xf32> to vector<16x128xf32>
    %253 = arith.addf %249, %252 : vector<16x128xf32>
    %254 = arith.mulf %253, %253 : vector<16x128xf32>
    %255 = arith.mulf %253, %254 : vector<16x128xf32>
    %cst_124 = arith.constant 4.471500e-02 : f32
    %256 = vector.broadcast %cst_124 : f32 to vector<16x128xf32>
    %257 = arith.mulf %256, %255 : vector<16x128xf32>
    %258 = arith.addf %253, %257 : vector<16x128xf32>
    %cst_125 = arith.constant 0.797884583 : f32
    %259 = vector.broadcast %cst_125 : f32 to vector<16x128xf32>
    %260 = arith.mulf %259, %258 : vector<16x128xf32>
    %261 = math.tanh %260 : vector<16x128xf32>
    %cst_126 = arith.constant 1.000000e+00 : f32
    %262 = vector.broadcast %cst_126 : f32 to vector<16x128xf32>
    %263 = arith.addf %262, %261 : vector<16x128xf32>
    %cst_127 = arith.constant 5.000000e-01 : f32
    %264 = vector.broadcast %cst_127 : f32 to vector<16x128xf32>
    %265 = arith.mulf %264, %263 : vector<16x128xf32>
    %266 = arith.mulf %253, %265 : vector<16x128xf32>
    %267 = arith.truncf %266 : vector<16x128xf32> to vector<16x128xbf16>
    %c1_128 = arith.constant 1 : index
    %c0_129 = arith.constant 0 : index
    %c0_130 = arith.constant 0 : index
    %268 = vector.load %arg15[%c1_128, %c0_129, %c0_130] : memref<2x128x32xbf16, #tpu.memory_space<vmem>>, vector<1x128x32xbf16>
    %269 = vector.shape_cast %268 : vector<1x128x32xbf16> to vector<128x32xbf16>
    %cst_131 = arith.constant dense<0.000000e+00> : vector<16x32xf32>
    %270 = tpu.matmul %267, %269, %cst_131 {dimension_numbers = #tpu.dot_dimension_numbers<[1], [0], [0], [1], [0, 0, 1, 1], [], []>} : vector<16x128xbf16>, vector<128x32xbf16>, vector<16x32xf32> -> vector<16x32xf32>
    %271 = arith.addf %221, %270 : vector<16x32xf32>
    %c1_132 = arith.constant 1 : index
    %c0_133 = arith.constant 0 : index
    %c0_134 = arith.constant 0 : index
    %272 = vector.load %arg16[%c1_132, %c0_133, %c0_134] : memref<2x1x32xf32, #tpu.memory_space<vmem>>, vector<1x1x32xf32>
    %273 = vector.shape_cast %272 : vector<1x1x32xf32> to vector<1x32xf32>
    %274 = vector.broadcast %273 : vector<1x32xf32> to vector<16x32xf32>
    %275 = arith.addf %271, %274 : vector<16x32xf32>
    %276 = arith.truncf %275 : vector<16x32xf32> to vector<16x32xbf16>
    %c0_135 = arith.constant 0 : index
    %c0_136 = arith.constant 0 : index
    %277 = vector.load %arg17[%c0_135, %c0_136] : memref<32x32xbf16, #tpu.memory_space<vmem>>, vector<32x32xbf16>
    %cst_137 = arith.constant dense<0.000000e+00> : vector<16x32xf32>
    %278 = tpu.matmul %276, %277, %cst_137 {dimension_numbers = #tpu.dot_dimension_numbers<[1], [0], [0], [1], [0, 0, 1, 1], [], []>} : vector<16x32xbf16>, vector<32x32xbf16>, vector<16x32xf32> -> vector<16x32xf32>
    %c0_138 = arith.constant 0 : index
    %c0_139 = arith.constant 0 : index
    %279 = vector.load %arg18[%c0_138, %c0_139] : memref<1x32xf32, #tpu.memory_space<vmem>>, vector<1x32xf32>
    %c0_140 = arith.constant 0 : index
    %c0_141 = arith.constant 0 : index
    %280 = vector.load %arg19[%c0_140, %c0_141] : memref<1x32xf32, #tpu.memory_space<vmem>>, vector<1x32xf32>
    %cst_142 = arith.constant dense<0.000000e+00> : vector<16xf32>
    %281 = vector.multi_reduction <add>, %278, %cst_142 [1] : vector<16x32xf32> to vector<16xf32>
    %282 = vector.shape_cast %281 : vector<16xf32> to vector<16x1xf32>
    %cst_143 = arith.constant 3.200000e+01 : f32
    %283 = vector.broadcast %cst_143 : f32 to vector<16x1xf32>
    %284 = arith.divf %282, %283 : vector<16x1xf32>
    %285 = vector.broadcast %284 : vector<16x1xf32> to vector<16x32xf32>
    %286 = arith.subf %278, %285 : vector<16x32xf32>
    %287 = arith.mulf %286, %286 : vector<16x32xf32>
    %cst_144 = arith.constant dense<0.000000e+00> : vector<16xf32>
    %288 = vector.multi_reduction <add>, %287, %cst_144 [1] : vector<16x32xf32> to vector<16xf32>
    %289 = vector.shape_cast %288 : vector<16xf32> to vector<16x1xf32>
    %cst_145 = arith.constant 3.200000e+01 : f32
    %290 = vector.broadcast %cst_145 : f32 to vector<16x1xf32>
    %291 = arith.divf %289, %290 : vector<16x1xf32>
    %cst_146 = arith.constant 9.99999997E-7 : f32
    %292 = vector.broadcast %cst_146 : f32 to vector<16x1xf32>
    %293 = arith.addf %291, %292 : vector<16x1xf32>
    %294 = math.rsqrt %293 : vector<16x1xf32>
    %295 = vector.broadcast %294 : vector<16x1xf32> to vector<16x32xf32>
    %296 = arith.mulf %286, %295 : vector<16x32xf32>
    %297 = vector.broadcast %279 : vector<1x32xf32> to vector<16x32xf32>
    %298 = arith.mulf %296, %297 : vector<16x32xf32>
    %299 = vector.broadcast %280 : vector<1x32xf32> to vector<16x32xf32>
    %300 = arith.addf %298, %299 : vector<16x32xf32>
    %c5_i32 = arith.constant 5 : i32
    %301 = tpu.dynamic_rotate %300 by %c5_i32 dim 0 : vector<16x32xf32>, i32 -> vector<16x32xf32>
    %c0_147 = arith.constant 0 : index
    %c0_148 = arith.constant 0 : index
    %c0_149 = arith.constant 0 : index
    %302 = vector.load %arg20[%c0_147, %c0_148, %c0_149] : memref<9x16x1xf32, #tpu.memory_space<vmem>>, vector<1x16x1xf32>
    %303 = vector.shape_cast %302 : vector<1x16x1xf32> to vector<16x1xf32>
    %304 = vector.broadcast %303 : vector<16x1xf32> to vector<16x32xf32>
    %305 = arith.mulf %301, %304 : vector<16x32xf32>
    %306 = arith.truncf %305 : vector<16x32xf32> to vector<16x32xbf16>
    %c0_150 = arith.constant 0 : index
    %c0_151 = arith.constant 0 : index
    %c0_152 = arith.constant 0 : index
    %307 = vector.load %arg21[%c0_150, %c0_151, %c0_152] : memref<9x32x32xbf16, #tpu.memory_space<vmem>>, vector<1x32x32xbf16>
    %308 = vector.shape_cast %307 : vector<1x32x32xbf16> to vector<32x32xbf16>
    %cst_153 = arith.constant dense<0.000000e+00> : vector<16x32xf32>
    %309 = tpu.matmul %306, %308, %cst_153 {dimension_numbers = #tpu.dot_dimension_numbers<[1], [0], [0], [1], [0, 0, 1, 1], [], []>} : vector<16x32xbf16>, vector<32x32xbf16>, vector<16x32xf32> -> vector<16x32xf32>
    %c4_i32 = arith.constant 4 : i32
    %310 = tpu.dynamic_rotate %300 by %c4_i32 dim 0 : vector<16x32xf32>, i32 -> vector<16x32xf32>
    %c1_154 = arith.constant 1 : index
    %c0_155 = arith.constant 0 : index
    %c0_156 = arith.constant 0 : index
    %311 = vector.load %arg20[%c1_154, %c0_155, %c0_156] : memref<9x16x1xf32, #tpu.memory_space<vmem>>, vector<1x16x1xf32>
    %312 = vector.shape_cast %311 : vector<1x16x1xf32> to vector<16x1xf32>
    %313 = vector.broadcast %312 : vector<16x1xf32> to vector<16x32xf32>
    %314 = arith.mulf %310, %313 : vector<16x32xf32>
    %315 = arith.truncf %314 : vector<16x32xf32> to vector<16x32xbf16>
    %c1_157 = arith.constant 1 : index
    %c0_158 = arith.constant 0 : index
    %c0_159 = arith.constant 0 : index
    %316 = vector.load %arg21[%c1_157, %c0_158, %c0_159] : memref<9x32x32xbf16, #tpu.memory_space<vmem>>, vector<1x32x32xbf16>
    %317 = vector.shape_cast %316 : vector<1x32x32xbf16> to vector<32x32xbf16>
    %cst_160 = arith.constant dense<0.000000e+00> : vector<16x32xf32>
    %318 = tpu.matmul %315, %317, %cst_160 {dimension_numbers = #tpu.dot_dimension_numbers<[1], [0], [0], [1], [0, 0, 1, 1], [], []>} : vector<16x32xbf16>, vector<32x32xbf16>, vector<16x32xf32> -> vector<16x32xf32>
    %319 = arith.addf %309, %318 : vector<16x32xf32>
    %c3_i32 = arith.constant 3 : i32
    %320 = tpu.dynamic_rotate %300 by %c3_i32 dim 0 : vector<16x32xf32>, i32 -> vector<16x32xf32>
    %c2 = arith.constant 2 : index
    %c0_161 = arith.constant 0 : index
    %c0_162 = arith.constant 0 : index
    %321 = vector.load %arg20[%c2, %c0_161, %c0_162] : memref<9x16x1xf32, #tpu.memory_space<vmem>>, vector<1x16x1xf32>
    %322 = vector.shape_cast %321 : vector<1x16x1xf32> to vector<16x1xf32>
    %323 = vector.broadcast %322 : vector<16x1xf32> to vector<16x32xf32>
    %324 = arith.mulf %320, %323 : vector<16x32xf32>
    %325 = arith.truncf %324 : vector<16x32xf32> to vector<16x32xbf16>
    %c2_163 = arith.constant 2 : index
    %c0_164 = arith.constant 0 : index
    %c0_165 = arith.constant 0 : index
    %326 = vector.load %arg21[%c2_163, %c0_164, %c0_165] : memref<9x32x32xbf16, #tpu.memory_space<vmem>>, vector<1x32x32xbf16>
    %327 = vector.shape_cast %326 : vector<1x32x32xbf16> to vector<32x32xbf16>
    %cst_166 = arith.constant dense<0.000000e+00> : vector<16x32xf32>
    %328 = tpu.matmul %325, %327, %cst_166 {dimension_numbers = #tpu.dot_dimension_numbers<[1], [0], [0], [1], [0, 0, 1, 1], [], []>} : vector<16x32xbf16>, vector<32x32xbf16>, vector<16x32xf32> -> vector<16x32xf32>
    %329 = arith.addf %319, %328 : vector<16x32xf32>
    %c1_i32 = arith.constant 1 : i32
    %330 = tpu.dynamic_rotate %300 by %c1_i32 dim 0 : vector<16x32xf32>, i32 -> vector<16x32xf32>
    %c3 = arith.constant 3 : index
    %c0_167 = arith.constant 0 : index
    %c0_168 = arith.constant 0 : index
    %331 = vector.load %arg20[%c3, %c0_167, %c0_168] : memref<9x16x1xf32, #tpu.memory_space<vmem>>, vector<1x16x1xf32>
    %332 = vector.shape_cast %331 : vector<1x16x1xf32> to vector<16x1xf32>
    %333 = vector.broadcast %332 : vector<16x1xf32> to vector<16x32xf32>
    %334 = arith.mulf %330, %333 : vector<16x32xf32>
    %335 = arith.truncf %334 : vector<16x32xf32> to vector<16x32xbf16>
    %c3_169 = arith.constant 3 : index
    %c0_170 = arith.constant 0 : index
    %c0_171 = arith.constant 0 : index
    %336 = vector.load %arg21[%c3_169, %c0_170, %c0_171] : memref<9x32x32xbf16, #tpu.memory_space<vmem>>, vector<1x32x32xbf16>
    %337 = vector.shape_cast %336 : vector<1x32x32xbf16> to vector<32x32xbf16>
    %cst_172 = arith.constant dense<0.000000e+00> : vector<16x32xf32>
    %338 = tpu.matmul %335, %337, %cst_172 {dimension_numbers = #tpu.dot_dimension_numbers<[1], [0], [0], [1], [0, 0, 1, 1], [], []>} : vector<16x32xbf16>, vector<32x32xbf16>, vector<16x32xf32> -> vector<16x32xf32>
    %339 = arith.addf %329, %338 : vector<16x32xf32>
    %c4 = arith.constant 4 : index
    %c0_173 = arith.constant 0 : index
    %c0_174 = arith.constant 0 : index
    %340 = vector.load %arg20[%c4, %c0_173, %c0_174] : memref<9x16x1xf32, #tpu.memory_space<vmem>>, vector<1x16x1xf32>
    %341 = vector.shape_cast %340 : vector<1x16x1xf32> to vector<16x1xf32>
    %342 = vector.broadcast %341 : vector<16x1xf32> to vector<16x32xf32>
    %343 = arith.mulf %300, %342 : vector<16x32xf32>
    %344 = arith.truncf %343 : vector<16x32xf32> to vector<16x32xbf16>
    %c4_175 = arith.constant 4 : index
    %c0_176 = arith.constant 0 : index
    %c0_177 = arith.constant 0 : index
    %345 = vector.load %arg21[%c4_175, %c0_176, %c0_177] : memref<9x32x32xbf16, #tpu.memory_space<vmem>>, vector<1x32x32xbf16>
    %346 = vector.shape_cast %345 : vector<1x32x32xbf16> to vector<32x32xbf16>
    %cst_178 = arith.constant dense<0.000000e+00> : vector<16x32xf32>
    %347 = tpu.matmul %344, %346, %cst_178 {dimension_numbers = #tpu.dot_dimension_numbers<[1], [0], [0], [1], [0, 0, 1, 1], [], []>} : vector<16x32xbf16>, vector<32x32xbf16>, vector<16x32xf32> -> vector<16x32xf32>
    %348 = arith.addf %339, %347 : vector<16x32xf32>
    %c15_i32 = arith.constant 15 : i32
    %349 = tpu.dynamic_rotate %300 by %c15_i32 dim 0 : vector<16x32xf32>, i32 -> vector<16x32xf32>
    %c5 = arith.constant 5 : index
    %c0_179 = arith.constant 0 : index
    %c0_180 = arith.constant 0 : index
    %350 = vector.load %arg20[%c5, %c0_179, %c0_180] : memref<9x16x1xf32, #tpu.memory_space<vmem>>, vector<1x16x1xf32>
    %351 = vector.shape_cast %350 : vector<1x16x1xf32> to vector<16x1xf32>
    %352 = vector.broadcast %351 : vector<16x1xf32> to vector<16x32xf32>
    %353 = arith.mulf %349, %352 : vector<16x32xf32>
    %354 = arith.truncf %353 : vector<16x32xf32> to vector<16x32xbf16>
    %c5_181 = arith.constant 5 : index
    %c0_182 = arith.constant 0 : index
    %c0_183 = arith.constant 0 : index
    %355 = vector.load %arg21[%c5_181, %c0_182, %c0_183] : memref<9x32x32xbf16, #tpu.memory_space<vmem>>, vector<1x32x32xbf16>
    %356 = vector.shape_cast %355 : vector<1x32x32xbf16> to vector<32x32xbf16>
    %cst_184 = arith.constant dense<0.000000e+00> : vector<16x32xf32>
    %357 = tpu.matmul %354, %356, %cst_184 {dimension_numbers = #tpu.dot_dimension_numbers<[1], [0], [0], [1], [0, 0, 1, 1], [], []>} : vector<16x32xbf16>, vector<32x32xbf16>, vector<16x32xf32> -> vector<16x32xf32>
    %358 = arith.addf %348, %357 : vector<16x32xf32>
    %c13_i32 = arith.constant 13 : i32
    %359 = tpu.dynamic_rotate %300 by %c13_i32 dim 0 : vector<16x32xf32>, i32 -> vector<16x32xf32>
    %c6 = arith.constant 6 : index
    %c0_185 = arith.constant 0 : index
    %c0_186 = arith.constant 0 : index
    %360 = vector.load %arg20[%c6, %c0_185, %c0_186] : memref<9x16x1xf32, #tpu.memory_space<vmem>>, vector<1x16x1xf32>
    %361 = vector.shape_cast %360 : vector<1x16x1xf32> to vector<16x1xf32>
    %362 = vector.broadcast %361 : vector<16x1xf32> to vector<16x32xf32>
    %363 = arith.mulf %359, %362 : vector<16x32xf32>
    %364 = arith.truncf %363 : vector<16x32xf32> to vector<16x32xbf16>
    %c6_187 = arith.constant 6 : index
    %c0_188 = arith.constant 0 : index
    %c0_189 = arith.constant 0 : index
    %365 = vector.load %arg21[%c6_187, %c0_188, %c0_189] : memref<9x32x32xbf16, #tpu.memory_space<vmem>>, vector<1x32x32xbf16>
    %366 = vector.shape_cast %365 : vector<1x32x32xbf16> to vector<32x32xbf16>
    %cst_190 = arith.constant dense<0.000000e+00> : vector<16x32xf32>
    %367 = tpu.matmul %364, %366, %cst_190 {dimension_numbers = #tpu.dot_dimension_numbers<[1], [0], [0], [1], [0, 0, 1, 1], [], []>} : vector<16x32xbf16>, vector<32x32xbf16>, vector<16x32xf32> -> vector<16x32xf32>
    %368 = arith.addf %358, %367 : vector<16x32xf32>
    %c12_i32 = arith.constant 12 : i32
    %369 = tpu.dynamic_rotate %300 by %c12_i32 dim 0 : vector<16x32xf32>, i32 -> vector<16x32xf32>
    %c7 = arith.constant 7 : index
    %c0_191 = arith.constant 0 : index
    %c0_192 = arith.constant 0 : index
    %370 = vector.load %arg20[%c7, %c0_191, %c0_192] : memref<9x16x1xf32, #tpu.memory_space<vmem>>, vector<1x16x1xf32>
    %371 = vector.shape_cast %370 : vector<1x16x1xf32> to vector<16x1xf32>
    %372 = vector.broadcast %371 : vector<16x1xf32> to vector<16x32xf32>
    %373 = arith.mulf %369, %372 : vector<16x32xf32>
    %374 = arith.truncf %373 : vector<16x32xf32> to vector<16x32xbf16>
    %c7_193 = arith.constant 7 : index
    %c0_194 = arith.constant 0 : index
    %c0_195 = arith.constant 0 : index
    %375 = vector.load %arg21[%c7_193, %c0_194, %c0_195] : memref<9x32x32xbf16, #tpu.memory_space<vmem>>, vector<1x32x32xbf16>
    %376 = vector.shape_cast %375 : vector<1x32x32xbf16> to vector<32x32xbf16>
    %cst_196 = arith.constant dense<0.000000e+00> : vector<16x32xf32>
    %377 = tpu.matmul %374, %376, %cst_196 {dimension_numbers = #tpu.dot_dimension_numbers<[1], [0], [0], [1], [0, 0, 1, 1], [], []>} : vector<16x32xbf16>, vector<32x32xbf16>, vector<16x32xf32> -> vector<16x32xf32>
    %378 = arith.addf %368, %377 : vector<16x32xf32>
    %c11_i32 = arith.constant 11 : i32
    %379 = tpu.dynamic_rotate %300 by %c11_i32 dim 0 : vector<16x32xf32>, i32 -> vector<16x32xf32>
    %c8 = arith.constant 8 : index
    %c0_197 = arith.constant 0 : index
    %c0_198 = arith.constant 0 : index
    %380 = vector.load %arg20[%c8, %c0_197, %c0_198] : memref<9x16x1xf32, #tpu.memory_space<vmem>>, vector<1x16x1xf32>
    %381 = vector.shape_cast %380 : vector<1x16x1xf32> to vector<16x1xf32>
    %382 = vector.broadcast %381 : vector<16x1xf32> to vector<16x32xf32>
    %383 = arith.mulf %379, %382 : vector<16x32xf32>
    %384 = arith.truncf %383 : vector<16x32xf32> to vector<16x32xbf16>
    %c8_199 = arith.constant 8 : index
    %c0_200 = arith.constant 0 : index
    %c0_201 = arith.constant 0 : index
    %385 = vector.load %arg21[%c8_199, %c0_200, %c0_201] : memref<9x32x32xbf16, #tpu.memory_space<vmem>>, vector<1x32x32xbf16>
    %386 = vector.shape_cast %385 : vector<1x32x32xbf16> to vector<32x32xbf16>
    %cst_202 = arith.constant dense<0.000000e+00> : vector<16x32xf32>
    %387 = tpu.matmul %384, %386, %cst_202 {dimension_numbers = #tpu.dot_dimension_numbers<[1], [0], [0], [1], [0, 0, 1, 1], [], []>} : vector<16x32xbf16>, vector<32x32xbf16>, vector<16x32xf32> -> vector<16x32xf32>
    %388 = arith.addf %378, %387 : vector<16x32xf32>
    %c0_203 = arith.constant 0 : index
    %c0_204 = arith.constant 0 : index
    %389 = vector.load %arg22[%c0_203, %c0_204] : memref<1x32xf32, #tpu.memory_space<vmem>>, vector<1x32xf32>
    %c0_205 = arith.constant 0 : index
    %c0_206 = arith.constant 0 : index
    %390 = vector.load %arg23[%c0_205, %c0_206] : memref<1x32xf32, #tpu.memory_space<vmem>>, vector<1x32xf32>
    %cst_207 = arith.constant dense<0.000000e+00> : vector<16xf32>
    %391 = vector.multi_reduction <add>, %388, %cst_207 [1] : vector<16x32xf32> to vector<16xf32>
    %392 = vector.shape_cast %391 : vector<16xf32> to vector<16x1xf32>
    %cst_208 = arith.constant 3.200000e+01 : f32
    %393 = vector.broadcast %cst_208 : f32 to vector<16x1xf32>
    %394 = arith.divf %392, %393 : vector<16x1xf32>
    %395 = vector.broadcast %394 : vector<16x1xf32> to vector<16x32xf32>
    %396 = arith.subf %388, %395 : vector<16x32xf32>
    %397 = arith.mulf %396, %396 : vector<16x32xf32>
    %cst_209 = arith.constant dense<0.000000e+00> : vector<16xf32>
    %398 = vector.multi_reduction <add>, %397, %cst_209 [1] : vector<16x32xf32> to vector<16xf32>
    %399 = vector.shape_cast %398 : vector<16xf32> to vector<16x1xf32>
    %cst_210 = arith.constant 3.200000e+01 : f32
    %400 = vector.broadcast %cst_210 : f32 to vector<16x1xf32>
    %401 = arith.divf %399, %400 : vector<16x1xf32>
    %cst_211 = arith.constant 9.99999997E-7 : f32
    %402 = vector.broadcast %cst_211 : f32 to vector<16x1xf32>
    %403 = arith.addf %401, %402 : vector<16x1xf32>
    %404 = math.rsqrt %403 : vector<16x1xf32>
    %405 = vector.broadcast %404 : vector<16x1xf32> to vector<16x32xf32>
    %406 = arith.mulf %396, %405 : vector<16x32xf32>
    %407 = vector.broadcast %389 : vector<1x32xf32> to vector<16x32xf32>
    %408 = arith.mulf %406, %407 : vector<16x32xf32>
    %409 = vector.broadcast %390 : vector<1x32xf32> to vector<16x32xf32>
    %410 = arith.addf %408, %409 : vector<16x32xf32>
    %c5_i32_212 = arith.constant 5 : i32
    %411 = tpu.dynamic_rotate %410 by %c5_i32_212 dim 0 : vector<16x32xf32>, i32 -> vector<16x32xf32>
    %c0_213 = arith.constant 0 : index
    %c0_214 = arith.constant 0 : index
    %c0_215 = arith.constant 0 : index
    %412 = vector.load %arg20[%c0_213, %c0_214, %c0_215] : memref<9x16x1xf32, #tpu.memory_space<vmem>>, vector<1x16x1xf32>
    %413 = vector.shape_cast %412 : vector<1x16x1xf32> to vector<16x1xf32>
    %414 = vector.broadcast %413 : vector<16x1xf32> to vector<16x32xf32>
    %415 = arith.mulf %411, %414 : vector<16x32xf32>
    %416 = arith.truncf %415 : vector<16x32xf32> to vector<16x32xbf16>
    %c0_216 = arith.constant 0 : index
    %c0_217 = arith.constant 0 : index
    %c0_218 = arith.constant 0 : index
    %417 = vector.load %arg24[%c0_216, %c0_217, %c0_218] : memref<9x32x16xbf16, #tpu.memory_space<vmem>>, vector<1x32x16xbf16>
    %418 = vector.shape_cast %417 : vector<1x32x16xbf16> to vector<32x16xbf16>
    %cst_219 = arith.constant dense<0.000000e+00> : vector<16x16xf32>
    %419 = tpu.matmul %416, %418, %cst_219 {dimension_numbers = #tpu.dot_dimension_numbers<[1], [0], [0], [1], [0, 0, 1, 1], [], []>} : vector<16x32xbf16>, vector<32x16xbf16>, vector<16x16xf32> -> vector<16x16xf32>
    %c4_i32_220 = arith.constant 4 : i32
    %420 = tpu.dynamic_rotate %410 by %c4_i32_220 dim 0 : vector<16x32xf32>, i32 -> vector<16x32xf32>
    %c1_221 = arith.constant 1 : index
    %c0_222 = arith.constant 0 : index
    %c0_223 = arith.constant 0 : index
    %421 = vector.load %arg20[%c1_221, %c0_222, %c0_223] : memref<9x16x1xf32, #tpu.memory_space<vmem>>, vector<1x16x1xf32>
    %422 = vector.shape_cast %421 : vector<1x16x1xf32> to vector<16x1xf32>
    %423 = vector.broadcast %422 : vector<16x1xf32> to vector<16x32xf32>
    %424 = arith.mulf %420, %423 : vector<16x32xf32>
    %425 = arith.truncf %424 : vector<16x32xf32> to vector<16x32xbf16>
    %c1_224 = arith.constant 1 : index
    %c0_225 = arith.constant 0 : index
    %c0_226 = arith.constant 0 : index
    %426 = vector.load %arg24[%c1_224, %c0_225, %c0_226] : memref<9x32x16xbf16, #tpu.memory_space<vmem>>, vector<1x32x16xbf16>
    %427 = vector.shape_cast %426 : vector<1x32x16xbf16> to vector<32x16xbf16>
    %cst_227 = arith.constant dense<0.000000e+00> : vector<16x16xf32>
    %428 = tpu.matmul %425, %427, %cst_227 {dimension_numbers = #tpu.dot_dimension_numbers<[1], [0], [0], [1], [0, 0, 1, 1], [], []>} : vector<16x32xbf16>, vector<32x16xbf16>, vector<16x16xf32> -> vector<16x16xf32>
    %429 = arith.addf %419, %428 : vector<16x16xf32>
    %c3_i32_228 = arith.constant 3 : i32
    %430 = tpu.dynamic_rotate %410 by %c3_i32_228 dim 0 : vector<16x32xf32>, i32 -> vector<16x32xf32>
    %c2_229 = arith.constant 2 : index
    %c0_230 = arith.constant 0 : index
    %c0_231 = arith.constant 0 : index
    %431 = vector.load %arg20[%c2_229, %c0_230, %c0_231] : memref<9x16x1xf32, #tpu.memory_space<vmem>>, vector<1x16x1xf32>
    %432 = vector.shape_cast %431 : vector<1x16x1xf32> to vector<16x1xf32>
    %433 = vector.broadcast %432 : vector<16x1xf32> to vector<16x32xf32>
    %434 = arith.mulf %430, %433 : vector<16x32xf32>
    %435 = arith.truncf %434 : vector<16x32xf32> to vector<16x32xbf16>
    %c2_232 = arith.constant 2 : index
    %c0_233 = arith.constant 0 : index
    %c0_234 = arith.constant 0 : index
    %436 = vector.load %arg24[%c2_232, %c0_233, %c0_234] : memref<9x32x16xbf16, #tpu.memory_space<vmem>>, vector<1x32x16xbf16>
    %437 = vector.shape_cast %436 : vector<1x32x16xbf16> to vector<32x16xbf16>
    %cst_235 = arith.constant dense<0.000000e+00> : vector<16x16xf32>
    %438 = tpu.matmul %435, %437, %cst_235 {dimension_numbers = #tpu.dot_dimension_numbers<[1], [0], [0], [1], [0, 0, 1, 1], [], []>} : vector<16x32xbf16>, vector<32x16xbf16>, vector<16x16xf32> -> vector<16x16xf32>
    %439 = arith.addf %429, %438 : vector<16x16xf32>
    %c1_i32_236 = arith.constant 1 : i32
    %440 = tpu.dynamic_rotate %410 by %c1_i32_236 dim 0 : vector<16x32xf32>, i32 -> vector<16x32xf32>
    %c3_237 = arith.constant 3 : index
    %c0_238 = arith.constant 0 : index
    %c0_239 = arith.constant 0 : index
    %441 = vector.load %arg20[%c3_237, %c0_238, %c0_239] : memref<9x16x1xf32, #tpu.memory_space<vmem>>, vector<1x16x1xf32>
    %442 = vector.shape_cast %441 : vector<1x16x1xf32> to vector<16x1xf32>
    %443 = vector.broadcast %442 : vector<16x1xf32> to vector<16x32xf32>
    %444 = arith.mulf %440, %443 : vector<16x32xf32>
    %445 = arith.truncf %444 : vector<16x32xf32> to vector<16x32xbf16>
    %c3_240 = arith.constant 3 : index
    %c0_241 = arith.constant 0 : index
    %c0_242 = arith.constant 0 : index
    %446 = vector.load %arg24[%c3_240, %c0_241, %c0_242] : memref<9x32x16xbf16, #tpu.memory_space<vmem>>, vector<1x32x16xbf16>
    %447 = vector.shape_cast %446 : vector<1x32x16xbf16> to vector<32x16xbf16>
    %cst_243 = arith.constant dense<0.000000e+00> : vector<16x16xf32>
    %448 = tpu.matmul %445, %447, %cst_243 {dimension_numbers = #tpu.dot_dimension_numbers<[1], [0], [0], [1], [0, 0, 1, 1], [], []>} : vector<16x32xbf16>, vector<32x16xbf16>, vector<16x16xf32> -> vector<16x16xf32>
    %449 = arith.addf %439, %448 : vector<16x16xf32>
    %c4_244 = arith.constant 4 : index
    %c0_245 = arith.constant 0 : index
    %c0_246 = arith.constant 0 : index
    %450 = vector.load %arg20[%c4_244, %c0_245, %c0_246] : memref<9x16x1xf32, #tpu.memory_space<vmem>>, vector<1x16x1xf32>
    %451 = vector.shape_cast %450 : vector<1x16x1xf32> to vector<16x1xf32>
    %452 = vector.broadcast %451 : vector<16x1xf32> to vector<16x32xf32>
    %453 = arith.mulf %410, %452 : vector<16x32xf32>
    %454 = arith.truncf %453 : vector<16x32xf32> to vector<16x32xbf16>
    %c4_247 = arith.constant 4 : index
    %c0_248 = arith.constant 0 : index
    %c0_249 = arith.constant 0 : index
    %455 = vector.load %arg24[%c4_247, %c0_248, %c0_249] : memref<9x32x16xbf16, #tpu.memory_space<vmem>>, vector<1x32x16xbf16>
    %456 = vector.shape_cast %455 : vector<1x32x16xbf16> to vector<32x16xbf16>
    %cst_250 = arith.constant dense<0.000000e+00> : vector<16x16xf32>
    %457 = tpu.matmul %454, %456, %cst_250 {dimension_numbers = #tpu.dot_dimension_numbers<[1], [0], [0], [1], [0, 0, 1, 1], [], []>} : vector<16x32xbf16>, vector<32x16xbf16>, vector<16x16xf32> -> vector<16x16xf32>
    %458 = arith.addf %449, %457 : vector<16x16xf32>
    %c15_i32_251 = arith.constant 15 : i32
    %459 = tpu.dynamic_rotate %410 by %c15_i32_251 dim 0 : vector<16x32xf32>, i32 -> vector<16x32xf32>
    %c5_252 = arith.constant 5 : index
    %c0_253 = arith.constant 0 : index
    %c0_254 = arith.constant 0 : index
    %460 = vector.load %arg20[%c5_252, %c0_253, %c0_254] : memref<9x16x1xf32, #tpu.memory_space<vmem>>, vector<1x16x1xf32>
    %461 = vector.shape_cast %460 : vector<1x16x1xf32> to vector<16x1xf32>
    %462 = vector.broadcast %461 : vector<16x1xf32> to vector<16x32xf32>
    %463 = arith.mulf %459, %462 : vector<16x32xf32>
    %464 = arith.truncf %463 : vector<16x32xf32> to vector<16x32xbf16>
    %c5_255 = arith.constant 5 : index
    %c0_256 = arith.constant 0 : index
    %c0_257 = arith.constant 0 : index
    %465 = vector.load %arg24[%c5_255, %c0_256, %c0_257] : memref<9x32x16xbf16, #tpu.memory_space<vmem>>, vector<1x32x16xbf16>
    %466 = vector.shape_cast %465 : vector<1x32x16xbf16> to vector<32x16xbf16>
    %cst_258 = arith.constant dense<0.000000e+00> : vector<16x16xf32>
    %467 = tpu.matmul %464, %466, %cst_258 {dimension_numbers = #tpu.dot_dimension_numbers<[1], [0], [0], [1], [0, 0, 1, 1], [], []>} : vector<16x32xbf16>, vector<32x16xbf16>, vector<16x16xf32> -> vector<16x16xf32>
    %468 = arith.addf %458, %467 : vector<16x16xf32>
    %c13_i32_259 = arith.constant 13 : i32
    %469 = tpu.dynamic_rotate %410 by %c13_i32_259 dim 0 : vector<16x32xf32>, i32 -> vector<16x32xf32>
    %c6_260 = arith.constant 6 : index
    %c0_261 = arith.constant 0 : index
    %c0_262 = arith.constant 0 : index
    %470 = vector.load %arg20[%c6_260, %c0_261, %c0_262] : memref<9x16x1xf32, #tpu.memory_space<vmem>>, vector<1x16x1xf32>
    %471 = vector.shape_cast %470 : vector<1x16x1xf32> to vector<16x1xf32>
    %472 = vector.broadcast %471 : vector<16x1xf32> to vector<16x32xf32>
    %473 = arith.mulf %469, %472 : vector<16x32xf32>
    %474 = arith.truncf %473 : vector<16x32xf32> to vector<16x32xbf16>
    %c6_263 = arith.constant 6 : index
    %c0_264 = arith.constant 0 : index
    %c0_265 = arith.constant 0 : index
    %475 = vector.load %arg24[%c6_263, %c0_264, %c0_265] : memref<9x32x16xbf16, #tpu.memory_space<vmem>>, vector<1x32x16xbf16>
    %476 = vector.shape_cast %475 : vector<1x32x16xbf16> to vector<32x16xbf16>
    %cst_266 = arith.constant dense<0.000000e+00> : vector<16x16xf32>
    %477 = tpu.matmul %474, %476, %cst_266 {dimension_numbers = #tpu.dot_dimension_numbers<[1], [0], [0], [1], [0, 0, 1, 1], [], []>} : vector<16x32xbf16>, vector<32x16xbf16>, vector<16x16xf32> -> vector<16x16xf32>
    %478 = arith.addf %468, %477 : vector<16x16xf32>
    %c12_i32_267 = arith.constant 12 : i32
    %479 = tpu.dynamic_rotate %410 by %c12_i32_267 dim 0 : vector<16x32xf32>, i32 -> vector<16x32xf32>
    %c7_268 = arith.constant 7 : index
    %c0_269 = arith.constant 0 : index
    %c0_270 = arith.constant 0 : index
    %480 = vector.load %arg20[%c7_268, %c0_269, %c0_270] : memref<9x16x1xf32, #tpu.memory_space<vmem>>, vector<1x16x1xf32>
    %481 = vector.shape_cast %480 : vector<1x16x1xf32> to vector<16x1xf32>
    %482 = vector.broadcast %481 : vector<16x1xf32> to vector<16x32xf32>
    %483 = arith.mulf %479, %482 : vector<16x32xf32>
    %484 = arith.truncf %483 : vector<16x32xf32> to vector<16x32xbf16>
    %c7_271 = arith.constant 7 : index
    %c0_272 = arith.constant 0 : index
    %c0_273 = arith.constant 0 : index
    %485 = vector.load %arg24[%c7_271, %c0_272, %c0_273] : memref<9x32x16xbf16, #tpu.memory_space<vmem>>, vector<1x32x16xbf16>
    %486 = vector.shape_cast %485 : vector<1x32x16xbf16> to vector<32x16xbf16>
    %cst_274 = arith.constant dense<0.000000e+00> : vector<16x16xf32>
    %487 = tpu.matmul %484, %486, %cst_274 {dimension_numbers = #tpu.dot_dimension_numbers<[1], [0], [0], [1], [0, 0, 1, 1], [], []>} : vector<16x32xbf16>, vector<32x16xbf16>, vector<16x16xf32> -> vector<16x16xf32>
    %488 = arith.addf %478, %487 : vector<16x16xf32>
    %c11_i32_275 = arith.constant 11 : i32
    %489 = tpu.dynamic_rotate %410 by %c11_i32_275 dim 0 : vector<16x32xf32>, i32 -> vector<16x32xf32>
    %c8_276 = arith.constant 8 : index
    %c0_277 = arith.constant 0 : index
    %c0_278 = arith.constant 0 : index
    %490 = vector.load %arg20[%c8_276, %c0_277, %c0_278] : memref<9x16x1xf32, #tpu.memory_space<vmem>>, vector<1x16x1xf32>
    %491 = vector.shape_cast %490 : vector<1x16x1xf32> to vector<16x1xf32>
    %492 = vector.broadcast %491 : vector<16x1xf32> to vector<16x32xf32>
    %493 = arith.mulf %489, %492 : vector<16x32xf32>
    %494 = arith.truncf %493 : vector<16x32xf32> to vector<16x32xbf16>
    %c8_279 = arith.constant 8 : index
    %c0_280 = arith.constant 0 : index
    %c0_281 = arith.constant 0 : index
    %495 = vector.load %arg24[%c8_279, %c0_280, %c0_281] : memref<9x32x16xbf16, #tpu.memory_space<vmem>>, vector<1x32x16xbf16>
    %496 = vector.shape_cast %495 : vector<1x32x16xbf16> to vector<32x16xbf16>
    %cst_282 = arith.constant dense<0.000000e+00> : vector<16x16xf32>
    %497 = tpu.matmul %494, %496, %cst_282 {dimension_numbers = #tpu.dot_dimension_numbers<[1], [0], [0], [1], [0, 0, 1, 1], [], []>} : vector<16x32xbf16>, vector<32x16xbf16>, vector<16x16xf32> -> vector<16x16xf32>
    %498 = arith.addf %488, %497 : vector<16x16xf32>
    %c0_283 = arith.constant 0 : index
    %c0_284 = arith.constant 0 : index
    %499 = vector.load %arg25[%c0_283, %c0_284] : memref<1x16xf32, #tpu.memory_space<vmem>>, vector<1x16xf32>
    %500 = vector.broadcast %499 : vector<1x16xf32> to vector<16x16xf32>
    %501 = arith.addf %498, %500 : vector<16x16xf32>
    %cst_285 = arith.constant 0.000000e+00 : f32
    %502 = vector.broadcast %cst_285 : f32 to vector<16x16xf32>
    %503 = arith.maximumf %501, %502 : vector<16x16xf32>
    %504 = vector.extract_strided_slice %503 {offsets = [0, 0], sizes = [1, 16], strides = [1, 1]} : vector<16x16xf32> to vector<1x16xf32>
    %505 = vector.shape_cast %504 : vector<1x16xf32> to vector<1x16xf32>
    %506 = vector.broadcast %505 : vector<1x16xf32> to vector<2x16xf32>
    %507 = vector.extract_strided_slice %503 {offsets = [1, 0], sizes = [1, 16], strides = [1, 1]} : vector<16x16xf32> to vector<1x16xf32>
    %508 = vector.shape_cast %507 : vector<1x16xf32> to vector<1x16xf32>
    %509 = vector.broadcast %508 : vector<1x16xf32> to vector<2x16xf32>
    %510 = vector.extract_strided_slice %503 {offsets = [2, 0], sizes = [1, 16], strides = [1, 1]} : vector<16x16xf32> to vector<1x16xf32>
    %511 = vector.shape_cast %510 : vector<1x16xf32> to vector<1x16xf32>
    %512 = vector.broadcast %511 : vector<1x16xf32> to vector<2x16xf32>
    %513 = vector.extract_strided_slice %503 {offsets = [3, 0], sizes = [1, 16], strides = [1, 1]} : vector<16x16xf32> to vector<1x16xf32>
    %514 = vector.shape_cast %513 : vector<1x16xf32> to vector<1x16xf32>
    %515 = vector.broadcast %514 : vector<1x16xf32> to vector<2x16xf32>
    %516 = tpu.concatenate %506, %509, %512, %515 in 0 : vector<2x16xf32>, vector<2x16xf32>, vector<2x16xf32>, vector<2x16xf32> -> vector<8x16xf32>
    %517 = vector.extract_strided_slice %503 {offsets = [4, 0], sizes = [1, 16], strides = [1, 1]} : vector<16x16xf32> to vector<1x16xf32>
    %518 = vector.shape_cast %517 : vector<1x16xf32> to vector<1x16xf32>
    %519 = vector.broadcast %518 : vector<1x16xf32> to vector<2x16xf32>
    %520 = vector.extract_strided_slice %503 {offsets = [5, 0], sizes = [1, 16], strides = [1, 1]} : vector<16x16xf32> to vector<1x16xf32>
    %521 = vector.shape_cast %520 : vector<1x16xf32> to vector<1x16xf32>
    %522 = vector.broadcast %521 : vector<1x16xf32> to vector<2x16xf32>
    %523 = vector.extract_strided_slice %503 {offsets = [6, 0], sizes = [1, 16], strides = [1, 1]} : vector<16x16xf32> to vector<1x16xf32>
    %524 = vector.shape_cast %523 : vector<1x16xf32> to vector<1x16xf32>
    %525 = vector.broadcast %524 : vector<1x16xf32> to vector<2x16xf32>
    %526 = vector.extract_strided_slice %503 {offsets = [7, 0], sizes = [1, 16], strides = [1, 1]} : vector<16x16xf32> to vector<1x16xf32>
    %527 = vector.shape_cast %526 : vector<1x16xf32> to vector<1x16xf32>
    %528 = vector.broadcast %527 : vector<1x16xf32> to vector<2x16xf32>
    %529 = tpu.concatenate %519, %522, %525, %528 in 0 : vector<2x16xf32>, vector<2x16xf32>, vector<2x16xf32>, vector<2x16xf32> -> vector<8x16xf32>
    %530 = vector.extract_strided_slice %503 {offsets = [8, 0], sizes = [1, 16], strides = [1, 1]} : vector<16x16xf32> to vector<1x16xf32>
    %531 = vector.shape_cast %530 : vector<1x16xf32> to vector<1x16xf32>
    %532 = vector.broadcast %531 : vector<1x16xf32> to vector<2x16xf32>
    %533 = vector.extract_strided_slice %503 {offsets = [9, 0], sizes = [1, 16], strides = [1, 1]} : vector<16x16xf32> to vector<1x16xf32>
    %534 = vector.shape_cast %533 : vector<1x16xf32> to vector<1x16xf32>
    %535 = vector.broadcast %534 : vector<1x16xf32> to vector<2x16xf32>
    %536 = vector.extract_strided_slice %503 {offsets = [10, 0], sizes = [1, 16], strides = [1, 1]} : vector<16x16xf32> to vector<1x16xf32>
    %537 = vector.shape_cast %536 : vector<1x16xf32> to vector<1x16xf32>
    %538 = vector.broadcast %537 : vector<1x16xf32> to vector<2x16xf32>
    %539 = vector.extract_strided_slice %503 {offsets = [11, 0], sizes = [1, 16], strides = [1, 1]} : vector<16x16xf32> to vector<1x16xf32>
    %540 = vector.shape_cast %539 : vector<1x16xf32> to vector<1x16xf32>
    %541 = vector.broadcast %540 : vector<1x16xf32> to vector<2x16xf32>
    %542 = tpu.concatenate %532, %535, %538, %541 in 0 : vector<2x16xf32>, vector<2x16xf32>, vector<2x16xf32>, vector<2x16xf32> -> vector<8x16xf32>
    %543 = vector.extract_strided_slice %503 {offsets = [12, 0], sizes = [1, 16], strides = [1, 1]} : vector<16x16xf32> to vector<1x16xf32>
    %544 = vector.shape_cast %543 : vector<1x16xf32> to vector<1x16xf32>
    %545 = vector.broadcast %544 : vector<1x16xf32> to vector<2x16xf32>
    %546 = vector.extract_strided_slice %503 {offsets = [13, 0], sizes = [1, 16], strides = [1, 1]} : vector<16x16xf32> to vector<1x16xf32>
    %547 = vector.shape_cast %546 : vector<1x16xf32> to vector<1x16xf32>
    %548 = vector.broadcast %547 : vector<1x16xf32> to vector<2x16xf32>
    %549 = vector.extract_strided_slice %503 {offsets = [14, 0], sizes = [1, 16], strides = [1, 1]} : vector<16x16xf32> to vector<1x16xf32>
    %550 = vector.shape_cast %549 : vector<1x16xf32> to vector<1x16xf32>
    %551 = vector.broadcast %550 : vector<1x16xf32> to vector<2x16xf32>
    %552 = vector.extract_strided_slice %503 {offsets = [15, 0], sizes = [1, 16], strides = [1, 1]} : vector<16x16xf32> to vector<1x16xf32>
    %553 = vector.shape_cast %552 : vector<1x16xf32> to vector<1x16xf32>
    %554 = vector.broadcast %553 : vector<1x16xf32> to vector<2x16xf32>
    %555 = tpu.concatenate %545, %548, %551, %554 in 0 : vector<2x16xf32>, vector<2x16xf32>, vector<2x16xf32>, vector<2x16xf32> -> vector<8x16xf32>
    %556 = tpu.concatenate %516, %516, %529, %529, %542, %542, %555, %555 in 0 : vector<8x16xf32>, vector<8x16xf32>, vector<8x16xf32>, vector<8x16xf32>, vector<8x16xf32>, vector<8x16xf32>, vector<8x16xf32>, vector<8x16xf32> -> vector<64x16xf32>
    %c9_i32 = arith.constant 9 : i32
    %557 = tpu.dynamic_rotate %556 by %c9_i32 dim 0 : vector<64x16xf32>, i32 -> vector<64x16xf32>
    %c0_286 = arith.constant 0 : index
    %c0_287 = arith.constant 0 : index
    %c0_288 = arith.constant 0 : index
    %558 = vector.load %arg26[%c0_286, %c0_287, %c0_288] : memref<9x64x1xf32, #tpu.memory_space<vmem>>, vector<1x64x1xf32>
    %559 = vector.shape_cast %558 : vector<1x64x1xf32> to vector<64x1xf32>
    %560 = vector.broadcast %559 : vector<64x1xf32> to vector<64x16xf32>
    %561 = arith.mulf %557, %560 : vector<64x16xf32>
    %562 = arith.truncf %561 : vector<64x16xf32> to vector<64x16xbf16>
    %c0_289 = arith.constant 0 : index
    %c0_290 = arith.constant 0 : index
    %c0_291 = arith.constant 0 : index
    %563 = vector.load %arg27[%c0_289, %c0_290, %c0_291] : memref<9x16x16xbf16, #tpu.memory_space<vmem>>, vector<1x16x16xbf16>
    %564 = vector.shape_cast %563 : vector<1x16x16xbf16> to vector<16x16xbf16>
    %cst_292 = arith.constant dense<0.000000e+00> : vector<64x16xf32>
    %565 = tpu.matmul %562, %564, %cst_292 {dimension_numbers = #tpu.dot_dimension_numbers<[1], [0], [0], [1], [0, 0, 1, 1], [], []>} : vector<64x16xbf16>, vector<16x16xbf16>, vector<64x16xf32> -> vector<64x16xf32>
    %c8_i32 = arith.constant 8 : i32
    %566 = tpu.dynamic_rotate %556 by %c8_i32 dim 0 : vector<64x16xf32>, i32 -> vector<64x16xf32>
    %c1_293 = arith.constant 1 : index
    %c0_294 = arith.constant 0 : index
    %c0_295 = arith.constant 0 : index
    %567 = vector.load %arg26[%c1_293, %c0_294, %c0_295] : memref<9x64x1xf32, #tpu.memory_space<vmem>>, vector<1x64x1xf32>
    %568 = vector.shape_cast %567 : vector<1x64x1xf32> to vector<64x1xf32>
    %569 = vector.broadcast %568 : vector<64x1xf32> to vector<64x16xf32>
    %570 = arith.mulf %566, %569 : vector<64x16xf32>
    %571 = arith.truncf %570 : vector<64x16xf32> to vector<64x16xbf16>
    %c1_296 = arith.constant 1 : index
    %c0_297 = arith.constant 0 : index
    %c0_298 = arith.constant 0 : index
    %572 = vector.load %arg27[%c1_296, %c0_297, %c0_298] : memref<9x16x16xbf16, #tpu.memory_space<vmem>>, vector<1x16x16xbf16>
    %573 = vector.shape_cast %572 : vector<1x16x16xbf16> to vector<16x16xbf16>
    %cst_299 = arith.constant dense<0.000000e+00> : vector<64x16xf32>
    %574 = tpu.matmul %571, %573, %cst_299 {dimension_numbers = #tpu.dot_dimension_numbers<[1], [0], [0], [1], [0, 0, 1, 1], [], []>} : vector<64x16xbf16>, vector<16x16xbf16>, vector<64x16xf32> -> vector<64x16xf32>
    %575 = arith.addf %565, %574 : vector<64x16xf32>
    %c7_i32 = arith.constant 7 : i32
    %576 = tpu.dynamic_rotate %556 by %c7_i32 dim 0 : vector<64x16xf32>, i32 -> vector<64x16xf32>
    %c2_300 = arith.constant 2 : index
    %c0_301 = arith.constant 0 : index
    %c0_302 = arith.constant 0 : index
    %577 = vector.load %arg26[%c2_300, %c0_301, %c0_302] : memref<9x64x1xf32, #tpu.memory_space<vmem>>, vector<1x64x1xf32>
    %578 = vector.shape_cast %577 : vector<1x64x1xf32> to vector<64x1xf32>
    %579 = vector.broadcast %578 : vector<64x1xf32> to vector<64x16xf32>
    %580 = arith.mulf %576, %579 : vector<64x16xf32>
    %581 = arith.truncf %580 : vector<64x16xf32> to vector<64x16xbf16>
    %c2_303 = arith.constant 2 : index
    %c0_304 = arith.constant 0 : index
    %c0_305 = arith.constant 0 : index
    %582 = vector.load %arg27[%c2_303, %c0_304, %c0_305] : memref<9x16x16xbf16, #tpu.memory_space<vmem>>, vector<1x16x16xbf16>
    %583 = vector.shape_cast %582 : vector<1x16x16xbf16> to vector<16x16xbf16>
    %cst_306 = arith.constant dense<0.000000e+00> : vector<64x16xf32>
    %584 = tpu.matmul %581, %583, %cst_306 {dimension_numbers = #tpu.dot_dimension_numbers<[1], [0], [0], [1], [0, 0, 1, 1], [], []>} : vector<64x16xbf16>, vector<16x16xbf16>, vector<64x16xf32> -> vector<64x16xf32>
    %585 = arith.addf %575, %584 : vector<64x16xf32>
    %c1_i32_307 = arith.constant 1 : i32
    %586 = tpu.dynamic_rotate %556 by %c1_i32_307 dim 0 : vector<64x16xf32>, i32 -> vector<64x16xf32>
    %c3_308 = arith.constant 3 : index
    %c0_309 = arith.constant 0 : index
    %c0_310 = arith.constant 0 : index
    %587 = vector.load %arg26[%c3_308, %c0_309, %c0_310] : memref<9x64x1xf32, #tpu.memory_space<vmem>>, vector<1x64x1xf32>
    %588 = vector.shape_cast %587 : vector<1x64x1xf32> to vector<64x1xf32>
    %589 = vector.broadcast %588 : vector<64x1xf32> to vector<64x16xf32>
    %590 = arith.mulf %586, %589 : vector<64x16xf32>
    %591 = arith.truncf %590 : vector<64x16xf32> to vector<64x16xbf16>
    %c3_311 = arith.constant 3 : index
    %c0_312 = arith.constant 0 : index
    %c0_313 = arith.constant 0 : index
    %592 = vector.load %arg27[%c3_311, %c0_312, %c0_313] : memref<9x16x16xbf16, #tpu.memory_space<vmem>>, vector<1x16x16xbf16>
    %593 = vector.shape_cast %592 : vector<1x16x16xbf16> to vector<16x16xbf16>
    %cst_314 = arith.constant dense<0.000000e+00> : vector<64x16xf32>
    %594 = tpu.matmul %591, %593, %cst_314 {dimension_numbers = #tpu.dot_dimension_numbers<[1], [0], [0], [1], [0, 0, 1, 1], [], []>} : vector<64x16xbf16>, vector<16x16xbf16>, vector<64x16xf32> -> vector<64x16xf32>
    %595 = arith.addf %585, %594 : vector<64x16xf32>
    %c4_315 = arith.constant 4 : index
    %c0_316 = arith.constant 0 : index
    %c0_317 = arith.constant 0 : index
    %596 = vector.load %arg26[%c4_315, %c0_316, %c0_317] : memref<9x64x1xf32, #tpu.memory_space<vmem>>, vector<1x64x1xf32>
    %597 = vector.shape_cast %596 : vector<1x64x1xf32> to vector<64x1xf32>
    %598 = vector.broadcast %597 : vector<64x1xf32> to vector<64x16xf32>
    %599 = arith.mulf %556, %598 : vector<64x16xf32>
    %600 = arith.truncf %599 : vector<64x16xf32> to vector<64x16xbf16>
    %c4_318 = arith.constant 4 : index
    %c0_319 = arith.constant 0 : index
    %c0_320 = arith.constant 0 : index
    %601 = vector.load %arg27[%c4_318, %c0_319, %c0_320] : memref<9x16x16xbf16, #tpu.memory_space<vmem>>, vector<1x16x16xbf16>
    %602 = vector.shape_cast %601 : vector<1x16x16xbf16> to vector<16x16xbf16>
    %cst_321 = arith.constant dense<0.000000e+00> : vector<64x16xf32>
    %603 = tpu.matmul %600, %602, %cst_321 {dimension_numbers = #tpu.dot_dimension_numbers<[1], [0], [0], [1], [0, 0, 1, 1], [], []>} : vector<64x16xbf16>, vector<16x16xbf16>, vector<64x16xf32> -> vector<64x16xf32>
    %604 = arith.addf %595, %603 : vector<64x16xf32>
    %c63_i32 = arith.constant 63 : i32
    %605 = tpu.dynamic_rotate %556 by %c63_i32 dim 0 : vector<64x16xf32>, i32 -> vector<64x16xf32>
    %c5_322 = arith.constant 5 : index
    %c0_323 = arith.constant 0 : index
    %c0_324 = arith.constant 0 : index
    %606 = vector.load %arg26[%c5_322, %c0_323, %c0_324] : memref<9x64x1xf32, #tpu.memory_space<vmem>>, vector<1x64x1xf32>
    %607 = vector.shape_cast %606 : vector<1x64x1xf32> to vector<64x1xf32>
    %608 = vector.broadcast %607 : vector<64x1xf32> to vector<64x16xf32>
    %609 = arith.mulf %605, %608 : vector<64x16xf32>
    %610 = arith.truncf %609 : vector<64x16xf32> to vector<64x16xbf16>
    %c5_325 = arith.constant 5 : index
    %c0_326 = arith.constant 0 : index
    %c0_327 = arith.constant 0 : index
    %611 = vector.load %arg27[%c5_325, %c0_326, %c0_327] : memref<9x16x16xbf16, #tpu.memory_space<vmem>>, vector<1x16x16xbf16>
    %612 = vector.shape_cast %611 : vector<1x16x16xbf16> to vector<16x16xbf16>
    %cst_328 = arith.constant dense<0.000000e+00> : vector<64x16xf32>
    %613 = tpu.matmul %610, %612, %cst_328 {dimension_numbers = #tpu.dot_dimension_numbers<[1], [0], [0], [1], [0, 0, 1, 1], [], []>} : vector<64x16xbf16>, vector<16x16xbf16>, vector<64x16xf32> -> vector<64x16xf32>
    %614 = arith.addf %604, %613 : vector<64x16xf32>
    %c57_i32 = arith.constant 57 : i32
    %615 = tpu.dynamic_rotate %556 by %c57_i32 dim 0 : vector<64x16xf32>, i32 -> vector<64x16xf32>
    %c6_329 = arith.constant 6 : index
    %c0_330 = arith.constant 0 : index
    %c0_331 = arith.constant 0 : index
    %616 = vector.load %arg26[%c6_329, %c0_330, %c0_331] : memref<9x64x1xf32, #tpu.memory_space<vmem>>, vector<1x64x1xf32>
    %617 = vector.shape_cast %616 : vector<1x64x1xf32> to vector<64x1xf32>
    %618 = vector.broadcast %617 : vector<64x1xf32> to vector<64x16xf32>
    %619 = arith.mulf %615, %618 : vector<64x16xf32>
    %620 = arith.truncf %619 : vector<64x16xf32> to vector<64x16xbf16>
    %c6_332 = arith.constant 6 : index
    %c0_333 = arith.constant 0 : index
    %c0_334 = arith.constant 0 : index
    %621 = vector.load %arg27[%c6_332, %c0_333, %c0_334] : memref<9x16x16xbf16, #tpu.memory_space<vmem>>, vector<1x16x16xbf16>
    %622 = vector.shape_cast %621 : vector<1x16x16xbf16> to vector<16x16xbf16>
    %cst_335 = arith.constant dense<0.000000e+00> : vector<64x16xf32>
    %623 = tpu.matmul %620, %622, %cst_335 {dimension_numbers = #tpu.dot_dimension_numbers<[1], [0], [0], [1], [0, 0, 1, 1], [], []>} : vector<64x16xbf16>, vector<16x16xbf16>, vector<64x16xf32> -> vector<64x16xf32>
    %624 = arith.addf %614, %623 : vector<64x16xf32>
    %c56_i32 = arith.constant 56 : i32
    %625 = tpu.dynamic_rotate %556 by %c56_i32 dim 0 : vector<64x16xf32>, i32 -> vector<64x16xf32>
    %c7_336 = arith.constant 7 : index
    %c0_337 = arith.constant 0 : index
    %c0_338 = arith.constant 0 : index
    %626 = vector.load %arg26[%c7_336, %c0_337, %c0_338] : memref<9x64x1xf32, #tpu.memory_space<vmem>>, vector<1x64x1xf32>
    %627 = vector.shape_cast %626 : vector<1x64x1xf32> to vector<64x1xf32>
    %628 = vector.broadcast %627 : vector<64x1xf32> to vector<64x16xf32>
    %629 = arith.mulf %625, %628 : vector<64x16xf32>
    %630 = arith.truncf %629 : vector<64x16xf32> to vector<64x16xbf16>
    %c7_339 = arith.constant 7 : index
    %c0_340 = arith.constant 0 : index
    %c0_341 = arith.constant 0 : index
    %631 = vector.load %arg27[%c7_339, %c0_340, %c0_341] : memref<9x16x16xbf16, #tpu.memory_space<vmem>>, vector<1x16x16xbf16>
    %632 = vector.shape_cast %631 : vector<1x16x16xbf16> to vector<16x16xbf16>
    %cst_342 = arith.constant dense<0.000000e+00> : vector<64x16xf32>
    %633 = tpu.matmul %630, %632, %cst_342 {dimension_numbers = #tpu.dot_dimension_numbers<[1], [0], [0], [1], [0, 0, 1, 1], [], []>} : vector<64x16xbf16>, vector<16x16xbf16>, vector<64x16xf32> -> vector<64x16xf32>
    %634 = arith.addf %624, %633 : vector<64x16xf32>
    %c55_i32 = arith.constant 55 : i32
    %635 = tpu.dynamic_rotate %556 by %c55_i32 dim 0 : vector<64x16xf32>, i32 -> vector<64x16xf32>
    %c8_343 = arith.constant 8 : index
    %c0_344 = arith.constant 0 : index
    %c0_345 = arith.constant 0 : index
    %636 = vector.load %arg26[%c8_343, %c0_344, %c0_345] : memref<9x64x1xf32, #tpu.memory_space<vmem>>, vector<1x64x1xf32>
    %637 = vector.shape_cast %636 : vector<1x64x1xf32> to vector<64x1xf32>
    %638 = vector.broadcast %637 : vector<64x1xf32> to vector<64x16xf32>
    %639 = arith.mulf %635, %638 : vector<64x16xf32>
    %640 = arith.truncf %639 : vector<64x16xf32> to vector<64x16xbf16>
    %c8_346 = arith.constant 8 : index
    %c0_347 = arith.constant 0 : index
    %c0_348 = arith.constant 0 : index
    %641 = vector.load %arg27[%c8_346, %c0_347, %c0_348] : memref<9x16x16xbf16, #tpu.memory_space<vmem>>, vector<1x16x16xbf16>
    %642 = vector.shape_cast %641 : vector<1x16x16xbf16> to vector<16x16xbf16>
    %cst_349 = arith.constant dense<0.000000e+00> : vector<64x16xf32>
    %643 = tpu.matmul %640, %642, %cst_349 {dimension_numbers = #tpu.dot_dimension_numbers<[1], [0], [0], [1], [0, 0, 1, 1], [], []>} : vector<64x16xbf16>, vector<16x16xbf16>, vector<64x16xf32> -> vector<64x16xf32>
    %644 = arith.addf %634, %643 : vector<64x16xf32>
    %c0_350 = arith.constant 0 : index
    %c0_351 = arith.constant 0 : index
    %645 = vector.load %arg28[%c0_350, %c0_351] : memref<1x16xf32, #tpu.memory_space<vmem>>, vector<1x16xf32>
    %646 = vector.broadcast %645 : vector<1x16xf32> to vector<64x16xf32>
    %647 = arith.addf %644, %646 : vector<64x16xf32>
    %cst_352 = arith.constant 0.000000e+00 : f32
    %648 = vector.broadcast %cst_352 : f32 to vector<64x16xf32>
    %649 = arith.maximumf %647, %648 : vector<64x16xf32>
    %650 = arith.truncf %649 : vector<64x16xf32> to vector<64x16xbf16>
    %c0_353 = arith.constant 0 : index
    %c0_354 = arith.constant 0 : index
    %651 = vector.load %arg29[%c0_353, %c0_354] : memref<16x128xbf16, #tpu.memory_space<vmem>>, vector<16x128xbf16>
    %cst_355 = arith.constant dense<0.000000e+00> : vector<64x128xf32>
    %652 = tpu.matmul %650, %651, %cst_355 {dimension_numbers = #tpu.dot_dimension_numbers<[1], [0], [0], [1], [0, 0, 1, 1], [], []>} : vector<64x16xbf16>, vector<16x128xbf16>, vector<64x128xf32> -> vector<64x128xf32>
    %c0_356 = arith.constant 0 : index
    %c0_357 = arith.constant 0 : index
    %653 = vector.load %arg30[%c0_356, %c0_357] : memref<1x128xf32, #tpu.memory_space<vmem>>, vector<1x128xf32>
    %654 = vector.broadcast %653 : vector<1x128xf32> to vector<64x128xf32>
    %655 = arith.addf %652, %654 : vector<64x128xf32>
    %c0_358 = arith.constant 0 : index
    %c0_359 = arith.constant 0 : index
    %c0_360 = arith.constant 0 : index
    %656 = vector.load %arg31[%c0_358, %c0_359, %c0_360] : memref<1x64x128xf32, #tpu.memory_space<vmem>>, vector<1x64x128xf32>
    %657 = vector.shape_cast %656 : vector<1x64x128xf32> to vector<64x128xf32>
    %658 = vector.shape_cast %655 : vector<64x128xf32> to vector<1x64x128xf32>
    tpu.vector_store %arg31[%c0_358, %c0_359, %c0_360], %658 {strides = array<i32>} : memref<1x64x128xf32, #tpu.memory_space<vmem>>, vector<1x64x128xf32>,
    return
  }
  func.func @transform_0(%arg0: i32) -> (i32, i32, i32) {
    %c0_i32 = arith.constant 0 : i32
    %c0_i32_0 = arith.constant 0 : i32
    %c0_i32_1 = arith.constant 0 : i32
    return %arg0, %c0_i32, %c0_i32_0 : i32, i32, i32
  }
  func.func @transform_1(%arg0: i32) -> (i32, i32) {
    %c0_i32 = arith.constant 0 : i32
    %c0_i32_0 = arith.constant 0 : i32
    %c0_i32_1 = arith.constant 0 : i32
    return %c0_i32, %c0_i32_0 : i32, i32
  }
  func.func @transform_2(%arg0: i32) -> (i32, i32) {
    %c0_i32 = arith.constant 0 : i32
    %c0_i32_0 = arith.constant 0 : i32
    %c0_i32_1 = arith.constant 0 : i32
    return %c0_i32, %c0_i32_0 : i32, i32
  }
  func.func @transform_3(%arg0: i32) -> (i32, i32) {
    %c0_i32 = arith.constant 0 : i32
    %c0_i32_0 = arith.constant 0 : i32
    %c0_i32_1 = arith.constant 0 : i32
    return %c0_i32, %c0_i32_0 : i32, i32
  }
  func.func @transform_4(%arg0: i32) -> (i32, i32, i32) {
    %c0_i32 = arith.constant 0 : i32
    %c0_i32_0 = arith.constant 0 : i32
    %c0_i32_1 = arith.constant 0 : i32
    %c0_i32_2 = arith.constant 0 : i32
    return %c0_i32, %c0_i32_0, %c0_i32_1 : i32, i32, i32
  }
  func.func @transform_5(%arg0: i32) -> (i32, i32, i32) {
    %c0_i32 = arith.constant 0 : i32
    %c0_i32_0 = arith.constant 0 : i32
    %c0_i32_1 = arith.constant 0 : i32
    %c0_i32_2 = arith.constant 0 : i32
    return %c0_i32, %c0_i32_0, %c0_i32_1 : i32, i32, i32
  }
  func.func @transform_6(%arg0: i32) -> (i32, i32, i32) {
    %c0_i32 = arith.constant 0 : i32
    %c0_i32_0 = arith.constant 0 : i32
    %c0_i32_1 = arith.constant 0 : i32
    %c0_i32_2 = arith.constant 0 : i32
    return %c0_i32, %c0_i32_0, %c0_i32_1 : i32, i32, i32
  }
  func.func @transform_7(%arg0: i32) -> (i32, i32, i32) {
    %c0_i32 = arith.constant 0 : i32
    %c0_i32_0 = arith.constant 0 : i32
    %c0_i32_1 = arith.constant 0 : i32
    %c0_i32_2 = arith.constant 0 : i32
    return %c0_i32, %c0_i32_0, %c0_i32_1 : i32, i32, i32
  }
  func.func @transform_8(%arg0: i32) -> (i32, i32, i32) {
    %c0_i32 = arith.constant 0 : i32
    %c0_i32_0 = arith.constant 0 : i32
    %c0_i32_1 = arith.constant 0 : i32
    %c0_i32_2 = arith.constant 0 : i32
    return %c0_i32, %c0_i32_0, %c0_i32_1 : i32, i32, i32
  }
  func.func @transform_9(%arg0: i32) -> (i32, i32, i32) {
    %c0_i32 = arith.constant 0 : i32
    %c0_i32_0 = arith.constant 0 : i32
    %c0_i32_1 = arith.constant 0 : i32
    %c0_i32_2 = arith.constant 0 : i32
    return %c0_i32, %c0_i32_0, %c0_i32_1 : i32, i32, i32
  }
  func.func @transform_10(%arg0: i32) -> (i32, i32, i32) {
    %c0_i32 = arith.constant 0 : i32
    %c0_i32_0 = arith.constant 0 : i32
    %c0_i32_1 = arith.constant 0 : i32
    %c0_i32_2 = arith.constant 0 : i32
    return %c0_i32, %c0_i32_0, %c0_i32_1 : i32, i32, i32
  }
  func.func @transform_11(%arg0: i32) -> (i32, i32, i32) {
    %c0_i32 = arith.constant 0 : i32
    %c0_i32_0 = arith.constant 0 : i32
    %c0_i32_1 = arith.constant 0 : i32
    %c0_i32_2 = arith.constant 0 : i32
    return %c0_i32, %c0_i32_0, %c0_i32_1 : i32, i32, i32
  }
  func.func @transform_12(%arg0: i32) -> (i32, i32, i32) {
    %c0_i32 = arith.constant 0 : i32
    %c0_i32_0 = arith.constant 0 : i32
    %c0_i32_1 = arith.constant 0 : i32
    %c0_i32_2 = arith.constant 0 : i32
    return %c0_i32, %c0_i32_0, %c0_i32_1 : i32, i32, i32
  }
  func.func @transform_13(%arg0: i32) -> (i32, i32, i32) {
    %c0_i32 = arith.constant 0 : i32
    %c0_i32_0 = arith.constant 0 : i32
    %c0_i32_1 = arith.constant 0 : i32
    %c0_i32_2 = arith.constant 0 : i32
    return %c0_i32, %c0_i32_0, %c0_i32_1 : i32, i32, i32
  }
  func.func @transform_14(%arg0: i32) -> (i32, i32, i32) {
    %c0_i32 = arith.constant 0 : i32
    %c0_i32_0 = arith.constant 0 : i32
    %c0_i32_1 = arith.constant 0 : i32
    %c0_i32_2 = arith.constant 0 : i32
    return %c0_i32, %c0_i32_0, %c0_i32_1 : i32, i32, i32
  }
  func.func @transform_15(%arg0: i32) -> (i32, i32, i32) {
    %c0_i32 = arith.constant 0 : i32
    %c0_i32_0 = arith.constant 0 : i32
    %c0_i32_1 = arith.constant 0 : i32
    %c0_i32_2 = arith.constant 0 : i32
    return %c0_i32, %c0_i32_0, %c0_i32_1 : i32, i32, i32
  }
  func.func @transform_16(%arg0: i32) -> (i32, i32) {
    %c0_i32 = arith.constant 0 : i32
    %c0_i32_0 = arith.constant 0 : i32
    %c0_i32_1 = arith.constant 0 : i32
    return %c0_i32, %c0_i32_0 : i32, i32
  }
  func.func @transform_17(%arg0: i32) -> (i32, i32) {
    %c0_i32 = arith.constant 0 : i32
    %c0_i32_0 = arith.constant 0 : i32
    %c0_i32_1 = arith.constant 0 : i32
    return %c0_i32, %c0_i32_0 : i32, i32
  }
  func.func @transform_18(%arg0: i32) -> (i32, i32) {
    %c0_i32 = arith.constant 0 : i32
    %c0_i32_0 = arith.constant 0 : i32
    %c0_i32_1 = arith.constant 0 : i32
    return %c0_i32, %c0_i32_0 : i32, i32
  }
  func.func @transform_19(%arg0: i32) -> (i32, i32, i32) {
    %c0_i32 = arith.constant 0 : i32
    %c0_i32_0 = arith.constant 0 : i32
    %c0_i32_1 = arith.constant 0 : i32
    %c0_i32_2 = arith.constant 0 : i32
    return %c0_i32, %c0_i32_0, %c0_i32_1 : i32, i32, i32
  }
  func.func @transform_20(%arg0: i32) -> (i32, i32, i32) {
    %c0_i32 = arith.constant 0 : i32
    %c0_i32_0 = arith.constant 0 : i32
    %c0_i32_1 = arith.constant 0 : i32
    %c0_i32_2 = arith.constant 0 : i32
    return %c0_i32, %c0_i32_0, %c0_i32_1 : i32, i32, i32
  }
  func.func @transform_21(%arg0: i32) -> (i32, i32) {
    %c0_i32 = arith.constant 0 : i32
    %c0_i32_0 = arith.constant 0 : i32
    %c0_i32_1 = arith.constant 0 : i32
    return %c0_i32, %c0_i32_0 : i32, i32
  }
  func.func @transform_22(%arg0: i32) -> (i32, i32) {
    %c0_i32 = arith.constant 0 : i32
    %c0_i32_0 = arith.constant 0 : i32
    %c0_i32_1 = arith.constant 0 : i32
    return %c0_i32, %c0_i32_0 : i32, i32
  }
  func.func @transform_23(%arg0: i32) -> (i32, i32, i32) {
    %c0_i32 = arith.constant 0 : i32
    %c0_i32_0 = arith.constant 0 : i32
    %c0_i32_1 = arith.constant 0 : i32
    %c0_i32_2 = arith.constant 0 : i32
    return %c0_i32, %c0_i32_0, %c0_i32_1 : i32, i32, i32
  }
  func.func @transform_24(%arg0: i32) -> (i32, i32) {
    %c0_i32 = arith.constant 0 : i32
    %c0_i32_0 = arith.constant 0 : i32
    %c0_i32_1 = arith.constant 0 : i32
    return %c0_i32, %c0_i32_0 : i32, i32
  }
  func.func @transform_25(%arg0: i32) -> (i32, i32, i32) {
    %c0_i32 = arith.constant 0 : i32
    %c0_i32_0 = arith.constant 0 : i32
    %c0_i32_1 = arith.constant 0 : i32
    %c0_i32_2 = arith.constant 0 : i32
    return %c0_i32, %c0_i32_0, %c0_i32_1 : i32, i32, i32
  }
  func.func @transform_26(%arg0: i32) -> (i32, i32, i32) {
    %c0_i32 = arith.constant 0 : i32
    %c0_i32_0 = arith.constant 0 : i32
    %c0_i32_1 = arith.constant 0 : i32
    %c0_i32_2 = arith.constant 0 : i32
    return %c0_i32, %c0_i32_0, %c0_i32_1 : i32, i32, i32
  }
  func.func @transform_27(%arg0: i32) -> (i32, i32) {
    %c0_i32 = arith.constant 0 : i32
    %c0_i32_0 = arith.constant 0 : i32
    %c0_i32_1 = arith.constant 0 : i32
    return %c0_i32, %c0_i32_0 : i32, i32
  }
  func.func @transform_28(%arg0: i32) -> (i32, i32) {
    %c0_i32 = arith.constant 0 : i32
    %c0_i32_0 = arith.constant 0 : i32
    %c0_i32_1 = arith.constant 0 : i32
    return %c0_i32, %c0_i32_0 : i32, i32
  }
  func.func @transform_29(%arg0: i32) -> (i32, i32) {
    %c0_i32 = arith.constant 0 : i32
    %c0_i32_0 = arith.constant 0 : i32
    %c0_i32_1 = arith.constant 0 : i32
    return %c0_i32, %c0_i32_0 : i32, i32
  }
  func.func @transform_30(%arg0: i32) -> (i32, i32, i32) {
    %c0_i32 = arith.constant 0 : i32
    %c0_i32_0 = arith.constant 0 : i32
    %c0_i32_1 = arith.constant 0 : i32
    return %arg0, %c0_i32, %c0_i32_0 : i32, i32, i32
  }
}

</mosaic_0001>

<bundles_post_ra>
// kernel: sam_feat_seg_forward.1
= control target key start
LH: loop header
LB: loop body
LE: loop exit
PB: predicated region body
PF: predicated region fallthrough
CT: control target
= control target key end

     0   :  { %s6825_s6 = smov 1   ;;  %s6826_s10 = smov 2   ;;  %s8151_s0 = inlined_call_operand.smem [shape: u32[31], index: -1, kind: input, shape index: {}] }
   0x1   :  { %s6872_s5 = sld [smem:[%s8151_s0]]   ;;  %s6827_s14 = smov 3  }
   0x2   :  { %s6877_s9 = sld [smem:[%s8151_s0 + %s6825_s6]]   ;;  %s6828_s18 = smov 4  }
   0x3   :  { %s6882_s13 = sld [smem:[%s8151_s0 + %s6826_s10]]   ;;  %s6829_s22 = smov 5  }
   0x4   :  { %s6887_s17 = sld [smem:[%s8151_s0 + %s6827_s14]]   ;;  %s6830_s26 = smov 6  }
   0x5   :  { %s6892_s21 = sld [smem:[%s8151_s0 + %s6828_s18]]   ;;  %s6831_s30 = smov 7  }
   0x6   :  { %s6897_s25 = sld [smem:[%s8151_s0 + %s6829_s22]]   ;;  %s6832_s4 = smov 8  }
   0x7   :  { %s6902_s29 = sld [smem:[%s8151_s0 + %s6830_s26]]   ;;  %s6833_s10 = smov 9  }
   0x8   :  { %s6907_s3 = sld [smem:[%s8151_s0 + %s6831_s30]]   ;;  %s6834_s15 = smov 10  }
   0x9   :  { %s6912_s8 = sld [smem:[%s8151_s0 + %s6832_s4]]   ;;  %s6835_s20 = smov 11  }
   0xa   :  { %s6917_s14 = sld [smem:[%s8151_s0 + %s6833_s10]]   ;;  %s6836_s26 = smov 12  }
   0xb   :  { %s6922_s19 = sld [smem:[%s8151_s0 + %s6834_s15]]   ;;  %s6837_s1 = smov 13  }
   0xc   :  { %s6927_s24 = sld [smem:[%s8151_s0 + %s6835_s20]]   ;;  %s6838_s7 = smov 14  }
   0xd   :  { %s6932_s30 = sld [smem:[%s8151_s0 + %s6836_s26]]   ;;  %s6839_s15 = smov 15  }
   0xe   :  { %s6937_s6 = sld [smem:[%s8151_s0 + %s6837_s1]]   ;;  %s6840_s22 = smov 16  }
   0xf   :  { %s6942_s12 = sld [smem:[%s8151_s0 + %s6838_s7]]   ;;  %s6841_s28 = smov 17  }
  0x10   :  { %s6947_s20 = sld [smem:[%s8151_s0 + %s6839_s15]]   ;;  %s6842_s7 = smov 18  }
  0x11   :  { %s6952_s27 = sld [smem:[%s8151_s0 + %s6840_s22]]   ;;  %s6843_s15 = smov 19  }
  0x12   :  { %s6957_s4 = sld [smem:[%s8151_s0 + %s6841_s28]]   ;;  %s6844_s22 = smov 20  }
  0x13   :  { %s6845_s28 = smov 21  }
  0x14   :  { %8160 = sst [smem:[#allocation2_spill]] %s6937_s6 }
  0x15   :  { %s6962_s6 = sld [smem:[%s8151_s0 + %s6842_s7]]   ;;  %s6846_s7 = smov 22  }
  0x16   :  { %8161 = sst [smem:[#allocation3_spill]] %s6947_s20 }
  0x17   :  { %8162 = sst [smem:[#allocation4_spill]] %s6952_s27 }
  0x18   :  { %8163 = sst [smem:[#allocation5_spill]] %s6957_s4 }
  0x19   :  { %s6967_s20 = sld [smem:[%s8151_s0 + %s6843_s15]]   ;;  %s6847_s15 = smov 23  }
  0x1a   :  { %s6972_s27 = sld [smem:[%s8151_s0 + %s6844_s22]]   ;;  %s6848_s22 = smov 24  }
  0x1b   :  { %8164 = sst [smem:[#allocation6_spill]] %s6962_s6 }
  0x1c   :  { %s6977_s4 = sld [smem:[%s8151_s0 + %s6845_s28]]   ;;  %s6849_s28 = smov 25  }
  0x1d   :  { %s6982_s6 = sld [smem:[%s8151_s0 + %s6846_s7]]   ;;  %s6850_s7 = smov 26  }
  0x1f   :  { %8165 = sst [smem:[#allocation7_spill]] %s6967_s20 }
  0x20   :  { %8166 = sst [smem:[#allocation8_spill]] %s6972_s27 }
  0x21   :  { %s6987_s20 = sld [smem:[%s8151_s0 + %s6847_s15]]   ;;  %s6851_s15 = smov 27  }
  0x22   :  { %8167 = sst [smem:[#allocation9_spill]] %s6977_s4 }
  0x23   :  { %8168 = sst [smem:[#allocation10_spill]] %s6982_s6 }
  0x24   :  { %s6992_s27 = sld [smem:[%s8151_s0 + %s6848_s22]]   ;;  %s6852_s22 = smov 28  }
  0x25   :  { %s6997_s4 = sld [smem:[%s8151_s0 + %s6849_s28]]   ;;  %s6853_s28 = smov 29  }
  0x26   :  { %s7002_s6 = sld [smem:[%s8151_s0 + %s6850_s7]]   ;;  %s6854_s7 = smov 30  }
  0x27   :  { %8169 = sst [smem:[#allocation11_spill]] %s6987_s20 }
  0x28   :  { %s7007_s20 = sld [smem:[%s8151_s0 + %s6851_s15]]   ;;  %s7024_s15 = smov 0  }
  0x2a   :  { %8170 = sst [smem:[#allocation12_spill]] %s6992_s27 }
  0x2b   :  { %8171 = sst [smem:[#allocation13_spill]] %s6997_s4 }
  0x2c   :  { %8172 = sst [smem:[#allocation14_spill]] %s7002_s6 }
  0x2d   :  { %s7012_s27 = sld [smem:[%s8151_s0 + %s6852_s22]]  }
  0x2e   :  { %s7017_s4 = sld [smem:[%s8151_s0 + %s6853_s28]]  }
  0x2f   :  { %s7022_s6 = sld [smem:[%s8151_s0 + %s6854_s7]]  }
  0x30 LB: > { %s5664_s16 = sadd.s32 4294967295, %s6823_s15   ;;  %p5668_p0 = scmp.ge.s32.totalorder %s6823_s15, 1  ;;  %s6823_s15 = sphi %s7024_s15, %s71_s15  }
  0x31   : > { %p843_p1 = scmp.lt.s32.totalorder %s6823_s15, 3 }
  0x33   : > { %p844_p2 = pnand %p5668_p0, %p843_p1 }
  0x35   : > { %847 = sbr.rel (%p844_p2) target bundleno = 7963 (0x1f1b), region = 140 }
  0x3a   : > { %v6665_v0 = vld [vmem:[%s6877_s9 + $0x38] sm:$0xff]   ;;  %v6855_v1 = vmov 0   ;;  %p921_p3 = scmp.lt.s32.totalorder %s5664_s16, 1  ;;  %v6666_v2 = vld [vmem:[%s6877_s9 + $0x30] sm:$0xff]   ;;  %v6667_v3 = vld [vmem:[%s6877_s9 + $0x28] sm:$0xff]   ;;  %vm1041_vm0 = vcmask 523264  }
  0x3b   : > { %1045 = vmatprep.subr.bf16.mxu0 %v6855_v1  ;;  %6664 = vset.pattern.permute.xlu1 %v6855_v1  ;;  %v6668_v4 = vld [vmem:[%s6877_s9 + $0x20] sm:$0xff]   ;;  %v6669_v7 = vld [vmem:[%s6877_s9 + $0x18] sm:$0xff]   ;;  %v6670_v9 = vld [vmem:[%s6877_s9 + $0x10] sm:$0xff]   ;;  %vm1092_vm1 = vcmask 261120   ;;  %v6856_v43 = vmov 0.0   ;;  %vm6857_vm2 = vmmov 0  }
  0x3c   : > { %1046 = vmatpush1.bf16.msra.mxu0 %v6665_v0  ;;  %6663 = vset.pattern.permute.xlu0 %v6855_v1  ;;  %s8215_s16 = smov (!%p921_p3, %s5664_s16), 1  ;;  %v6671_v10 = vld [vmem:[%s6877_s9 + $0x8] sm:$0xff]   ;;  %v6672_v11 = vld [vmem:[%s6877_s9] sm:$0xff]   ;;  %v6673_v12 = vld [vmem:[%s6877_s9 + $0x58] sm:$0xff]   ;;  %s6858_s22 = smov 96   ;;  %vm1208_vm3 = vcmask 130048  }
  0x3d   : > { %1047 = vmatprep.subr.bf16.mxu0 %v6855_v1  ;;  %s6057_s0 = sshll.u32 %s8215_s16, 5  ;;  %v6674_v13 = vld [vmem:[%s6877_s9 + $0x50] sm:$0xff]   ;;  %v6675_v14 = vld [vmem:[%s6877_s9 + $0x48] sm:$0xff]   ;;  %v6676_v15 = vld [vmem:[%s6877_s9 + $0x40] sm:$0xff]   ;;  %6218 = vmatprep.subr.bf16.mxu1 %v6856_v43  ;;  %s6859_s23 = smov 80   ;;  %vm3996_vm9 = vcmask 1041408  }
  0x3e   : > { %s7039_s18 = scalar_lea.vmem %s6872_s5, %s6057_s0  ;;  %v5673_v19 = vld [vmem:[%s6882_s13] ss:$0 sm:$0xff]  ;;  %v1087_v26 = vld [vmem:[%s6887_s17 + $0x8] sm:$0xff]  ;;  %6222 = vmatprep.mubr.msk.bf16.mxu1 %vm6857_vm2, %v6856_v43  ;;  %s6860_s26 = smov 112   ;;  %vm3998_vm10 = vcmask 1043456   ;;  %vm4000_vm11 = vcmask 1045504  }
  0x3f   : > { %v933_v5 = vld [vmem:[%s7039_s18 + $0x8] sm:$0xff]  ;;  %v935_v6 = vld [vmem:[%s7039_s18 + $0x18] sm:$0xff]  ;;  %v932_v16 = vld [vmem:[%s7039_s18] sm:$0xff]  ;;  %s6861_s28 = smov 64   ;;  %s6862_s1 = smov 48  }
  0x40   : > { %1048 = vmatpush1.bf16.msra.mxu0 %v6666_v2  ;;  %v937_v8 = vpack.c.bf16 %v935_v6, %v933_v5  ;;  %v934_v17 = vld [vmem:[%s7039_s18 + $0x10] sm:$0xff]  ;;  %v1086_v21 = vld [vmem:[%s6887_s17] sm:$0xff]  ;;  %v6677_v42 = vld [vmem:[%s6902_s29 + $0x8] sm:$0xff]   ;;  %s6863_s2 = smov 16   ;;  %s8173_s7 = sld [smem:[#allocation2_spill]] }
  0x41   : > { %1049 = vmatprep.subr.bf16.mxu0 %v6855_v1  ;;  %v936_v18 = vpack.c.bf16 %v934_v17, %v932_v16  ;;  %6219 = vmatpush3.bf16.msra.mxu1 %v6677_v42  ;;  %v6678_v44 = vld [vmem:[%s6902_s29] sm:$0xff]   ;;  %s8174_s10 = sld [smem:[#allocation3_spill]] }
  0x42   : > { %5686 = vmatprep.mubr.msk.bf16.mxu0 %vm1041_vm0, %v937_v8  ;;  %6220 = vmatprep.subr.bf16.mxu1 %v6856_v43  ;;  %v5687_v53 = vld [vmem:[%s6892_s21] ss:$0 sm:$0xff]  ;;  %s8175_s11 = sld [smem:[#allocation4_spill]] }
  0x43   : > { %v5688_v57 = vld [vmem:[%s6897_s25] ss:$0 sm:$0xff]  ;;  %s8176_s0 = sld [smem:[#allocation7_spill]] }
  0x44   : > { %1050 = vmatpush1.bf16.msra.mxu0 %v6667_v3  ;;  %v5689_v63 = vld [vmem:[%s6907_s3] ss:$0 sm:$0xff]  ;;  %s8177_s18 = sld [smem:[#allocation8_spill]] }
  0x45   : > { %1051 = vmatprep.subr.bf16.mxu0 %v6855_v1  ;;  %6221 = vmatpush3.bf16.msra.mxu1 %v6678_v44 }
  0x46   : > { %6226 = vmatprep.subr.bf16.mxu1 %v6856_v43 }
  0x48   : > { %1052 = vmatpush1.bf16.msra.mxu0 %v6668_v4 }
  0x49   : > { %1053 = vmatprep.subr.bf16.mxu0 %v6855_v1 }
  0x4c   : > { %1054 = vmatpush1.bf16.msra.mxu0 %v6669_v7 }
  0x4d   : > { %1055 = vmatprep.subr.bf16.mxu0 %v6855_v1 }
  0x50   : > { %1056 = vmatpush1.bf16.msra.mxu0 %v6670_v9 }
  0x51   : > { %1057 = vmatprep.subr.bf16.mxu0 %v6855_v1 }
  0x54   : > { %1058 = vmatpush1.bf16.msra.mxu0 %v6671_v10 }
  0x55   : > { %1059 = vmatprep.subr.bf16.mxu0 %v6855_v1 }
  0x58   : > { %1060 = vmatpush1.bf16.msra.mxu0 %v6672_v11 }
  0x59   : > { %1069 = vmatprep.subr.bf16.mxu0 %v6855_v1 }
  0x5c   : > { %1070 = vmatpush2.bf16.msra.mxu0 %v6673_v12 }
  0x5d   : > { %1071 = vmatprep.subr.bf16.mxu0 %v6855_v1 }
  0x60   : > { %1072 = vmatpush2.bf16.msra.mxu0 %v6674_v13 }
  0x61   : > { %1073 = vmatprep.subr.bf16.mxu0 %v6855_v1 }
  0x64   : > { %1074 = vmatpush2.bf16.msra.mxu0 %v6675_v14 }
  0x65   : > { %1075 = vmatprep.subr.bf16.mxu0 %v6855_v1 }
  0x68   : > { %1076 = vmatpush2.bf16.msra.mxu0 %v6676_v15 }
  0x69   : > { %6258 = vmatprep.subr.bf16.mxu0 %v6856_v43 }
  0x6b   : > { %1078 = vmatmul.mubr.bf16.vlgmr.msra.gmra.mxu0 %v936_v18 }
  0x6c   : > { %6262 = vmatprep.mubr.msk.bf16.mxu0 %vm6857_vm2, %v6856_v43 }
 0x12b   : > { %v1079_v20 = vpop.f32.mrf.mxu0 }
 0x12c   : > { %v1080_v22 = vadd.f32 %v5673_v19, %v1079_v20 }
 0x12d   : > { %v1081_v23 = vpop.f32.mrf.mxu0 }
 0x12e   : > { %v7056_v24 = vadd.f32 %v1086_v21, %v1080_v22 }
 0x12f   : > { %v1082_v25 = vpop.f32.mrf.mxu0 }
 0x130   : > { %v1083_v27 = vadd.f32 %v5673_v19, %v1082_v25  ;;  %v1093_v28 = vsel %vm1092_vm1, %v7056_v24, 0.0 }
 0x131   : > { %v1084_v29 = vpop.f32.mrf.mxu0  ;;  %1094 = vadd.xlane.f32.xlu0 %v1093_v28 }
 0x132   : > { %v7061_v30 = vadd.f32 %v1087_v26, %v1083_v27 }
 0x134   : > { %v1096_v31 = vsel %vm1092_vm1, %v7061_v30, 0.0 }
 0x135   : > { %1097 = vadd.xlane.f32.xlu0 %v1096_v31 }
 0x1ba   : > { %v1095_v32 = vpop.xlane.xlu0 %1094 }
 0x1bb   : > { %v1100_v33 = vmul.f32 0.03125, %v1095_v32 }
 0x1bd   : > { %v1102_v34 = vsub.f32 %v7056_v24, %v1100_v33 }
 0x1be   : > { %v1098_v35 = vpop.xlane.xlu0 %1097 }
 0x1bf   : > { %v1101_v36 = vmul.f32 0.03125, %v1098_v35  ;;  %v1104_v37 = vmul.f32 %v1102_v34, %v1102_v34 }
 0x1c1   : > { %v1103_v38 = vsub.f32 %v7061_v30, %v1101_v36  ;;  %v1106_v39 = vsel %vm1092_vm1, %v1104_v37, 0.0 }
 0x1c2   : > { %1107 = vadd.xlane.f32.xlu1 %v1106_v39 }
 0x1c3   : > { %v1105_v40 = vmul.f32 %v1103_v38, %v1103_v38 }
 0x1c5   : > { %v1109_v41 = vsel %vm1092_vm1, %v1105_v40, 0.0 }
 0x1c6   : > { %1110 = vadd.xlane.f32.xlu1 %v1109_v41 }
 0x24b   : > { %v1108_v45 = vpop.xlane.xlu1 %1107 }
 0x24c   : > { %v1112_v46 = vmul.f32 0.03125, %v1108_v45 }
 0x24e   : > { %v1114_v47 = vadd.f32 1e-06, %v1112_v46 }
 0x24f   : > { %v1111_v48 = vpop.xlane.xlu1 %1110 }
 0x250   : > { %6753 = vrsqrt.f32 %v1114_v47  ;;  %v1113_v49 = vmul.f32 0.03125, %v1111_v48 }
 0x252   : > { %v1115_v50 = vadd.f32 1e-06, %v1113_v49 }
 0x254   : > { %6755 = vrsqrt.f32 %v1115_v50 }
 0x25d   : > { %v6754_v51 = vpop.eup %6753 }
 0x25e   : > { %v1118_v52 = vmul.f32 %v6754_v51, %v1102_v34 }
 0x260   : > { %v1126_v56 = vmul.f32 %v5687_v53, %v1118_v52 }
 0x261   : > { %v6756_v54 = vpop.eup %6755 }
 0x262   : > { %v1119_v55 = vmul.f32 %v6756_v54, %v1103_v38  ;;  %v1134_v59 = vadd.f32 %v5688_v57, %v1126_v56 }
 0x264   : > { %v1127_v58 = vmul.f32 %v5687_v53, %v1119_v55 }
 0x266   : > { %v1135_v60 = vadd.f32 %v5688_v57, %v1127_v58 }
 0x268   : > { %v1136_v61 = vpack.c.bf16 %v1135_v60, %v1134_v59 }
 0x26a   : > { %6223 = vmatmul.mubr.msk.bf16.vlgmr.msra.gmra.mxu1 %vm1092_vm1, %v1136_v61 }
 0x26b   : > { %6228 = vmatprep.mubr.msk.bf16.mxu1 %vm6857_vm2, %v6856_v43 }
 0x32a   : > { %v1197_v62 = vpop.f32.mrf.mxu1 }
 0x32b   : > { %v1198_v2 = vadd.f32 %v5689_v63, %v1197_v62 }
 0x32c   : > { %v6224_v0 = vpop.f32.mrf.mxu1 }
 0x32e   : > { %v1200_v1 = vpop.f32.mrf.mxu1 }
 0x32f   : > { %v1201_v3 = vadd.f32 %v5689_v63, %v1200_v1 }
 0x330   : > { %v6225_v4 = vpop.f32.mrf.mxu1 }
 0x331   : > { %v7085_v5 = vpack.c.bf16 %v1201_v3, %v1198_v2 }
 0x333   : > { %1206 = vrot.lane.b32.xlu0 %v7085_v5, %s6858_s22 }
 0x337   : > { %1330 = vrot.lane.b32.xlu0 %v7085_v5, %s6859_s23 }
 0x33b   : > { %1328 = vrot.lane.b32.xlu0 %v7085_v5, %s6860_s26 }
 0x3a5   : > { %v1207_v6 = vpop.permute.xlu0 %1206 }
 0x3a6   : > { %v1213_v7 = vsel %vm1208_vm3, %v1207_v6, 0 }
 0x3a7   : > { %6227 = vmatpush3.bf16.xpose.msra.mxu1 %v1213_v7  ;;  %v6680_v7 = vld [vmem:[%s6912_s8] sm:$0xff]  }
 0x3a8   : > { %6232 = vmatprep.subr.bf16.mxu1 %v6856_v43 }
 0x3a9   : > { %v1331_v35 = vpop.permute.xlu0 %1330 }
 0x3aa   : > { %v1336_v37 = vsel %vm1208_vm3, %v1331_v35, 0 }
 0x3ad   : > { %v1329_v38 = vpop.permute.xlu0 %1328 }
 0x3ae   : > { %6229 = vmatmul.mubr.msk.bf16.vlgmr.msra.gmra.mxu1 %vm1208_vm3, %v7085_v5 }
 0x3af   : > { %6234 = vmatprep.mubr.msk.bf16.mxu1 %vm6857_vm2, %v6856_v43 }
 0x46e   : > { %v1249_v8 = vpop.f32.mrf.mxu1 }
 0x46f   : > { %v1256_v9 = vmul.f32 0.25, %v1249_v8 }
 0x470   : > { %v6230_v10 = vpop.f32.mrf.mxu1 }
 0x471   : > { %v1258_v11 = vsel %vm1208_vm3, %v1256_v9, -inf }
 0x472   : > { %1259 = vmax.xlane.f32.xlu1 %v1258_v11  ;;  %v1252_v12 = vpop.f32.mrf.mxu1 }
 0x473   : > { %v1257_v13 = vmul.f32 0.25, %v1252_v12 }
 0x474   : > { %v6231_v14 = vpop.f32.mrf.mxu1 }
 0x475   : > { %v1261_v15 = vsel %vm1208_vm3, %v1257_v13, -inf }
 0x476   : > { %1262 = vmax.xlane.f32.xlu1 %v1261_v15 }
 0x4fb   : > { %v1260_v16 = vpop.xlane.xlu1 %1259 }
 0x4fc   : > { %v1264_v17 = vsub.f32 %v1256_v9, %v1260_v16 }
 0x4fe   : > { %v1266_v18 = vmul.f32 1.442695, %v1264_v17 }
 0x4ff   : > { %v1263_v19 = vpop.xlane.xlu1 %1262 }
 0x500   : > { %6757 = vpow2.f32 %v1266_v18  ;;  %v1265_v20 = vsub.f32 %v1257_v13, %v1263_v19 }
 0x502   : > { %v1268_v21 = vmul.f32 1.442695, %v1265_v20  ;;  %v5700_v20 = vld [vmem:[%s6917_s14] ss:$0 sm:$0xff] }
 0x504   : > { %6759 = vpow2.f32 %v1268_v21 }
 0x50d   : > { %v6758_v22 = vpop.eup %6757 }
 0x50e   : > { %v1270_v23 = vsel %vm1208_vm3, %v6758_v22, 0.0 }
 0x50f   : > { %1271 = vadd.xlane.f32.xlu1 %v1270_v23 }
 0x511   : > { %v6760_v25 = vpop.eup %6759 }
 0x512   : > { %v1273_v26 = vsel %vm1208_vm3, %v6760_v25, 0.0 }
 0x513   : > { %1274 = vadd.xlane.f32.xlu1 %v1273_v26 }
 0x524   : > { %1281 = vrot.lane.b32.xlu1 %v7085_v5, %s6861_s28 }
 0x598   : > { %v1272_v27 = vpop.xlane.xlu1 %1271 }
 0x599   : > { %6761 = vrcp.f32 %v1272_v27 }
 0x59c   : > { %v1275_v28 = vpop.xlane.xlu1 %1274 }
 0x59d   : > { %6763 = vrcp.f32 %v1275_v28 }
 0x5a0   : > { %v1282_v29 = vpop.permute.xlu1 %1281 }
 0x5a1   : > { %6233 = vmatpush3.bf16.msra.mxu1 %v1282_v29 }
 0x5a2   : > { %6238 = vmatprep.subr.bf16.mxu1 %v6856_v43 }
 0x5a6   : > { %v6762_v31 = vpop.eup %6761 }
 0x5a7   : > { %v1278_v33 = vmul.f32 %v6762_v31, %v6758_v22 }
 0x5aa   : > { %v6764_v32 = vpop.eup %6763 }
 0x5ab   : > { %v1279_v34 = vmul.f32 %v6764_v32, %v6760_v25 }
 0x5ad   : > { %v1280_v36 = vpack.c.bf16 %v1279_v34, %v1278_v33 }
 0x5af   : > { %6235 = vmatmul.mubr.msk.bf16.vlgmr.msra.gmra.mxu1 %vm1208_vm3, %v1280_v36 }
 0x5b0   : > { %6239 = vmatpush3.bf16.xpose.msra.mxu1 %v1336_v37  ;;  %6240 = vmatprep.mubr.msk.bf16.mxu1 %vm6857_vm2, %v6856_v43 }
 0x5b1   : > { %6244 = vmatprep.subr.bf16.mxu1 %v6856_v43 }
 0x5b7   : > { %6241 = vmatmul.mubr.msk.bf16.vlgmr.msra.gmra.mxu1 %vm1208_vm3, %v1329_v38 }
 0x5b8   : > { %6246 = vmatprep.mubr.msk.bf16.mxu1 %vm6857_vm2, %v6856_v43 }
 0x66f   : > { %v1321_v39 = vpop.f32.mrf.mxu1 }
 0x671   : > { %v6236_v40 = vpop.f32.mrf.mxu1 }
 0x672   : > { %v6681_v40 = vld [vmem:[%s6932_s30 + $0x8] sm:$0xff]  }
 0x673   : > { %v1324_v41 = vpop.f32.mrf.mxu1  ;;  %6259 = vmatpush3.bf16.msra.mxu0 %v6681_v40 }
 0x674   : > { %6260 = vmatprep.subr.bf16.mxu0 %v6856_v43 }
 0x675   : > { %v6237_v42 = vpop.f32.mrf.mxu1 }
 0x677   : > { %v1372_v44 = vpop.f32.mrf.mxu1 }
 0x678   : > { %v1379_v45 = vmul.f32 0.25, %v1372_v44 }
 0x679   : > { %v6242_v46 = vpop.f32.mrf.mxu1 }
 0x67a   : > { %v1381_v47 = vsel %vm1208_vm3, %v1379_v45, -inf }
 0x67b   : > { %1382 = vmax.xlane.f32.xlu0 %v1381_v47  ;;  %v1375_v48 = vpop.f32.mrf.mxu1 }
 0x67c   : > { %v1380_v49 = vmul.f32 0.25, %v1375_v48 }
 0x67d   : > { %v6243_v50 = vpop.f32.mrf.mxu1 }
 0x67e   : > { %v1384_v51 = vsel %vm1208_vm3, %v1380_v49, -inf }
 0x67f   : > { %1385 = vmax.xlane.f32.xlu1 %v1384_v51  ;;  %v5701_v51 = vld [vmem:[%s6922_s19] ss:$0 sm:$0xff] }
 0x704   : > { %v1383_v52 = vpop.xlane.xlu0 %1382 }
 0x705   : > { %v1387_v53 = vsub.f32 %v1379_v45, %v1383_v52 }
 0x707   : > { %v1389_v54 = vmul.f32 1.442695, %v1387_v53 }
 0x708   : > { %v1386_v55 = vpop.xlane.xlu1 %1385 }
 0x709   : > { %6765 = vpow2.f32 %v1389_v54  ;;  %v1388_v56 = vsub.f32 %v1380_v49, %v1386_v55  ;;  %v5702_v55 = vld [vmem:[%s6927_s24] ss:$0 sm:$0xff] }
 0x70b   : > { %v1391_v57 = vmul.f32 1.442695, %v1388_v56 }
 0x70d   : > { %6767 = vpow2.f32 %v1391_v57 }
 0x716   : > { %v6766_v58 = vpop.eup %6765 }
 0x717   : > { %v1393_v59 = vsel %vm1208_vm3, %v6766_v58, 0.0 }
 0x718   : > { %1394 = vadd.xlane.f32.xlu0 %v1393_v59 }
 0x71a   : > { %v6768_v60 = vpop.eup %6767 }
 0x71b   : > { %v1396_v61 = vsel %vm1208_vm3, %v6768_v60, 0.0 }
 0x71c   : > { %1397 = vadd.xlane.f32.xlu0 %v1396_v61  ;;  %v6684_v61 = vld [vmem:[%s6942_s12 + $0x30] sm:$0xff]  }
 0x732   : > { %1404 = vrot.lane.b32.xlu0 %v7085_v5, %s6862_s1  ;;  %v6679_v5 = vld [vmem:[%s6912_s8 + $0x8] sm:$0xff]  }
 0x7a1   : > { %v1395_v62 = vpop.xlane.xlu0 %1394 }
 0x7a2   : > { %6769 = vrcp.f32 %v1395_v62  ;;  %v6685_v62 = vld [vmem:[%s6942_s12 + $0x28] sm:$0xff]  }
 0x7a5   : > { %v1398_v63 = vpop.xlane.xlu0 %1397 }
 0x7a6   : > { %6771 = vrcp.f32 %v1398_v63  ;;  %v6686_v63 = vld [vmem:[%s6942_s12 + $0x20] sm:$0xff]  }
 0x7a9   : > { %v1405_v0 = vpop.permute.xlu0 %1404 }
 0x7aa   : > { %6245 = vmatpush3.bf16.msra.mxu1 %v1405_v0  ;;  %v6687_v0 = vld [vmem:[%s6942_s12 + $0x18] sm:$0xff]  }
 0x7ab   : > { %6250 = vmatprep.subr.bf16.mxu1 %v6856_v43 }
 0x7af   : > { %v6770_v1 = vpop.eup %6769 }
 0x7b0   : > { %v1401_v3 = vmul.f32 %v6770_v1, %v6766_v58  ;;  %v6688_v1 = vld [vmem:[%s6942_s12 + $0x10] sm:$0xff]  }
 0x7b3   : > { %v6772_v2 = vpop.eup %6771 }
 0x7b4   : > { %v1402_v4 = vmul.f32 %v6772_v2, %v6768_v60  ;;  %v6683_v60 = vld [vmem:[%s6942_s12 + $0x38] sm:$0xff]   ;;  %v6689_v2 = vld [vmem:[%s6942_s12 + $0x8] sm:$0xff]  }
 0x7b6   : > { %v1403_v6 = vpack.c.bf16 %v1402_v4, %v1401_v3  ;;  %v6690_v3 = vld [vmem:[%s6942_s12] sm:$0xff]  }
 0x7b7   : > { %v5703_v4 = vld [vmem:[%s8173_s7] ss:$0 sm:$0xff] }
 0x7b8   : > { %6247 = vmatmul.mubr.msk.bf16.vlgmr.msra.gmra.mxu1 %vm1208_vm3, %v1403_v6 }
 0x7b9   : > { %6254 = vmatprep.mubr.msk.bf16.mxu1 %vm6857_vm2, %v6856_v43  ;;  %6251 = vmatpush3.bf16.msra.mxu1 %v6679_v5 }
 0x7ba   : > { %6252 = vmatprep.subr.bf16.mxu1 %v6856_v43 }
 0x7bd   : > { %6253 = vmatpush3.bf16.msra.mxu1 %v6680_v7 }
 0x7be   : > { %6266 = vmatprep.subr.bf16.mxu1 %v6856_v43 }
 0x878   : > { %v1444_v8 = vpop.f32.mrf.mxu1 }
 0x87a   : > { %v6248_v9 = vpop.f32.mrf.mxu1 }
 0x87c   : > { %v1447_v10 = vpop.f32.mrf.mxu1 }
 0x87d   : > { %v6653_v11 = vpack.i.bf16 %v1447_v10, %v1444_v8 }
 0x87e   : > { %v6249_v12 = vpop.f32.mrf.mxu1 }
 0x87f   : > { %6654 = vrot.lane.b32.xlu1 %v6653_v11, %s6863_s2 }
 0x8f1   : > { %v6655_v13 = vpop.permute.xlu1 %6654 }
 0x8f2   : > { %v6657_v14 = vunpack.i.h.bf16 %v6655_v13  ;;  %v6656_v15 = vunpack.i.l.bf16 %v6655_v13 }
 0x8f4   : > { %v1460_v16 = vsel %vm1208_vm3, %v1324_v41, %v6657_v14  ;;  %v1459_v17 = vsel %vm1208_vm3, %v1321_v39, %v6656_v15  ;;  %v6682_v41 = vld [vmem:[%s6932_s30] sm:$0xff]  }
 0x8f5   : > { %v1461_v18 = vpack.c.bf16 %v1460_v16, %v1459_v17  ;;  %6261 = vmatpush3.bf16.msra.mxu0 %v6682_v41 }
 0x8f6   : > { %6286 = vmatprep.subr.bf16.mxu0 %v6856_v43 }
 0x8f7   : > { %6255 = vmatmul.mubr.msk.bf16.vlgmr.msra.gmra.mxu1 %vm1092_vm1, %v1461_v18 }
 0x8f8   : > { %6282 = vmatprep.mubr.msk.bf16.mxu1 %vm6857_vm2, %v6856_v43  ;;  %6267 = vmatpush3.bf16.msra.mxu1 %v6683_v60 }
 0x8f9   : > { %6268 = vmatprep.subr.bf16.mxu1 %v6856_v43 }
 0x8fc   : > { %6269 = vmatpush3.bf16.msra.mxu1 %v6684_v61 }
 0x8fd   : > { %6270 = vmatprep.subr.bf16.mxu1 %v6856_v43 }
 0x900   : > { %6271 = vmatpush3.bf16.msra.mxu1 %v6685_v62  ;;  %v5718_v62 = vld [vmem:[%s6892_s21 + $0x1] ss:$0 sm:$0xff] }
 0x901   : > { %6272 = vmatprep.subr.bf16.mxu1 %v6856_v43 }
 0x904   : > { %6273 = vmatpush3.bf16.msra.mxu1 %v6686_v63 }
 0x905   : > { %6274 = vmatprep.subr.bf16.mxu1 %v6856_v43 }
 0x908   : > { %6275 = vmatpush3.bf16.msra.mxu1 %v6687_v0 }
 0x909   : > { %6276 = vmatprep.subr.bf16.mxu1 %v6856_v43 }
 0x90c   : > { %6277 = vmatpush3.bf16.msra.mxu1 %v6688_v1 }
 0x90d   : > { %6278 = vmatprep.subr.bf16.mxu1 %v6856_v43 }
 0x910   : > { %6279 = vmatpush3.bf16.msra.mxu1 %v6689_v2  ;;  %v5719_v2 = vld [vmem:[%s6897_s25 + $0x1] ss:$0 sm:$0xff] }
 0x911   : > { %6280 = vmatprep.subr.bf16.mxu1 %v6856_v43 }
 0x914   : > { %6281 = vmatpush3.bf16.msra.mxu1 %v6690_v3 }
 0x915   : > { %6312 = vmatprep.subr.bf16.mxu1 %v6856_v43 }
 0x9b7   : > { %v1515_v19 = vpop.f32.mrf.mxu1 }
 0x9b8   : > { %v1522_v21 = vadd.f32 %v1515_v19, %v7056_v24 }
 0x9b9   : > { %v6256_v22 = vpop.f32.mrf.mxu1 }
 0x9ba   : > { %v7136_v23 = vadd.f32 %v5700_v20, %v1522_v21 }
 0x9bb   : > { %v1518_v25 = vpop.f32.mrf.mxu1 }
 0x9bc   : > { %v1523_v26 = vadd.f32 %v1518_v25, %v7061_v30  ;;  %v1535_v27 = vsel %vm1092_vm1, %v7136_v23, 0.0 }
 0x9bd   : > { %1536 = vadd.xlane.f32.xlu1 %v1535_v27  ;;  %v6257_v28 = vpop.f32.mrf.mxu1 }
 0x9be   : > { %v7141_v29 = vadd.f32 %v5700_v20, %v1523_v26 }
 0x9c0   : > { %v1538_v31 = vsel %vm1092_vm1, %v7141_v29, 0.0 }
 0x9c1   : > { %1539 = vadd.xlane.f32.xlu0 %v1538_v31 }
 0xa46   : > { %v1537_v24 = vpop.xlane.xlu1 %1536 }
 0xa47   : > { %v1541_v32 = vmul.f32 0.03125, %v1537_v24 }
 0xa49   : > { %v1543_v33 = vsub.f32 %v7136_v23, %v1541_v32 }
 0xa4a   : > { %v1540_v34 = vpop.xlane.xlu0 %1539 }
 0xa4b   : > { %v1542_v35 = vmul.f32 0.03125, %v1540_v34  ;;  %v1545_v30 = vmul.f32 %v1543_v33, %v1543_v33  ;;  %v5715_v34 = vld [vmem:[%s8174_s10] ss:$0 sm:$0xff] }
 0xa4d   : > { %v1544_v36 = vsub.f32 %v7141_v29, %v1542_v35  ;;  %v1547_v37 = vsel %vm1092_vm1, %v1545_v30, 0.0 }
 0xa4e   : > { %1548 = vadd.xlane.f32.xlu0 %v1547_v37 }
 0xa4f   : > { %v1546_v38 = vmul.f32 %v1544_v36, %v1544_v36 }
 0xa51   : > { %v1550_v39 = vsel %vm1092_vm1, %v1546_v38, 0.0 }
 0xa52   : > { %1551 = vadd.xlane.f32.xlu1 %v1550_v39 }
 0xad7   : > { %v1549_v42 = vpop.xlane.xlu0 %1548 }
 0xad8   : > { %v1553_v44 = vmul.f32 0.03125, %v1549_v42 }
 0xada   : > { %v1555_v45 = vadd.f32 1e-06, %v1553_v44 }
 0xadb   : > { %v1552_v46 = vpop.xlane.xlu1 %1551 }
 0xadc   : > { %6773 = vrsqrt.f32 %v1555_v45  ;;  %v1554_v47 = vmul.f32 0.03125, %v1552_v46 }
 0xade   : > { %v1556_v48 = vadd.f32 1e-06, %v1554_v47 }
 0xae0   : > { %6775 = vrsqrt.f32 %v1556_v48 }
 0xae9   : > { %v6774_v49 = vpop.eup %6773 }
 0xaea   : > { %v1559_v50 = vmul.f32 %v6774_v49, %v1543_v33 }
 0xaec   : > { %v1567_v54 = vmul.f32 %v5701_v51, %v1559_v50 }
 0xaed   : > { %v6776_v52 = vpop.eup %6775 }
 0xaee   : > { %v1560_v53 = vmul.f32 %v6776_v52, %v1544_v36  ;;  %v1575_v57 = vadd.f32 %v5702_v55, %v1567_v54  ;;  %v6691_v52 = vld [vmem:[%s6902_s29 + $0x18] sm:$0xff]  }
 0xaf0   : > { %v1568_v56 = vmul.f32 %v5701_v51, %v1560_v53  ;;  %v6692_v53 = vld [vmem:[%s6902_s29 + $0x10] sm:$0xff]  }
 0xaf2   : > { %v1576_v58 = vadd.f32 %v5702_v55, %v1568_v56 }
 0xaf4   : > { %v1577_v59 = vpack.c.bf16 %v1576_v58, %v1575_v57 }
 0xaf6   : > { %6263 = vmatmul.mubr.msk.bf16.vlgmr.msra.gmra.mxu0 %vm1092_vm1, %v1577_v59 }
 0xaf7   : > { %6290 = vmatprep.mubr.msk.bf16.mxu0 %vm6857_vm2, %v6856_v43  ;;  %6287 = vmatpush3.bf16.msra.mxu0 %v6691_v52 }
 0xaf8   : > { %6288 = vmatprep.subr.bf16.mxu0 %v6856_v43 }
 0xafb   : > { %6289 = vmatpush3.bf16.msra.mxu0 %v6692_v53 }
 0xafc   : > { %6294 = vmatprep.subr.bf16.mxu0 %v6856_v43 }
 0xbb6   : > { %v1638_v6 = vpop.f32.mrf.mxu0 }
 0xbb7   : > { %v1639_v5 = vadd.f32 %v5703_v4, %v1638_v6 }
 0xbb8   : > { %v6264_v7 = vpop.f32.mrf.mxu0 }
 0xbb9   : > { %v1645_v8 = vmul.f32 %v1639_v5, %v1639_v5 }
 0xbba   : > { %v1641_v9 = vpop.f32.mrf.mxu0 }
 0xbbb   : > { %v1647_v10 = vmul.f32 %v1645_v8, %v1639_v5  ;;  %v1642_v11 = vadd.f32 %v5703_v4, %v1641_v9  ;;  %v5725_v8 = vld [vmem:[%s6907_s3 + $0x1] ss:$0 sm:$0xff] }
 0xbbc   : > { %v6265_v12 = vpop.f32.mrf.mxu0 }
 0xbbd   : > { %v1649_v13 = vmul.f32 0.044715, %v1647_v10  ;;  %v1646_v14 = vmul.f32 %v1642_v11, %v1642_v11 }
 0xbbf   : > { %v1651_v15 = vadd.f32 %v1649_v13, %v1639_v5  ;;  %v1648_v16 = vmul.f32 %v1646_v14, %v1642_v11 }
 0xbc1   : > { %v1653_v17 = vmul.f32 0.7978846, %v1651_v15  ;;  %v1650_v18 = vmul.f32 0.044715, %v1648_v16 }
 0xbc3   : > { %6777 = vtanh.f32 %v1653_v17  ;;  %v1652_v19 = vadd.f32 %v1650_v18, %v1642_v11 }
 0xbc5   : > { %v1654_v20 = vmul.f32 0.7978846, %v1652_v19 }
 0xbc7   : > { %6779 = vtanh.f32 %v1654_v20 }
 0xbd0   : > { %v6778_v21 = vpop.eup %6777 }
 0xbd1   : > { %v1657_v22 = vadd.f32 1.0, %v6778_v21 }
 0xbd3   : > { %v1659_v26 = vmul.f32 0.5, %v1657_v22 }
 0xbd4   : > { %v6780_v25 = vpop.eup %6779 }
 0xbd5   : > { %v1658_v27 = vadd.f32 1.0, %v6780_v25  ;;  %v1661_v31 = vmul.f32 %v1659_v26, %v1639_v5 }
 0xbd7   : > { %v1660_v28 = vmul.f32 0.5, %v1658_v27 }
 0xbd9   : > { %v1662_v24 = vmul.f32 %v1660_v28, %v1642_v11 }
 0xbdb   : > { %v1663_v32 = vpack.c.bf16 %v1662_v24, %v1661_v31 }
 0xbdd   : > { %6283 = vmatmul.mubr.bf16.vlgmr.msra.gmra.mxu1 %v1663_v32 }
 0xbde   : > { %6314 = vmatprep.mubr.msk.bf16.mxu1 %vm6857_vm2, %v6856_v43 }
 0xc9d   : > { %v1762_v33 = vpop.f32.mrf.mxu1 }
 0xc9e   : > { %v1769_v35 = vadd.f32 %v1762_v33, %v7136_v23 }
 0xc9f   : > { %v6284_v30 = vpop.f32.mrf.mxu1 }
 0xca0   : > { %v7179_v36 = vadd.f32 %v5715_v34, %v1769_v35 }
 0xca1   : > { %v1765_v37 = vpop.f32.mrf.mxu1 }
 0xca2   : > { %v1770_v38 = vadd.f32 %v1765_v37, %v7141_v29  ;;  %v1784_v39 = vsel %vm1092_vm1, %v7179_v36, 0.0 }
 0xca3   : > { %1785 = vadd.xlane.f32.xlu0 %v1784_v39  ;;  %v6285_v40 = vpop.f32.mrf.mxu1 }
 0xca4   : > { %v7184_v41 = vadd.f32 %v5715_v34, %v1770_v38 }
 0xca6   : > { %v1787_v42 = vsel %vm1092_vm1, %v7184_v41, 0.0 }
 0xca7   : > { %1788 = vadd.xlane.f32.xlu1 %v1787_v42 }
 0xd2c   : > { %v1786_v23 = vpop.xlane.xlu0 %1785 }
 0xd2d   : > { %v1790_v44 = vmul.f32 0.03125, %v1786_v23 }
 0xd2f   : > { %v1792_v45 = vsub.f32 %v7179_v36, %v1790_v44 }
 0xd30   : > { %v1789_v46 = vpop.xlane.xlu1 %1788 }
 0xd31   : > { %v1791_v47 = vmul.f32 0.03125, %v1789_v46  ;;  %v1794_v29 = vmul.f32 %v1792_v45, %v1792_v45 }
 0xd33   : > { %v1793_v48 = vsub.f32 %v7184_v41, %v1791_v47  ;;  %v1796_v49 = vsel %vm1092_vm1, %v1794_v29, 0.0 }
 0xd34   : > { %1797 = vadd.xlane.f32.xlu0 %v1796_v49 }
 0xd35   : > { %v1795_v50 = vmul.f32 %v1793_v48, %v1793_v48 }
 0xd37   : > { %v1799_v51 = vsel %vm1092_vm1, %v1795_v50, 0.0 }
 0xd38   : > { %1800 = vadd.xlane.f32.xlu1 %v1799_v51 }
 0xdbd   : > { %v1798_v54 = vpop.xlane.xlu0 %1797 }
 0xdbe   : > { %v1802_v55 = vmul.f32 0.03125, %v1798_v54 }
 0xdc0   : > { %v1804_v56 = vadd.f32 1e-06, %v1802_v55 }
 0xdc1   : > { %v1801_v57 = vpop.xlane.xlu1 %1800 }
 0xdc2   : > { %6781 = vrsqrt.f32 %v1804_v56  ;;  %v1803_v58 = vmul.f32 0.03125, %v1801_v57 }
 0xdc4   : > { %v1805_v59 = vadd.f32 1e-06, %v1803_v58 }
 0xdc6   : > { %6783 = vrsqrt.f32 %v1805_v59 }
 0xdcf   : > { %v6782_v60 = vpop.eup %6781 }
 0xdd0   : > { %v1808_v61 = vmul.f32 %v6782_v60, %v1792_v45 }
 0xdd2   : > { %v1816_v1 = vmul.f32 %v5718_v62, %v1808_v61 }
 0xdd3   : > { %v6784_v63 = vpop.eup %6783 }
 0xdd4   : > { %v1809_v0 = vmul.f32 %v6784_v63, %v1793_v48  ;;  %v1824_v4 = vadd.f32 %v5719_v2, %v1816_v1 }
 0xdd6   : > { %v1817_v3 = vmul.f32 %v5718_v62, %v1809_v0 }
 0xdd8   : > { %v1825_v6 = vadd.f32 %v5719_v2, %v1817_v3 }
 0xdda   : > { %v1826_v5 = vpack.c.bf16 %v1825_v6, %v1824_v4 }
 0xddc   : > { %6291 = vmatmul.mubr.msk.bf16.vlgmr.msra.gmra.mxu0 %vm1092_vm1, %v1826_v5 }
 0xddd   : > { %6296 = vmatprep.mubr.msk.bf16.mxu0 %vm6857_vm2, %v6856_v43 }
 0xe9c   : > { %v1889_v7 = vpop.f32.mrf.mxu0 }
 0xe9d   : > { %v1890_v11 = vadd.f32 %v5725_v8, %v1889_v7 }
 0xe9e   : > { %v6292_v9 = vpop.f32.mrf.mxu0 }
 0xea0   : > { %v1892_v10 = vpop.f32.mrf.mxu0 }
 0xea1   : > { %v1893_v12 = vadd.f32 %v5725_v8, %v1892_v10 }
 0xea2   : > { %v6293_v13 = vpop.f32.mrf.mxu0 }
 0xea3   : > { %v7202_v14 = vpack.c.bf16 %v1893_v12, %v1890_v11 }
 0xea5   : > { %1898 = vrot.lane.b32.xlu0 %v7202_v14, %s6858_s22  ;;  %s8178_s22 = sld [smem:[#allocation5_spill]] }
 0xea9   : > { %2021 = vrot.lane.b32.xlu0 %v7202_v14, %s6859_s23  ;;  %s8179_s23 = sld [smem:[#allocation6_spill]] }
 0xead   : > { %2019 = vrot.lane.b32.xlu0 %v7202_v14, %s6860_s26  ;;  %s8180_s26 = sld [smem:[#allocation13_spill]] }
 0xf17   : > { %v1899_v15 = vpop.permute.xlu0 %1898 }
 0xf18   : > { %v1904_v16 = vsel %vm1208_vm3, %v1899_v15, 0 }
 0xf19   : > { %6295 = vmatpush3.bf16.xpose.msra.mxu0 %v1904_v16  ;;  %v6694_v16 = vld [vmem:[%s6912_s8 + $0x10] sm:$0xff]  }
 0xf1a   : > { %6300 = vmatprep.subr.bf16.mxu0 %v6856_v43 }
 0xf1b   : > { %v2022_v46 = vpop.permute.xlu0 %2021 }
 0xf1c   : > { %v2027_v29 = vsel %vm1208_vm3, %v2022_v46, 0 }
 0xf1f   : > { %v2020_v48 = vpop.permute.xlu0 %2019 }
 0xf20   : > { %6297 = vmatmul.mubr.msk.bf16.vlgmr.msra.gmra.mxu0 %vm1208_vm3, %v7202_v14 }
 0xf21   : > { %6302 = vmatprep.mubr.msk.bf16.mxu0 %vm6857_vm2, %v6856_v43 }
 0xfe0   : > { %v1940_v17 = vpop.f32.mrf.mxu0 }
 0xfe1   : > { %v1947_v18 = vmul.f32 0.25, %v1940_v17 }
 0xfe2   : > { %v6298_v19 = vpop.f32.mrf.mxu0 }
 0xfe3   : > { %v1949_v20 = vsel %vm1208_vm3, %v1947_v18, -inf }
 0xfe4   : > { %1950 = vmax.xlane.f32.xlu1 %v1949_v20  ;;  %v1943_v21 = vpop.f32.mrf.mxu0 }
 0xfe5   : > { %v1948_v22 = vmul.f32 0.25, %v1943_v21 }
 0xfe6   : > { %v6299_v25 = vpop.f32.mrf.mxu0 }
 0xfe7   : > { %v1952_v26 = vsel %vm1208_vm3, %v1948_v22, -inf }
 0xfe8   : > { %1953 = vmax.xlane.f32.xlu1 %v1952_v26 }
0x106d   : > { %v1951_v27 = vpop.xlane.xlu1 %1950 }
0x106e   : > { %v1955_v28 = vsub.f32 %v1947_v18, %v1951_v27 }
0x1070   : > { %v1957_v31 = vmul.f32 1.442695, %v1955_v28 }
0x1071   : > { %v1954_v24 = vpop.xlane.xlu1 %1953 }
0x1072   : > { %6785 = vpow2.f32 %v1957_v31  ;;  %v1956_v32 = vsub.f32 %v1948_v22, %v1954_v24 }
0x1074   : > { %v1959_v33 = vmul.f32 1.442695, %v1956_v32  ;;  %v5741_v32 = vld [vmem:[%s6917_s14 + $0x1] ss:$0 sm:$0xff] }
0x1076   : > { %6787 = vpow2.f32 %v1959_v33 }
0x107f   : > { %v6786_v34 = vpop.eup %6785 }
0x1080   : > { %v1961_v35 = vsel %vm1208_vm3, %v6786_v34, 0.0 }
0x1081   : > { %1962 = vadd.xlane.f32.xlu1 %v1961_v35 }
0x1083   : > { %v6788_v30 = vpop.eup %6787 }
0x1084   : > { %v1964_v37 = vsel %vm1208_vm3, %v6788_v30, 0.0 }
0x1085   : > { %1965 = vadd.xlane.f32.xlu1 %v1964_v37 }
0x1096   : > { %1972 = vrot.lane.b32.xlu1 %v7202_v14, %s6861_s28  ;;  %s8181_s28 = sld [smem:[#allocation11_spill]] }
0x110a   : > { %v1963_v38 = vpop.xlane.xlu1 %1962 }
0x110b   : > { %6789 = vrcp.f32 %v1963_v38 }
0x110e   : > { %v1966_v39 = vpop.xlane.xlu1 %1965 }
0x110f   : > { %6791 = vrcp.f32 %v1966_v39 }
0x1112   : > { %v1973_v40 = vpop.permute.xlu1 %1972 }
0x1113   : > { %6301 = vmatpush3.bf16.msra.mxu0 %v1973_v40 }
0x1114   : > { %6306 = vmatprep.subr.bf16.mxu0 %v6856_v43 }
0x1118   : > { %v6790_v42 = vpop.eup %6789 }
0x1119   : > { %v1969_v44 = vmul.f32 %v6790_v42, %v6786_v34 }
0x111c   : > { %v6792_v23 = vpop.eup %6791 }
0x111d   : > { %v1970_v45 = vmul.f32 %v6792_v23, %v6788_v30 }
0x111f   : > { %v1971_v47 = vpack.c.bf16 %v1970_v45, %v1969_v44 }
0x1121   : > { %6303 = vmatmul.mubr.msk.bf16.vlgmr.msra.gmra.mxu0 %vm1208_vm3, %v1971_v47 }
0x1122   : > { %6307 = vmatpush3.bf16.xpose.msra.mxu0 %v2027_v29  ;;  %6308 = vmatprep.mubr.msk.bf16.mxu0 %vm6857_vm2, %v6856_v43 }
0x1123   : > { %6318 = vmatprep.subr.bf16.mxu0 %v6856_v43 }
0x1129   : > { %6309 = vmatmul.mubr.msk.bf16.vlgmr.msra.gmra.mxu0 %vm1208_vm3, %v2020_v48 }
0x112a   : > { %6322 = vmatprep.mubr.msk.bf16.mxu0 %vm6857_vm2, %v6856_v43 }
0x11e1   : > { %v2012_v49 = vpop.f32.mrf.mxu0 }
0x11e3   : > { %v6304_v50 = vpop.f32.mrf.mxu0 }
0x11e4   : > { %v6695_v50 = vld [vmem:[%s6932_s30 + $0x18] sm:$0xff]  }
0x11e5   : > { %v2015_v51 = vpop.f32.mrf.mxu0 }
0x11e7   : > { %v6305_v52 = vpop.f32.mrf.mxu0 }
0x11e9   : > { %v2063_v53 = vpop.f32.mrf.mxu0 }
0x11ea   : > { %v2070_v54 = vmul.f32 0.25, %v2063_v53 }
0x11eb   : > { %v6310_v55 = vpop.f32.mrf.mxu0 }
0x11ec   : > { %v2072_v56 = vsel %vm1208_vm3, %v2070_v54, -inf }
0x11ed   : > { %2073 = vmax.xlane.f32.xlu0 %v2072_v56  ;;  %v2066_v57 = vpop.f32.mrf.mxu0 }
0x11ee   : > { %v2071_v58 = vmul.f32 0.25, %v2066_v57 }
0x11ef   : > { %v6311_v59 = vpop.f32.mrf.mxu0 }
0x11f0   : > { %v2075_v60 = vsel %vm1208_vm3, %v2071_v58, -inf }
0x11f1   : > { %2076 = vmax.xlane.f32.xlu1 %v2075_v60  ;;  %v5744_v60 = vld [vmem:[%s6922_s19 + $0x1] ss:$0 sm:$0xff] }
0x1276   : > { %v2074_v61 = vpop.xlane.xlu0 %2073 }
0x1277   : > { %v2078_v62 = vsub.f32 %v2070_v54, %v2074_v61 }
0x1279   : > { %v2080_v63 = vmul.f32 1.442695, %v2078_v62 }
0x127a   : > { %v2077_v0 = vpop.xlane.xlu1 %2076 }
0x127b   : > { %6793 = vpow2.f32 %v2080_v63  ;;  %v2079_v1 = vsub.f32 %v2071_v58, %v2077_v0  ;;  %v5745_v0 = vld [vmem:[%s6927_s24 + $0x1] ss:$0 sm:$0xff] }
0x127d   : > { %v2082_v2 = vmul.f32 1.442695, %v2079_v1 }
0x127f   : > { %6795 = vpow2.f32 %v2082_v2 }
0x1288   : > { %v6794_v3 = vpop.eup %6793 }
0x1289   : > { %v2084_v4 = vsel %vm1208_vm3, %v6794_v3, 0.0 }
0x128a   : > { %2085 = vadd.xlane.f32.xlu0 %v2084_v4 }
0x128c   : > { %v6796_v6 = vpop.eup %6795 }
0x128d   : > { %v2087_v5 = vsel %vm1208_vm3, %v6796_v6, 0.0 }
0x128e   : > { %2088 = vadd.xlane.f32.xlu0 %v2087_v5  ;;  %v6698_v5 = vld [vmem:[%s6942_s12 + $0x70] sm:$0xff]  }
0x12a4   : > { %2095 = vrot.lane.b32.xlu0 %v7202_v14, %s6862_s1  ;;  %v6693_v14 = vld [vmem:[%s6912_s8 + $0x18] sm:$0xff]   ;;  %s8182_s1 = sld [smem:[#allocation9_spill]] }
0x12a5   : > { %6319 = vmatpush3.bf16.msra.mxu0 %v6693_v14 }
0x12a6   : > { %6320 = vmatprep.subr.bf16.mxu0 %v6856_v43 }
0x12a9   : > { %6321 = vmatpush3.bf16.msra.mxu0 %v6694_v16 }
0x12aa   : > { %6334 = vmatprep.subr.bf16.mxu0 %v6856_v43 }
0x1313   : > { %v2086_v7 = vpop.xlane.xlu0 %2085 }
0x1314   : > { %6797 = vrcp.f32 %v2086_v7  ;;  %v6699_v7 = vld [vmem:[%s6942_s12 + $0x68] sm:$0xff]  }
0x1317   : > { %v2089_v8 = vpop.xlane.xlu0 %2088 }
0x1318   : > { %6799 = vrcp.f32 %v2089_v8  ;;  %v6700_v8 = vld [vmem:[%s6942_s12 + $0x60] sm:$0xff]  }
0x131b   : > { %v2096_v9 = vpop.permute.xlu0 %2095 }
0x131c   : > { %6313 = vmatpush3.bf16.msra.mxu1 %v2096_v9  ;;  %v6701_v9 = vld [vmem:[%s6942_s12 + $0x58] sm:$0xff]  }
0x131d   : > { %6326 = vmatprep.subr.bf16.mxu1 %v6856_v43 }
0x1321   : > { %v6798_v10 = vpop.eup %6797 }
0x1322   : > { %v2092_v12 = vmul.f32 %v6798_v10, %v6794_v3  ;;  %v6702_v10 = vld [vmem:[%s6942_s12 + $0x50] sm:$0xff]  }
0x1325   : > { %v6800_v11 = vpop.eup %6799 }
0x1326   : > { %v2093_v13 = vmul.f32 %v6800_v11, %v6796_v6  ;;  %v6697_v6 = vld [vmem:[%s6942_s12 + $0x78] sm:$0xff]   ;;  %v6703_v11 = vld [vmem:[%s6942_s12 + $0x48] sm:$0xff]  }
0x1328   : > { %v2094_v15 = vpack.c.bf16 %v2093_v13, %v2092_v12  ;;  %v6704_v12 = vld [vmem:[%s6942_s12 + $0x40] sm:$0xff]  }
0x1329   : > { %v5751_v13 = vld [vmem:[%s8173_s7 + $0x1] ss:$0 sm:$0xff] }
0x132a   : > { %6315 = vmatmul.mubr.msk.bf16.vlgmr.msra.gmra.mxu1 %vm1208_vm3, %v2094_v15 }
0x132b   : > { %6330 = vmatprep.mubr.msk.bf16.mxu1 %vm6857_vm2, %v6856_v43  ;;  %6327 = vmatpush3.bf16.msra.mxu1 %v6695_v50 }
0x132c   : > { %6328 = vmatprep.subr.bf16.mxu1 %v6856_v43 }
0x13ea   : > { %v2135_v17 = vpop.f32.mrf.mxu1 }
0x13ec   : > { %v6316_v18 = vpop.f32.mrf.mxu1 }
0x13ee   : > { %v2138_v19 = vpop.f32.mrf.mxu1 }
0x13ef   : > { %v6658_v20 = vpack.i.bf16 %v2138_v19, %v2135_v17 }
0x13f0   : > { %v6317_v21 = vpop.f32.mrf.mxu1 }
0x13f1   : > { %6659 = vrot.lane.b32.xlu1 %v6658_v20, %s6863_s2  ;;  %s8183_s2 = sld [smem:[#allocation10_spill]] }
0x1463   : > { %v6660_v22 = vpop.permute.xlu1 %6659 }
0x1464   : > { %v6662_v25 = vunpack.i.h.bf16 %v6660_v22  ;;  %v6661_v26 = vunpack.i.l.bf16 %v6660_v22 }
0x1466   : > { %v2151_v27 = vsel %vm1208_vm3, %v2015_v51, %v6662_v25  ;;  %v2150_v28 = vsel %vm1208_vm3, %v2012_v49, %v6661_v26  ;;  %v6696_v51 = vld [vmem:[%s6932_s30 + $0x10] sm:$0xff]  }
0x1467   : > { %v2152_v31 = vpack.c.bf16 %v2151_v27, %v2150_v28  ;;  %6329 = vmatpush3.bf16.msra.mxu1 %v6696_v51 }
0x1468   : > { %6354 = vmatprep.subr.bf16.mxu1 %v6856_v43 }
0x1469   : > { %6323 = vmatmul.mubr.msk.bf16.vlgmr.msra.gmra.mxu0 %vm1092_vm1, %v2152_v31 }
0x146a   : > { %6350 = vmatprep.mubr.msk.bf16.mxu0 %vm6857_vm2, %v6856_v43  ;;  %6335 = vmatpush3.bf16.msra.mxu0 %v6697_v6  ;;  %v2591_v6 = vld [vmem:[%s8176_s0] sm:$0xff] }
0x146b   : > { %6336 = vmatprep.subr.bf16.mxu0 %v6856_v43 }
0x146e   : > { %6337 = vmatpush3.bf16.msra.mxu0 %v6698_v5  ;;  %v5786_v5 = vld [vmem:[%s8176_s0 + $0x10] sm:$0xff] }
0x146f   : > { %6338 = vmatprep.subr.bf16.mxu0 %v6856_v43 }
0x1472   : > { %6339 = vmatpush3.bf16.msra.mxu0 %v6699_v7  ;;  %v2592_v7 = vld [vmem:[%s8176_s0 + $0x8] sm:$0xff] }
0x1473   : > { %6340 = vmatprep.subr.bf16.mxu0 %v6856_v43 }
0x1476   : > { %6341 = vmatpush3.bf16.msra.mxu0 %v6700_v8  ;;  %v5817_v8 = vld [vmem:[%s8176_s0 + $0x48] sm:$0xff] }
0x1477   : > { %6342 = vmatprep.subr.bf16.mxu0 %v6856_v43 }
0x147a   : > { %6343 = vmatpush3.bf16.msra.mxu0 %v6701_v9  ;;  %v5798_v9 = vld [vmem:[%s8176_s0 + $0x20] sm:$0xff] }
0x147b   : > { %6344 = vmatprep.subr.bf16.mxu0 %v6856_v43 }
0x147e   : > { %6345 = vmatpush3.bf16.msra.mxu0 %v6702_v10  ;;  %v5826_v10 = vld [vmem:[%s8176_s0 + $0x58] sm:$0xff] }
0x147f   : > { %6346 = vmatprep.subr.bf16.mxu0 %v6856_v43 }
0x1482   : > { %6347 = vmatpush3.bf16.msra.mxu0 %v6703_v11  ;;  %v5799_v11 = vld [vmem:[%s8176_s0 + $0x28] sm:$0xff] }
0x1483   : > { %6348 = vmatprep.subr.bf16.mxu0 %v6856_v43 }
0x1486   : > { %6349 = vmatpush3.bf16.msra.mxu0 %v6704_v12  ;;  %v5835_v12 = vld [vmem:[%s8176_s0 + $0x68] sm:$0xff] }
0x1487   : > { %6386 = vmatprep.subr.bf16.mxu0 %v6856_v43 }
0x1529   : > { %v2207_v24 = vpop.f32.mrf.mxu0 }
0x152a   : > { %v2214_v33 = vadd.f32 %v2207_v24, %v7179_v36 }
0x152b   : > { %v6324_v34 = vpop.f32.mrf.mxu0 }
0x152c   : > { %v7253_v35 = vadd.f32 %v5741_v32, %v2214_v33 }
0x152d   : > { %v2210_v30 = vpop.f32.mrf.mxu0 }
0x152e   : > { %v2215_v37 = vadd.f32 %v2210_v30, %v7184_v41  ;;  %v2230_v38 = vsel %vm1092_vm1, %v7253_v35, 0.0 }
0x152f   : > { %2231 = vadd.xlane.f32.xlu1 %v2230_v38  ;;  %v6325_v39 = vpop.f32.mrf.mxu0 }
0x1530   : > { %v7258_v40 = vadd.f32 %v5741_v32, %v2215_v37 }
0x1532   : > { %v2233_v42 = vsel %vm1092_vm1, %v7258_v40, 0.0 }
0x1533   : > { %2234 = vadd.xlane.f32.xlu0 %v2233_v42 }
0x15b8   : > { %v2232_v36 = vpop.xlane.xlu1 %2231 }
0x15b9   : > { %v2236_v23 = vmul.f32 0.03125, %v2232_v36 }
0x15bb   : > { %v2238_v44 = vsub.f32 %v7253_v35, %v2236_v23 }
0x15bc   : > { %v2235_v45 = vpop.xlane.xlu0 %2234 }
0x15bd   : > { %v2237_v46 = vmul.f32 0.03125, %v2235_v45  ;;  %v2240_v41 = vmul.f32 %v2238_v44, %v2238_v44  ;;  %v6706_v45 = vld [vmem:[%s8175_s11] sm:$0xff]  }
0x15bf   : > { %v2239_v47 = vsub.f32 %v7258_v40, %v2237_v46  ;;  %v2242_v29 = vsel %vm1092_vm1, %v2240_v41, 0.0 }
0x15c0   : > { %2243 = vadd.xlane.f32.xlu0 %v2242_v29  ;;  %v5780_v29 = vld [vmem:[%s8174_s10 + $0x1] ss:$0 sm:$0xff] }
0x15c1   : > { %v2241_v48 = vmul.f32 %v2239_v47, %v2239_v47 }
0x15c3   : > { %v2245_v49 = vsel %vm1092_vm1, %v2241_v48, 0.0 }
0x15c4   : > { %2246 = vadd.xlane.f32.xlu1 %v2245_v49 }
0x1649   : > { %v2244_v52 = vpop.xlane.xlu0 %2243 }
0x164a   : > { %v2248_v53 = vmul.f32 0.03125, %v2244_v52 }
0x164c   : > { %v2250_v54 = vadd.f32 1e-06, %v2248_v53 }
0x164d   : > { %v2247_v55 = vpop.xlane.xlu1 %2246 }
0x164e   : > { %6801 = vrsqrt.f32 %v2250_v54  ;;  %v2249_v56 = vmul.f32 0.03125, %v2247_v55 }
0x1650   : > { %v2251_v57 = vadd.f32 1e-06, %v2249_v56 }
0x1652   : > { %6803 = vrsqrt.f32 %v2251_v57 }
0x165b   : > { %v6802_v58 = vpop.eup %6801 }
0x165c   : > { %v2254_v59 = vmul.f32 %v6802_v58, %v2238_v44  ;;  %v6705_v44 = vld [vmem:[%s8175_s11 + $0x8] sm:$0xff]   ;;  %v5787_v58 = vld [vmem:[%s8176_s0 + $0x18] sm:$0xff] }
0x165e   : > { %v2262_v63 = vmul.f32 %v5744_v60, %v2254_v59 }
0x165f   : > { %v6804_v61 = vpop.eup %6803 }
0x1660   : > { %v2255_v62 = vmul.f32 %v6804_v61, %v2239_v47  ;;  %v2270_v2 = vadd.f32 %v5745_v0, %v2262_v63 }
0x1662   : > { %v2263_v1 = vmul.f32 %v5744_v60, %v2255_v62 }
0x1664   : > { %v2271_v3 = vadd.f32 %v5745_v0, %v2263_v1 }
0x1666   : > { %v2272_v4 = vpack.c.bf16 %v2271_v3, %v2270_v2 }
0x1668   : > { %6331 = vmatmul.mubr.msk.bf16.vlgmr.msra.gmra.mxu1 %vm1092_vm1, %v2272_v4 }
0x1669   : > { %6358 = vmatprep.mubr.msk.bf16.mxu1 %vm6857_vm2, %v6856_v43  ;;  %6355 = vmatpush3.bf16.msra.mxu1 %v6705_v44  ;;  %v2586_v44 = vlaneseq }
0x166a   : > { %6356 = vmatprep.subr.bf16.mxu1 %v6856_v43 }
0x166d   : > { %6357 = vmatpush3.bf16.msra.mxu1 %v6706_v45 }
0x166e   : > { %6362 = vmatprep.subr.bf16.mxu1 %v6856_v43 }
0x1728   : > { %v2335_v15 = vpop.f32.mrf.mxu1 }
0x1729   : > { %v2336_v14 = vadd.f32 %v5751_v13, %v2335_v15  ;;  %v5844_v15 = vld [vmem:[%s8176_s0 + $0x78] sm:$0xff] }
0x172a   : > { %v6332_v16 = vpop.f32.mrf.mxu1 }
0x172b   : > { %v2342_v17 = vmul.f32 %v2336_v14, %v2336_v14  ;;  %v5853_v16 = vld [vmem:[%s8176_s0 + $0x88] sm:$0xff] }
0x172c   : > { %v2338_v18 = vpop.f32.mrf.mxu1 }
0x172d   : > { %v2344_v19 = vmul.f32 %v2342_v17, %v2336_v14  ;;  %v2339_v20 = vadd.f32 %v5751_v13, %v2338_v18  ;;  %v5807_v13 = vld [vmem:[%s8176_s0 + $0x30] sm:$0xff]  ;;  %v6707_v17 = vld [vmem:[%s8177_s18 + $0x18] sm:$0xff]  }
0x172e   : > { %v6333_v21 = vpop.f32.mrf.mxu1  ;;  %v6708_v18 = vld [vmem:[%s8177_s18 + $0x38] sm:$0xff]  }
0x172f   : > { %v2346_v22 = vmul.f32 0.044715, %v2344_v19  ;;  %v2343_v25 = vmul.f32 %v2339_v20, %v2339_v20  ;;  %v5816_v19 = vld [vmem:[%s8176_s0 + $0x40] sm:$0xff]  ;;  %v6710_v21 = vld [vmem:[%s8177_s18 + $0x30] sm:$0xff]  }
0x1731   : > { %v2348_v26 = vadd.f32 %v2346_v22, %v2336_v14  ;;  %v2345_v27 = vmul.f32 %v2343_v25, %v2339_v20  ;;  %v5825_v22 = vld [vmem:[%s8176_s0 + $0x50] sm:$0xff]  ;;  %v5834_v25 = vld [vmem:[%s8176_s0 + $0x60] sm:$0xff] }
0x1733   : > { %v2350_v28 = vmul.f32 0.7978846, %v2348_v26  ;;  %v2347_v31 = vmul.f32 0.044715, %v2345_v27  ;;  %v5843_v26 = vld [vmem:[%s8176_s0 + $0x70] sm:$0xff]  ;;  %v5852_v27 = vld [vmem:[%s8176_s0 + $0x80] sm:$0xff] }
0x1735   : > { %6805 = vtanh.f32 %v2350_v28  ;;  %v2349_v24 = vadd.f32 %v2347_v31, %v2339_v20 }
0x1737   : > { %v2351_v32 = vmul.f32 0.7978846, %v2349_v24 }
0x1739   : > { %6807 = vtanh.f32 %v2351_v32 }
0x1742   : > { %v6806_v33 = vpop.eup %6805 }
0x1743   : > { %v2354_v34 = vadd.f32 1.0, %v6806_v33 }
0x1745   : > { %v2356_v37 = vmul.f32 0.5, %v2354_v34 }
0x1746   : > { %v6808_v30 = vpop.eup %6807 }
0x1747   : > { %v2355_v38 = vadd.f32 1.0, %v6808_v30  ;;  %v2358_v42 = vmul.f32 %v2356_v37, %v2336_v14  ;;  %v5808_v14 = vld [vmem:[%s8176_s0 + $0x38] sm:$0xff] }
0x1749   : > { %v2357_v39 = vmul.f32 0.5, %v2355_v38 }
0x174b   : > { %v2359_v36 = vmul.f32 %v2357_v39, %v2339_v20  ;;  %v6709_v20 = vld [vmem:[%s8177_s18 + $0x10] sm:$0xff]  }
0x174d   : > { %v2360_v23 = vpack.c.bf16 %v2359_v36, %v2358_v42  ;;  %v5784_v36 = vld [vmem:[%s8178_s22] ss:$0 sm:$0xff]  ;;  %s8184_s22 = sld [smem:[#allocation14_spill]] }
0x174f   : > { %6351 = vmatmul.mubr.bf16.vlgmr.msra.gmra.mxu0 %v2360_v23 }
0x1750   : > { %6390 = vmatprep.mubr.msk.bf16.mxu0 %vm6857_vm2, %v6856_v43  ;;  %6387 = vmatpush3.bf16.msra.mxu0 %v6708_v18 }
0x1751   : > { %6388 = vmatprep.subr.bf16.mxu0 %v6856_v43 }
0x1754   : > { %6389 = vmatpush3.bf16.msra.mxu0 %v6710_v21 }
0x1755   : > { %6402 = vmatprep.subr.bf16.mxu0 %v6856_v43 }
0x180f   : > { %v2460_v46 = vpop.f32.mrf.mxu0 }
0x1810   : > { %v2467_v47 = vadd.f32 %v2460_v46, %v7253_v35 }
0x1811   : > { %v6352_v41 = vpop.f32.mrf.mxu0 }
0x1812   : > { %v2477_v51 = vadd.f32 %v5780_v29, %v2467_v47  ;;  %v5785_v47 = vld [vmem:[%s8179_s23] ss:$0 sm:$0xff]  ;;  %s8194_s23 = sld [smem:[#allocation12_spill]] }
0x1813   : > { %v2463_v48 = vpop.f32.mrf.mxu0 }
0x1814   : > { %v2468_v49 = vadd.f32 %v2463_v48, %v7258_v40  ;;  %v7356_v48 = vshrl.u32 %v2586_v44, 7 }
0x1815   : > { %v6353_v50 = vpop.f32.mrf.mxu0 }
0x1816   : > { %v2478_v52 = vadd.f32 %v5780_v29, %v2468_v49  ;;  %vm2612_vm4 = vcmp.lt.s32.totalorder %v7356_v48, 4  ;;  %vm2588_vm5 = vcmp.lt.s32.totalorder %v7356_v48, 5  ;;  %vm2834_vm6 = vcmp.lt.s32.totalorder %v7356_v48, 1 }
0x1817   : > { %vm2997_vm7 = vcmp.lt.s32.totalorder %v7356_v48, 7  ;;  %vm2750_vm8 = vcmp.lt.s32.totalorder %v7356_v48, 3 }
0x1818   : > { %v2479_v53 = vpack.c.bf16 %v2478_v52, %v2477_v51 }
0x181a   : > { %6359 = vmatmul.mubr.msk.bf16.vlgmr.msra.gmra.mxu1 %vm1092_vm1, %v2479_v53 }
0x181b   : > { %6366 = vmatprep.mubr.msk.bf16.mxu1 %vm6857_vm2, %v6856_v43  ;;  %6363 = vmatpush3.bf16.msra.mxu1 %v6707_v17 }
0x181c   : > { %6364 = vmatprep.subr.bf16.mxu1 %v6856_v43 }
0x181f   : > { %6365 = vmatpush3.bf16.msra.mxu1 %v6709_v20 }
0x1820   : > { %6370 = vmatprep.subr.bf16.mxu1 %v6856_v43 }
0x18da   : > { %v2533_v54 = vpop.f32.mrf.mxu1 }
0x18db   : > { %v2542_v55 = vsel %vm1092_vm1, %v2533_v54, 0.0 }
0x18dc   : > { %2543 = vadd.xlane.f32.xlu0 %v2542_v55  ;;  %v6360_v56 = vpop.f32.mrf.mxu1 }
0x18de   : > { %v2536_v35 = vpop.f32.mrf.mxu1 }
0x18df   : > { %v2545_v57 = vsel %vm1092_vm1, %v2536_v35, 0.0 }
0x18e0   : > { %2546 = vadd.xlane.f32.xlu1 %v2545_v57  ;;  %v6361_v40 = vpop.f32.mrf.mxu1 }
0x18f1   : > { %2625 = vperm.xlu1 %6664, %v5787_v58  }
0x1965   : > { %v2544_v59 = vpop.xlane.xlu0 %2543 }
0x1966   : > { %v2548_v60 = vmul.f32 0.03125, %v2544_v59 }
0x1968   : > { %v7307_v61 = vsub.f32 %v2533_v54, %v2548_v60 }
0x1969   : > { %v2547_v62 = vpop.xlane.xlu1 %2546 }
0x196a   : > { %v2549_v63 = vmul.f32 0.03125, %v2547_v62  ;;  %v2552_v0 = vmul.f32 %v7307_v61, %v7307_v61 }
0x196c   : > { %v7311_v1 = vsub.f32 %v2536_v35, %v2549_v63  ;;  %v2554_v2 = vsel %vm1092_vm1, %v2552_v0, 0.0 }
0x196d   : > { %2555 = vadd.xlane.f32.xlu0 %v2554_v2  ;;  %v7342_v28 = vpop.permute.xlu1 %2625 }
0x196e   : > { %v2553_v3 = vmul.f32 %v7311_v1, %v7311_v1 }
0x1970   : > { %v2557_v4 = vsel %vm1092_vm1, %v2553_v3, 0.0 }
0x1971   : > { %2558 = vadd.xlane.f32.xlu1 %v2557_v4 }
0x1982   : > { %2595 = vperm.xlu1 %6664, %v2591_v6  }
0x1983   : > { %2620 = vperm.xlu0 %6663, %v5786_v5  }
0x1986   : > { %2600 = vperm.xlu1 %6664, %v2592_v7  }
0x1987   : > { %2926 = vperm.xlu0 %6663, %v5817_v8  }
0x198a   : > { %2758 = vperm.xlu1 %6664, %v5798_v9  }
0x198b   : > { %3010 = vperm.xlu0 %6663, %v5826_v10  }
0x198e   : > { %2763 = vperm.xlu1 %6664, %v5799_v11   ;;  %v6712_v11 = vld [vmem:[%s8177_s18 + $0x58] sm:$0xff]  }
0x198f   : > { %3089 = vperm.xlu0 %6663, %v5835_v12   ;;  %v6713_v12 = vld [vmem:[%s8177_s18] sm:$0xff]  }
0x1992   : > { %2842 = vperm.xlu1 %6664, %v5807_v13  }
0x1993   : > { %3168 = vperm.xlu0 %6663, %v5844_v15  }
0x1996   : > { %2847 = vperm.xlu1 %6664, %v5808_v14  }
0x1997   : > { %3247 = vperm.xlu0 %6663, %v5853_v16  }
0x199a   : > { %2921 = vperm.xlu1 %6664, %v5816_v19  }
0x199e   : > { %3005 = vperm.xlu1 %6664, %v5825_v22  }
0x19a2   : > { %3084 = vperm.xlu1 %6664, %v5834_v25   ;;  %v6714_v25 = vld [vmem:[%s8177_s18 + $0x50] sm:$0xff]  }
0x19a6   : > { %3163 = vperm.xlu1 %6664, %v5843_v26   ;;  %v6715_v26 = vld [vmem:[%s8177_s18 + $0x28] sm:$0xff]  }
0x19aa   : > { %3242 = vperm.xlu1 %6664, %v5852_v27  }
0x19f6   : > { %v2556_v31 = vpop.xlane.xlu0 %2555 }
0x19f7   : > { %v2560_v24 = vmul.f32 0.03125, %v2556_v31 }
0x19f9   : > { %v2562_v32 = vadd.f32 1e-06, %v2560_v24 }
0x19fa   : > { %v2559_v33 = vpop.xlane.xlu1 %2558 }
0x19fb   : > { %6809 = vrsqrt.f32 %v2562_v32  ;;  %v2561_v34 = vmul.f32 0.03125, %v2559_v33 }
0x19fd   : > { %v2563_v30 = vadd.f32 1e-06, %v2561_v34 }
0x19fe   : > { %v7344_v37 = vpop.permute.xlu1 %2595  ;;  %v7364_v53 = vpop.permute.xlu0 %2620 }
0x19ff   : > { %6811 = vrsqrt.f32 %v2563_v30  ;;  %v6716_v30 = vld [vmem:[%s8177_s18 + $0x78] sm:$0xff]  }
0x1a02   : > { %v7346_v38 = vpop.permute.xlu1 %2600  ;;  %v7390_v63 = vpop.permute.xlu0 %2926 }
0x1a06   : > { %v7348_v39 = vpop.permute.xlu1 %2758  ;;  %v7424_v18 = vpop.permute.xlu0 %3010 }
0x1a08   : > { %v6810_v42 = vpop.eup %6809 }
0x1a09   : > { %v2566_v23 = vmul.f32 %v6810_v42, %v7307_v61  ;;  %v6717_v42 = vld [vmem:[%s8177_s18 + $0x20] sm:$0xff]  }
0x1a0a   : > { %v7352_v45 = vpop.permute.xlu1 %2763  ;;  %v7450_v34 = vpop.permute.xlu0 %3089 }
0x1a0b   : > { %v2574_v46 = vmul.f32 %v5784_v36, %v2566_v23 }
0x1a0c   : > { %v6812_v41 = vpop.eup %6811 }
0x1a0d   : > { %v2567_v29 = vmul.f32 %v6812_v41, %v7311_v1  ;;  %v7360_v50 = vadd.f32 %v5785_v47, %v2574_v46  ;;  %v6711_v1 = vld [vmem:[%s8177_s18 + $0x8] sm:$0xff]   ;;  %v6718_v41 = vld [vmem:[%s8177_s18 + $0x70] sm:$0xff]  }
0x1a0e   : > { %v7358_v49 = vpop.permute.xlu1 %2842 }
0x1a0f   : > { %v2575_v51 = vmul.f32 %v5784_v36, %v2567_v29  ;;  %v2610_v55 = vrot.slane %v7360_v50, 4  ;;  %v2584_v62 = vrot.slane %v7360_v50, 3  ;;  %v2832_v0 = vrot.slane %v7360_v50, 7 }
0x1a10   : > { %v2995_v17 = vrot.slane %v7360_v50, 1  ;;  %v2748_v19 = vrot.slane %v7360_v50, 5 }
0x1a11   : > { %v7362_v52 = vadd.f32 %v5785_v47, %v2575_v51  ;;  %v6719_v47 = vld [vmem:[%s8177_s18 + $0x48] sm:$0xff]  }
0x1a12   : > { %v7367_v54 = vpop.permute.xlu1 %2847 }
0x1a13   : > { %v2611_v56 = vrot.slane %v7362_v52, 4  ;;  %v2585_v35 = vrot.slane %v7362_v52, 3  ;;  %v2833_v58 = vrot.slane %v7362_v52, 7  ;;  %v2996_v10 = vrot.slane %v7362_v52, 1 }
0x1a14   : > { %v2749_v16 = vrot.slane %v7362_v52, 5 }
0x1a15   : > { %v7374_v57 = vsel %vm2612_vm4, %v2610_v55, %v2611_v56  ;;  %v7378_v40 = vsel %vm2612_vm4, %v2611_v56, %v2610_v55  ;;  %v7396_v3 = vsel %vm2588_vm5, %v2585_v35, %v2584_v62  ;;  %v7400_v4 = vsel %vm2588_vm5, %v2584_v62, %v2585_v35  ;;  %v7471_v55 = vpop.permute.xlu0 %3168  ;;  %v6720_v35 = vld [vmem:[%s8177_s18 + $0x40] sm:$0xff]  }
0x1a16   : > { %v2628_v59 = vmul.f32 %v7364_v53, %v7378_v40  ;;  %v2629_v60 = vmul.f32 %v7342_v28, %v7374_v57  ;;  %v7387_v61 = vpop.permute.xlu1 %2921  ;;  %v2836_v6 = vsel %vm2834_vm6, %v2833_v58, %v2832_v0  ;;  %v2835_v5 = vsel %vm2834_vm6, %v2832_v0, %v2833_v58  ;;  %v6723_v0 = vld [vmem:[%s8177_s18 + $0x88] sm:$0xff]  }
0x1a17   : > { %v2850_v7 = vmul.f32 %v7358_v49, %v2836_v6  ;;  %v2851_v8 = vmul.f32 %v7367_v54, %v2835_v5  ;;  %v2603_v13 = vmul.f32 %v7344_v37, %v7396_v3  ;;  %v2604_v15 = vmul.f32 %v7346_v38, %v7400_v4  ;;  %v6724_v5 = vld [vmem:[%s8177_s18 + $0x80] sm:$0xff]  }
0x1a18   : > { %v2630_v2 = vpack.c.bf16 %v2629_v60, %v2628_v59  ;;  %v2999_v20 = vsel %vm2997_vm7, %v2996_v10, %v2995_v17  ;;  %v2998_v21 = vsel %vm2997_vm7, %v2995_v17, %v2996_v10  ;;  %v7443_v24 = vsel %vm2750_vm8, %v2749_v16, %v2748_v19  ;;  %v6721_v59 = vld [vmem:[%s8177_s18 + $0x68] sm:$0xff]   ;;  %v6722_v60 = vld [vmem:[%s8177_s18 + $0x60] sm:$0xff]  }
0x1a19   : > { %v2852_v14 = vpack.c.bf16 %v2851_v8, %v2850_v7  ;;  %v2605_v27 = vpack.c.bf16 %v2604_v15, %v2603_v13  ;;  %v2751_v32 = vsel %vm2750_vm8, %v2748_v19, %v2749_v16  ;;  %v3014_v33 = vmul.f32 %v7424_v18, %v2999_v20  ;;  %v7505_v6 = vpop.permute.xlu0 %3247 }
0x1a1a   : > { %6367 = vmatmul.mubr.msk.bf16.vlgmr.msra.gmra.mxu1 %vm1092_vm1, %v2630_v2  ;;  %v7409_v9 = vpop.permute.xlu1 %3005  ;;  %v2766_v36 = vmul.f32 %v7348_v39, %v7443_v24  ;;  %v2767_v23 = vmul.f32 %v7352_v45, %v2751_v32  ;;  %v3172_v56 = vmul.f32 %v7471_v55, %v7378_v40  ;;  %v2930_v40 = vmul.f32 %v7390_v63, %v7362_v52 }
0x1a1b   : > { %6371 = vmatpush3.bf16.msra.mxu1 %v6711_v1  ;;  %6374 = vmatprep.mubr.msk.bf16.mxu1 %vm6857_vm2, %v6856_v43  ;;  %v3013_v31 = vmul.f32 %v7409_v9, %v2998_v21  ;;  %v3093_v62 = vmul.f32 %v7450_v34, %v7396_v3  ;;  %v3251_v3 = vmul.f32 %v7505_v6, %v7443_v24 }
0x1a1c   : > { %6372 = vmatprep.subr.bf16.mxu1 %v6856_v43  ;;  %6391 = vmatmul.mubr.msk.bf16.vlgmr.msra.gmra.mxu0 %vm1092_vm1, %v2852_v14  ;;  %v2768_v29 = vpack.c.bf16 %v2767_v23, %v2766_v36 }
0x1a1d   : > { %6403 = vmatpush3.bf16.msra.mxu0 %v6712_v11  ;;  %6406 = vmatprep.mubr.msk.bf16.mxu0 %vm6857_vm2, %v6856_v43  ;;  %v3015_v44 = vpack.c.bf16 %v3014_v33, %v3013_v31 }
0x1a1e   : > { %v7433_v22 = vpop.permute.xlu1 %3084  ;;  %6404 = vmatprep.subr.bf16.mxu0 %v6856_v43 }
0x1a1f   : > { %6373 = vmatpush3.bf16.msra.mxu1 %v6713_v12  ;;  %v3092_v52 = vmul.f32 %v7433_v22, %v7400_v4 }
0x1a20   : > { %6378 = vmatprep.subr.bf16.mxu1 %v6856_v43 }
0x1a21   : > { %6405 = vmatpush3.bf16.msra.mxu0 %v6714_v25  ;;  %v3094_v1 = vpack.c.bf16 %v3093_v62, %v3092_v52 }
0x1a22   : > { %6375 = vmatmul.mubr.msk.bf16.vlgmr.msra.gmra.mxu1 %vm1092_vm1, %v2605_v27  ;;  %6418 = vmatprep.subr.bf16.mxu0 %v6856_v43  ;;  %v7459_v46 = vpop.permute.xlu1 %3163 }
0x1a23   : > { %6379 = vmatpush3.bf16.msra.mxu1 %v6715_v26  ;;  %6382 = vmatprep.mubr.msk.bf16.mxu1 %vm6857_vm2, %v6856_v43  ;;  %v3171_v51 = vmul.f32 %v7459_v46, %v7374_v57  ;;  %v2929_v57 = vmul.f32 %v7387_v61, %v7360_v50 }
0x1a24   : > { %6380 = vmatprep.subr.bf16.mxu1 %v6856_v43  ;;  %6407 = vmatmul.mubr.msk.bf16.vlgmr.msra.gmra.mxu0 %vm1092_vm1, %v3015_v44 }
0x1a25   : > { %6419 = vmatpush3.bf16.msra.mxu0 %v6716_v30  ;;  %6422 = vmatprep.mubr.msk.bf16.mxu0 %vm6857_vm2, %v6856_v43  ;;  %v3173_v58 = vpack.c.bf16 %v3172_v56, %v3171_v51  ;;  %v2931_v50 = vpack.c.bf16 %v2930_v40, %v2929_v57 }
0x1a26   : > { %6420 = vmatprep.subr.bf16.mxu0 %v6856_v43  ;;  %v7502_v2 = vpop.permute.xlu1 %3242 }
0x1a27   : > { %6381 = vmatpush3.bf16.msra.mxu1 %v6717_v42  ;;  %v3250_v4 = vmul.f32 %v7502_v2, %v2751_v32 }
0x1a28   : > { %6394 = vmatprep.subr.bf16.mxu1 %v6856_v43 }
0x1a29   : > { %6421 = vmatpush3.bf16.msra.mxu0 %v6718_v41  ;;  %v3252_v7 = vpack.c.bf16 %v3251_v3, %v3250_v4 }
0x1a2a   : > { %6383 = vmatmul.mubr.msk.bf16.vlgmr.msra.gmra.mxu1 %vm1092_vm1, %v2768_v29  ;;  %6434 = vmatprep.subr.bf16.mxu0 %v6856_v43 }
0x1a2b   : > { %6395 = vmatpush3.bf16.msra.mxu1 %v6719_v47  ;;  %6398 = vmatprep.mubr.msk.bf16.mxu1 %vm6857_vm2, %v6856_v43 }
0x1a2c   : > { %6396 = vmatprep.subr.bf16.mxu1 %v6856_v43  ;;  %6423 = vmatmul.mubr.msk.bf16.vlgmr.msra.gmra.mxu0 %vm1092_vm1, %v3173_v58 }
0x1a2d   : > { %6438 = vmatprep.mubr.msk.bf16.mxu0 %vm6857_vm2, %v6856_v43 }
0x1a2f   : > { %6397 = vmatpush3.bf16.msra.mxu1 %v6720_v35 }
0x1a30   : > { %6410 = vmatprep.subr.bf16.mxu1 %v6856_v43 }
0x1a32   : > { %6399 = vmatmul.mubr.msk.bf16.vlgmr.msra.gmra.mxu1 %vm1092_vm1, %v2931_v50 }
0x1a33   : > { %6411 = vmatpush3.bf16.msra.mxu1 %v6721_v59  ;;  %6414 = vmatprep.mubr.msk.bf16.mxu1 %vm6857_vm2, %v6856_v43 }
0x1a34   : > { %6412 = vmatprep.subr.bf16.mxu1 %v6856_v43 }
0x1a37   : > { %6413 = vmatpush3.bf16.msra.mxu1 %v6722_v60 }
0x1a38   : > { %6426 = vmatprep.subr.bf16.mxu1 %v6856_v43 }
0x1a3a   : > { %6415 = vmatmul.mubr.msk.bf16.vlgmr.msra.gmra.mxu1 %vm1092_vm1, %v3094_v1 }
0x1a3b   : > { %6427 = vmatpush3.bf16.msra.mxu1 %v6723_v0  ;;  %6430 = vmatprep.mubr.msk.bf16.mxu1 %vm6857_vm2, %v6856_v43 }
0x1a3c   : > { %6428 = vmatprep.subr.bf16.mxu1 %v6856_v43 }
0x1a3f   : > { %6429 = vmatpush3.bf16.msra.mxu1 %v6724_v5 }
0x1a40   : > { %6442 = vmatprep.subr.bf16.mxu1 %v6856_v43 }
0x1a42   : > { %6431 = vmatmul.mubr.msk.bf16.vlgmr.msra.gmra.mxu1 %vm1092_vm1, %v3252_v7 }
0x1a43   : > { %6446 = vmatprep.mubr.msk.bf16.mxu1 %vm6857_vm2, %v6856_v43 }
0x1ada   : > { %v2685_v8 = vpop.f32.mrf.mxu1 }
0x1adc   : > { %v6368_v10 = vpop.f32.mrf.mxu1  ;;  %v2907_v11 = vpop.f32.mrf.mxu0 }
0x1ade   : > { %v2688_v12 = vpop.f32.mrf.mxu1  ;;  %v6392_v13 = vpop.f32.mrf.mxu0 }
0x1ae0   : > { %v6369_v15 = vpop.f32.mrf.mxu1  ;;  %v2910_v14 = vpop.f32.mrf.mxu0 }
0x1ae2   : > { %v2741_v16 = vpop.f32.mrf.mxu1  ;;  %v6393_v17 = vpop.f32.mrf.mxu0 }
0x1ae3   : > { %v2742_v42 = vadd.f32 %v2741_v16, %v2685_v8 }
0x1ae4   : > { %v6376_v19 = vpop.f32.mrf.mxu1  ;;  %v3070_v20 = vpop.f32.mrf.mxu0 }
0x1ae6   : > { %v2744_v21 = vpop.f32.mrf.mxu1  ;;  %v6408_v25 = vpop.f32.mrf.mxu0 }
0x1ae7   : > { %v2745_v29 = vadd.f32 %v2744_v21, %v2688_v12 }
0x1ae8   : > { %v6377_v26 = vpop.f32.mrf.mxu1  ;;  %v3073_v27 = vpop.f32.mrf.mxu0 }
0x1aea   : > { %v2823_v31 = vpop.f32.mrf.mxu1  ;;  %v6409_v24 = vpop.f32.mrf.mxu0 }
0x1aeb   : > { %v2830_v44 = vadd.f32 %v2823_v31, %v2742_v42  ;;  %v5924_v42 = vld [vmem:[%s8180_s26 + $0x48] sm:$0xff] }
0x1aec   : > { %v6384_v32 = vpop.f32.mrf.mxu1  ;;  %v3228_v33 = vpop.f32.mrf.mxu0 }
0x1aed   : > { %v2914_v57 = vadd.f32 %v2907_v11, %v2830_v44  ;;  %v5926_v44 = vld [vmem:[%s8180_s26 + $0x58] sm:$0xff] }
0x1aee   : > { %v2826_v30 = vpop.f32.mrf.mxu1  ;;  %v6424_v36 = vpop.f32.mrf.mxu0 }
0x1aef   : > { %v2831_v35 = vadd.f32 %v2826_v30, %v2745_v29  ;;  %v5923_v36 = vld [vmem:[%s8180_s26 + $0x40] sm:$0xff]  ;;  %v5929_v29 = vld [vmem:[%s8180_s26 + $0x70] sm:$0xff] }
0x1af0   : > { %v6385_v23 = vpop.f32.mrf.mxu1  ;;  %v3231_v41 = vpop.f32.mrf.mxu0 }
0x1af1   : > { %v2915_v50 = vadd.f32 %v2910_v14, %v2831_v35  ;;  %v5925_v23 = vld [vmem:[%s8180_s26 + $0x50] sm:$0xff]  ;;  %v4068_v35 = vld [vmem:[%s8180_s26 + $0x8] sm:$0xff] }
0x1af2   : > { %v2986_v47 = vpop.f32.mrf.mxu1  ;;  %v6425_v51 = vpop.f32.mrf.mxu0 }
0x1af3   : > { %v2993_v40 = vadd.f32 %v2986_v47, %v2914_v57  ;;  %v5928_v47 = vld [vmem:[%s8180_s26 + $0x68] sm:$0xff]  ;;  %v5930_v51 = vld [vmem:[%s8180_s26 + $0x78] sm:$0xff] }
0x1af4   : > { %v6400_v56 = vpop.f32.mrf.mxu1  ;;  %v6725_v57 = vld [vmem:[%s8181_s28 + $0x18] sm:$0xff]  }
0x1af5   : > { %v3077_v62 = vadd.f32 %v3070_v20, %v2993_v40  ;;  %v4067_v56 = vld [vmem:[%s8180_s26] sm:$0xff]  ;;  %v4069_v40 = vld [vmem:[%s8180_s26 + $0x10] sm:$0xff]  ;;  %6435 = vmatpush3.bf16.msra.mxu0 %v6725_v57 }
0x1af6   : > { %v2989_v58 = vpop.f32.mrf.mxu1  ;;  %6436 = vmatprep.subr.bf16.mxu0 %v6856_v43  ;;  %v5992_v57 = vld [vmem:[%s8180_s26 + $0x160] sm:$0xff] }
0x1af7   : > { %v2994_v52 = vadd.f32 %v2989_v58, %v2915_v50  ;;  %v6726_v58 = vld [vmem:[%s8181_s28 + $0x8] sm:$0xff]   ;;  %v6727_v50 = vld [vmem:[%s8181_s28 + $0x10] sm:$0xff]  }
0x1af8   : > { %v6401_v59 = vpop.f32.mrf.mxu1  ;;  %6443 = vmatpush3.bf16.msra.mxu1 %v6726_v58  ;;  %v5993_v58 = vld [vmem:[%s8180_s26 + $0x168] sm:$0xff] }
0x1af9   : > { %v3078_v4 = vadd.f32 %v3073_v27, %v2994_v52  ;;  %v4070_v59 = vld [vmem:[%s8180_s26 + $0x18] sm:$0xff]  ;;  %6444 = vmatprep.subr.bf16.mxu1 %v6856_v43  ;;  %v5943_v52 = vld [vmem:[%s8180_s26 + $0x80] sm:$0xff]  ;;  %6437 = vmatpush3.bf16.msra.mxu0 %v6727_v50 }
0x1afa   : > { %v3149_v60 = vpop.f32.mrf.mxu1  ;;  %6450 = vmatprep.subr.bf16.mxu0 %v6856_v43  ;;  %v6007_v50 = vld [vmem:[%s8180_s26 + $0x1a0] sm:$0xff] }
0x1afb   : > { %v3156_v1 = vadd.f32 %v3149_v60, %v3077_v62  ;;  %v6728_v60 = vld [vmem:[%s8181_s28] sm:$0xff]   ;;  %v5944_v62 = vld [vmem:[%s8180_s26 + $0x88] sm:$0xff] }
0x1afc   : > { %v6416_v0 = vpop.f32.mrf.mxu1  ;;  %6445 = vmatpush3.bf16.msra.mxu1 %v6728_v60  ;;  %v6008_v60 = vld [vmem:[%s8180_s26 + $0x1a8] sm:$0xff] }
0x1afd   : > { %v3235_v8 = vadd.f32 %v3228_v33, %v3156_v1  ;;  %6458 = vmatprep.subr.bf16.mxu1 %v6856_v43  ;;  %v5945_v0 = vld [vmem:[%s8180_s26 + $0x90] sm:$0xff]  ;;  %v5946_v1 = vld [vmem:[%s8180_s26 + $0x98] sm:$0xff] }
0x1afe   : > { %v3152_v5 = vpop.f32.mrf.mxu1 }
0x1aff   : > { %v3157_v7 = vadd.f32 %v3152_v5, %v3078_v4  ;;  %v4071_v5 = vld [vmem:[%s8180_s26 + $0x20] sm:$0xff]  ;;  %v4072_v4 = vld [vmem:[%s8180_s26 + $0x28] sm:$0xff] }
0x1b00   : > { %v6417_v3 = vpop.f32.mrf.mxu1 }
0x1b01   : > { %v3236_v11 = vadd.f32 %v3231_v41, %v3157_v7  ;;  %v5927_v41 = vld [vmem:[%s8180_s26 + $0x60] sm:$0xff]  ;;  %v4073_v3 = vld [vmem:[%s8180_s26 + $0x30] sm:$0xff]  ;;  %v4074_v7 = vld [vmem:[%s8180_s26 + $0x38] sm:$0xff] }
0x1b02   : > { %v3307_v10 = vpop.f32.mrf.mxu1 }
0x1b03   : > { %v3314_v12 = vadd.f32 %v3307_v10, %v3235_v8  ;;  %v5947_v8 = vld [vmem:[%s8180_s26 + $0xa0] sm:$0xff]  ;;  %v5948_v10 = vld [vmem:[%s8180_s26 + $0xa8] sm:$0xff] }
0x1b04   : > { %v6432_v13 = vpop.f32.mrf.mxu1 }
0x1b05   : > { %v3318_v15 = vsel %vm1092_vm1, %v3314_v12, 0.0  ;;  %v5950_v13 = vld [vmem:[%s8180_s26 + $0xb8] sm:$0xff] }
0x1b06   : > { %3319 = vadd.xlane.f32.xlu1 %v3318_v15  ;;  %v3310_v16 = vpop.f32.mrf.mxu1  ;;  %v5958_v15 = vld [vmem:[%s8180_s26 + $0xc0] sm:$0xff] }
0x1b07   : > { %v3315_v17 = vadd.f32 %v3310_v16, %v3236_v11  ;;  %v5959_v11 = vld [vmem:[%s8180_s26 + $0xc8] sm:$0xff]  ;;  %v5960_v16 = vld [vmem:[%s8180_s26 + $0xd0] sm:$0xff] }
0x1b08   : > { %v6433_v14 = vpop.f32.mrf.mxu1 }
0x1b09   : > { %v3321_v19 = vsel %vm1092_vm1, %v3315_v17, 0.0  ;;  %v5973_v14 = vld [vmem:[%s8180_s26 + $0x100] sm:$0xff] }
0x1b0a   : > { %3322 = vadd.xlane.f32.xlu0 %v3321_v19  ;;  %v5974_v19 = vld [vmem:[%s8180_s26 + $0x108] sm:$0xff] }
0x1b8f   : > { %v3320_v20 = vpop.xlane.xlu1 %3319 }
0x1b90   : > { %v3324_v21 = vmul.f32 0.03125, %v3320_v20  ;;  %v5975_v20 = vld [vmem:[%s8180_s26 + $0x110] sm:$0xff] }
0x1b92   : > { %v7520_v25 = vsub.f32 %v3314_v12, %v3324_v21  ;;  %v5949_v12 = vld [vmem:[%s8180_s26 + $0xb0] sm:$0xff]  ;;  %v5976_v21 = vld [vmem:[%s8180_s26 + $0x118] sm:$0xff] }
0x1b93   : > { %v3323_v26 = vpop.xlane.xlu0 %3322 }
0x1b94   : > { %v3325_v27 = vmul.f32 0.03125, %v3323_v26  ;;  %v3328_v31 = vmul.f32 %v7520_v25, %v7520_v25  ;;  %v5962_v26 = vld [vmem:[%s8180_s26 + $0xe0] sm:$0xff] }
0x1b96   : > { %v7524_v24 = vsub.f32 %v3315_v17, %v3325_v27  ;;  %v3330_v32 = vsel %vm1092_vm1, %v3328_v31, 0.0  ;;  %v5961_v17 = vld [vmem:[%s8180_s26 + $0xd8] sm:$0xff]  ;;  %v5963_v27 = vld [vmem:[%s8180_s26 + $0xe8] sm:$0xff]  ;;  %v5964_v31 = vld [vmem:[%s8180_s26 + $0xf0] sm:$0xff] }
0x1b97   : > { %3331 = vadd.xlane.f32.xlu0 %v3330_v32  ;;  %v5965_v32 = vld [vmem:[%s8180_s26 + $0xf8] sm:$0xff] }
0x1b98   : > { %v3329_v33 = vmul.f32 %v7524_v24, %v7524_v24 }
0x1b9a   : > { %v3333_v30 = vsel %vm1092_vm1, %v3329_v33, 0.0  ;;  %v5977_v33 = vld [vmem:[%s8180_s26 + $0x120] sm:$0xff] }
0x1b9b   : > { %3334 = vadd.xlane.f32.xlu1 %v3333_v30  ;;  %v5978_v30 = vld [vmem:[%s8180_s26 + $0x128] sm:$0xff] }
0x1bac   : > { %4145 = vperm.xlu1 %6664, %v5924_v42   ;;  %v5979_v42 = vld [vmem:[%s8180_s26 + $0x130] sm:$0xff] }
0x1bad   : > { %4140 = vperm.xlu0 %6663, %v5923_v36   ;;  %v5980_v36 = vld [vmem:[%s8180_s26 + $0x138] sm:$0xff] }
0x1bb0   : > { %4150 = vperm.xlu1 %6664, %v5925_v23   ;;  %v5988_v23 = vld [vmem:[%s8180_s26 + $0x140] sm:$0xff] }
0x1bb1   : > { %4155 = vperm.xlu0 %6663, %v5926_v44   ;;  %v5989_v44 = vld [vmem:[%s8180_s26 + $0x148] sm:$0xff] }
0x1bb4   : > { %4160 = vperm.xlu1 %6664, %v5927_v41   ;;  %v5990_v41 = vld [vmem:[%s8180_s26 + $0x150] sm:$0xff] }
0x1bb5   : > { %4165 = vperm.xlu0 %6663, %v5928_v47   ;;  %v5991_v47 = vld [vmem:[%s8180_s26 + $0x158] sm:$0xff] }
0x1bb8   : > { %4170 = vperm.xlu1 %6664, %v5929_v29   ;;  %v6003_v29 = vld [vmem:[%s8180_s26 + $0x180] sm:$0xff] }
0x1bb9   : > { %4175 = vperm.xlu0 %6663, %v5930_v51   ;;  %v6004_v51 = vld [vmem:[%s8180_s26 + $0x188] sm:$0xff] }
0x1bbc   : > { %4077 = vperm.xlu1 %6664, %v4067_v56   ;;  %v6005_v56 = vld [vmem:[%s8180_s26 + $0x190] sm:$0xff] }
0x1bbd   : > { %4082 = vperm.xlu0 %6663, %v4068_v35   ;;  %v6006_v35 = vld [vmem:[%s8180_s26 + $0x198] sm:$0xff] }
0x1bc0   : > { %4087 = vperm.xlu1 %6664, %v4069_v40   ;;  %v5994_v40 = vld [vmem:[%s8180_s26 + $0x170] sm:$0xff] }
0x1bc1   : > { %4092 = vperm.xlu0 %6663, %v4070_v59   ;;  %v5995_v59 = vld [vmem:[%s8180_s26 + $0x178] sm:$0xff] }
0x1bc4   : > { %4378 = vperm.xlu1 %6664, %v5943_v52   ;;  %v6009_v52 = vld [vmem:[%s8180_s26 + $0x1b0] sm:$0xff] }
0x1bc5   : > { %4383 = vperm.xlu0 %6663, %v5944_v62   ;;  %v6010_v62 = vld [vmem:[%s8180_s26 + $0x1b8] sm:$0xff] }
0x1bc8   : > { %4388 = vperm.xlu1 %6664, %v5945_v0   ;;  %v6018_v0 = vld [vmem:[%s8180_s26 + $0x1c0] sm:$0xff] }
0x1bc9   : > { %4393 = vperm.xlu0 %6663, %v5946_v1   ;;  %v6019_v1 = vld [vmem:[%s8180_s26 + $0x1c8] sm:$0xff] }
0x1bcc   : > { %4097 = vperm.xlu1 %6664, %v4071_v5   ;;  %v6020_v5 = vld [vmem:[%s8180_s26 + $0x1d0] sm:$0xff] }
0x1bcd   : > { %4102 = vperm.xlu0 %6663, %v4072_v4   ;;  %v6021_v4 = vld [vmem:[%s8180_s26 + $0x1d8] sm:$0xff] }
0x1bd0   : > { %4107 = vperm.xlu1 %6664, %v4073_v3  }
0x1bd1   : > { %4112 = vperm.xlu0 %6663, %v4074_v7  }
0x1bd4   : > { %4398 = vperm.xlu1 %6664, %v5947_v8   ;;  %v6033_v8 = vld [vmem:[%s8180_s26 + $0x200] sm:$0xff] }
0x1bd5   : > { %4403 = vperm.xlu0 %6663, %v5948_v10   ;;  %v6034_v10 = vld [vmem:[%s8180_s26 + $0x208] sm:$0xff] }
0x1bd8   : > { %4408 = vperm.xlu1 %6664, %v5949_v12  }
0x1bd9   : > { %4413 = vperm.xlu0 %6663, %v5950_v13  }
0x1bdc   : > { %4533 = vperm.xlu1 %6664, %v5958_v15  }
0x1bdd   : > { %4538 = vperm.xlu0 %6663, %v5959_v11   ;;  %v6035_v11 = vld [vmem:[%s8180_s26 + $0x210] sm:$0xff] }
0x1be0   : > { %4543 = vperm.xlu1 %6664, %v5960_v16   ;;  %v6036_v16 = vld [vmem:[%s8180_s26 + $0x218] sm:$0xff] }
0x1be1   : > { %4548 = vperm.xlu0 %6663, %v5961_v17  }
0x1be4   : > { %4688 = vperm.xlu1 %6664, %v5973_v14   ;;  %v6022_v14 = vld [vmem:[%s8180_s26 + $0x1e0] sm:$0xff] }
0x1be5   : > { %4693 = vperm.xlu0 %6663, %v5974_v19   ;;  %v6023_v19 = vld [vmem:[%s8180_s26 + $0x1e8] sm:$0xff] }
0x1be8   : > { %4698 = vperm.xlu1 %6664, %v5975_v20   ;;  %v6024_v20 = vld [vmem:[%s8180_s26 + $0x1f0] sm:$0xff] }
0x1be9   : > { %4703 = vperm.xlu0 %6663, %v5976_v21   ;;  %v6025_v21 = vld [vmem:[%s8180_s26 + $0x1f8] sm:$0xff] }
0x1bec   : > { %4553 = vperm.xlu1 %6664, %v5962_v26   ;;  %v6037_v26 = vld [vmem:[%s8180_s26 + $0x220] sm:$0xff] }
0x1bed   : > { %4558 = vperm.xlu0 %6663, %v5963_v27  }
0x1bf0   : > { %4563 = vperm.xlu1 %6664, %v5964_v31   ;;  %v5861_v31 = vld [vmem:[%s8182_s1] ss:$0 sm:$0xff]  ;;  %s6058_s1 = sshll.u32 %s8215_s16, 6 }
0x1bf1   : > { %4568 = vperm.xlu0 %6663, %v5965_v32   ;;  %v6038_v32 = vld [vmem:[%s8180_s26 + $0x228] sm:$0xff] }
0x1bf4   : > { %4708 = vperm.xlu1 %6664, %v5977_v33  }
0x1bf5   : > { %4713 = vperm.xlu0 %6663, %v5978_v30  }
0x1bf8   : > { %4718 = vperm.xlu1 %6664, %v5979_v42   ;;  %v6039_v42 = vld [vmem:[%s8180_s26 + $0x230] sm:$0xff] }
0x1bf9   : > { %4723 = vperm.xlu0 %6663, %v5980_v36  }
0x1bfc   : > { %4843 = vperm.xlu1 %6664, %v5988_v23   ;;  %v5862_v23 = vld [vmem:[%s8183_s2] ss:$0 sm:$0xff]  ;;  %s930_s2 = scalar_lea.vmem %s7022_s6, %s6058_s1 }
0x1bfd   : > { %4848 = vperm.xlu0 %6663, %v5989_v44   ;;  %v6040_v44 = vld [vmem:[%s8180_s26 + $0x238] sm:$0xff] }
0x1c00   : > { %4853 = vperm.xlu1 %6664, %v5990_v41  }
0x1c01   : > { %4858 = vperm.xlu0 %6663, %v5991_v47  }
0x1c04   : > { %4998 = vperm.xlu1 %6664, %v6003_v29  }
0x1c05   : > { %5003 = vperm.xlu0 %6663, %v6004_v51  }
0x1c08   : > { %5008 = vperm.xlu1 %6664, %v6005_v56  }
0x1c09   : > { %5013 = vperm.xlu0 %6663, %v6006_v35  }
0x1c0c   : > { %4863 = vperm.xlu1 %6664, %v5992_v57  }
0x1c0d   : > { %4868 = vperm.xlu0 %6663, %v5993_v58  }
0x1c10   : > { %4873 = vperm.xlu1 %6664, %v5994_v40  }
0x1c11   : > { %4878 = vperm.xlu0 %6663, %v5995_v59  }
0x1c14   : > { %5018 = vperm.xlu1 %6664, %v6007_v50  }
0x1c15   : > { %5023 = vperm.xlu0 %6663, %v6008_v60  }
0x1c18   : > { %5028 = vperm.xlu1 %6664, %v6009_v52  }
0x1c19   : > { %5033 = vperm.xlu0 %6663, %v6010_v62  }
0x1c1c   : > { %5153 = vperm.xlu1 %6664, %v6018_v0  }
0x1c1d   : > { %5158 = vperm.xlu0 %6663, %v6019_v1  }
0x1c20   : > { %5163 = vperm.xlu1 %6664, %v6020_v5   ;;  %v3332_v3 = vpop.xlane.xlu0 %3331 }
0x1c21   : > { %v3336_v7 = vmul.f32 0.03125, %v3332_v3  ;;  %5168 = vperm.xlu0 %6663, %v6021_v4   ;;  %v6729_v4 = vld [vmem:[%s8181_s28 + $0x28] sm:$0xff]   ;;  %v6730_v3 = vld [vmem:[%s8181_s28 + $0x38] sm:$0xff]  }
0x1c23   : > { %v3338_v12 = vadd.f32 1e-06, %v3336_v7 }
0x1c24   : > { %5308 = vperm.xlu1 %6664, %v6033_v8   ;;  %v3335_v13 = vpop.xlane.xlu1 %3334 }
0x1c25   : > { %6813 = vrsqrt.f32 %v3338_v12  ;;  %v3337_v15 = vmul.f32 0.03125, %v3335_v13  ;;  %5313 = vperm.xlu0 %6663, %v6034_v10   ;;  %v6731_v12 = vld [vmem:[%s8181_s28 + $0x20] sm:$0xff]   ;;  %v6732_v13 = vld [vmem:[%s8181_s28 + $0x30] sm:$0xff]  }
0x1c27   : > { %v3339_v17 = vadd.f32 1e-06, %v3337_v15 }
0x1c28   : > { %5318 = vperm.xlu1 %6664, %v6035_v11  }
0x1c29   : > { %6815 = vrsqrt.f32 %v3339_v17  ;;  %5323 = vperm.xlu0 %6663, %v6036_v16  }
0x1c2c   : > { %5173 = vperm.xlu1 %6664, %v6022_v14  }
0x1c2d   : > { %5178 = vperm.xlu0 %6663, %v6023_v19   ;;  %v6734_v19 = vld [vmem:[%s8181_s28 + $0x58] sm:$0xff]  }
0x1c30   : > { %5183 = vperm.xlu1 %6664, %v6024_v20  }
0x1c31   : > { %5188 = vperm.xlu0 %6663, %v6025_v21  }
0x1c32   : > { %v6814_v27 = vpop.eup %6813 }
0x1c33   : > { %v3342_v33 = vmul.f32 %v6814_v27, %v7520_v25  ;;  %v6736_v27 = vld [vmem:[%s8181_s28 + $0x50] sm:$0xff]  }
0x1c34   : > { %5328 = vperm.xlu1 %6664, %v6037_v26   ;;  %v6735_v26 = vld [vmem:[%s8181_s28 + $0x40] sm:$0xff]  }
0x1c35   : > { %v3350_v30 = vmul.f32 %v5861_v31, %v3342_v33  ;;  %5333 = vperm.xlu0 %6663, %v6038_v32  }
0x1c36   : > { %v6816_v36 = vpop.eup %6815 }
0x1c37   : > { %v3343_v41 = vmul.f32 %v6816_v36, %v7524_v24  ;;  %v7614_v47 = vadd.f32 %v5862_v23, %v3350_v30  ;;  %v6738_v36 = vld [vmem:[%s8181_s28 + $0x78] sm:$0xff]  }
0x1c38   : > { %5338 = vperm.xlu1 %6664, %v6039_v42   ;;  %v6737_v42 = vld [vmem:[%s8181_s28 + $0x68] sm:$0xff]  }
0x1c39   : > { %v3351_v29 = vmul.f32 %v5861_v31, %v3343_v41  ;;  %5343 = vperm.xlu0 %6663, %v6040_v44   ;;  %v3371_v56 = vrot.slane %v7614_v47, 4  ;;  %v3360_v35 = vrot.slane %v7614_v47, 3  ;;  %v3495_v58 = vrot.slane %v7614_v47, 5 }
0x1c3a   : > { %v3565_v7 = vrot.slane %v7614_v47, 7  ;;  %v3701_v20 = vrot.slane %v7614_v47, 1  ;;  %v3635_v30 = vmul.f32 %v7614_v47, %v7387_v61 }
0x1c3b   : > { %v3359_v51 = vadd.f32 %v5862_v23, %v3351_v29 }
0x1c3d   : > { %v3372_v25 = vrot.slane %v3359_v51, 4  ;;  %v3361_v57 = vrot.slane %v3359_v51, 3  ;;  %v3496_v40 = vrot.slane %v3359_v51, 5  ;;  %v3566_v59 = vrot.slane %v3359_v51, 7 }
0x1c3e   : > { %v3702_v14 = vrot.slane %v3359_v51, 1  ;;  %v3636_v31 = vmul.f32 %v3359_v51, %v7390_v63 }
0x1c3f   : > { %v7621_v24 = vsel %vm2612_vm4, %v3371_v56, %v3372_v25  ;;  %v7625_v50 = vsel %vm2612_vm4, %v3372_v25, %v3371_v56  ;;  %v7629_v60 = vsel %vm2588_vm5, %v3360_v35, %v3361_v57  ;;  %v7633_v52 = vsel %vm2588_vm5, %v3361_v57, %v3360_v35  ;;  %v7733_v25 = vpop.permute.xlu1 %4145  ;;  %v7735_v35 = vpop.permute.xlu0 %4140 }
0x1c40   : > { %v3375_v62 = vmul.f32 %v7625_v50, %v7364_v53  ;;  %v3376_v0 = vmul.f32 %v7621_v24, %v7342_v28  ;;  %v3364_v1 = vmul.f32 %v7633_v52, %v7344_v37  ;;  %v3365_v5 = vmul.f32 %v7629_v60, %v7346_v38 }
0x1c41   : > { %v7648_v53 = vsel %vm2750_vm8, %v3496_v40, %v3495_v58  ;;  %v7652_v28 = vsel %vm2750_vm8, %v3495_v58, %v3496_v40  ;;  %v3567_v37 = vsel %vm2834_vm6, %v3565_v7, %v3566_v59  ;;  %v3568_v38 = vsel %vm2834_vm6, %v3566_v59, %v3565_v7 }
0x1c42   : > { %v3377_v8 = vpack.c.bf16 %v3376_v0, %v3375_v62  ;;  %v3366_v10 = vpack.c.bf16 %v3365_v5, %v3364_v1  ;;  %v3499_v15 = vmul.f32 %v7648_v53, %v7348_v39  ;;  %v3500_v11 = vmul.f32 %v7652_v28, %v7352_v45  ;;  %v6733_v39 = vld [vmem:[%s8181_s28 + $0x48] sm:$0xff]   ;;  %v7764_v1 = vld [vmem:[%s8184_s22 + $0x18] sm:$0xff]  }
0x1c43   : > { %v3569_v16 = vmul.f32 %v3568_v38, %v7358_v49  ;;  %v3570_v17 = vmul.f32 %v3567_v37, %v7367_v54  ;;  %v3703_v49 = vsel %vm2997_vm7, %v3701_v20, %v3702_v14  ;;  %v3704_v54 = vsel %vm2997_vm7, %v3702_v14, %v3701_v20  ;;  %v7737_v57 = vpop.permute.xlu1 %4150  ;;  %v7739_v58 = vpop.permute.xlu0 %4155 }
0x1c44   : > { %6439 = vmatmul.mubr.msk.bf16.vlgmr.msra.gmra.mxu0 %vm1092_vm1, %v3377_v8  ;;  %6447 = vmatmul.mubr.msk.bf16.vlgmr.msra.gmra.mxu1 %vm1092_vm1, %v3366_v10  ;;  %v3501_v45 = vpack.c.bf16 %v3500_v11, %v3499_v15  ;;  %v3705_v32 = vmul.f32 %v3703_v49, %v7409_v9  ;;  %v3706_v33 = vmul.f32 %v3704_v54, %v7424_v18  ;;  %v6739_v9 = vld [vmem:[%s8181_s28 + $0x60] sm:$0xff]   ;;  %v6740_v18 = vld [vmem:[%s8181_s28 + $0x70] sm:$0xff]  }
0x1c45   : > { %6451 = vmatpush3.bf16.msra.mxu0 %v6729_v4  ;;  %6459 = vmatpush3.bf16.msra.mxu1 %v6730_v3  ;;  %v3571_v21 = vpack.c.bf16 %v3570_v17, %v3569_v16  ;;  %v3637_v63 = vpack.c.bf16 %v3636_v31, %v3635_v30  ;;  %v3771_v61 = vmul.f32 %v7629_v60, %v7433_v22  ;;  %v6741_v22 = vld [vmem:[%s8181_s28 + $0x88] sm:$0xff]  }
0x1c46   : > { %6452 = vmatprep.subr.bf16.mxu0 %v6856_v43  ;;  %6460 = vmatprep.subr.bf16.mxu1 %v6856_v43  ;;  %v3707_v23 = vpack.c.bf16 %v3706_v33, %v3705_v32  ;;  %v3772_v44 = vmul.f32 %v7633_v52, %v7450_v34  ;;  %v3837_v41 = vmul.f32 %v7621_v24, %v7459_v46  ;;  %v6742_v34 = vld [vmem:[%s8181_s28 + $0x80] sm:$0xff]  }
0x1c47   : > { %6454 = vmatprep.mubr.msk.bf16.mxu0 %vm6857_vm2, %v6856_v43  ;;  %6462 = vmatprep.mubr.msk.bf16.mxu1 %vm6857_vm2, %v6856_v43  ;;  %v3838_v47 = vmul.f32 %v7625_v50, %v7471_v55  ;;  %v3903_v46 = vmul.f32 %v7652_v28, %v7502_v2  ;;  %v3904_v55 = vmul.f32 %v7648_v53, %v7505_v6  ;;  %v7742_v2 = vpop.permute.xlu1 %4160  ;;  %v7744_v6 = vpop.permute.xlu0 %4165  ;;  %v6744_v24 = vld [vmem:[%s8184_s22] sm:$0xff]   ;;  %v7752_v50 = vld [vmem:[%s8184_s22 + $0x10] sm:$0xff]  }
0x1c48   : > { %v3773_v29 = vpack.c.bf16 %v3772_v44, %v3771_v61 }
0x1c49   : > { %6453 = vmatpush3.bf16.msra.mxu0 %v6731_v12  ;;  %6461 = vmatpush3.bf16.msra.mxu1 %v6732_v13  ;;  %v3839_v51 = vpack.c.bf16 %v3838_v47, %v3837_v41  ;;  %v3905_v56 = vpack.c.bf16 %v3904_v55, %v3903_v46 }
0x1c4a   : > { %6466 = vmatprep.subr.bf16.mxu0 %v6856_v43  ;;  %6474 = vmatprep.subr.bf16.mxu1 %v6856_v43 }
0x1c4b   : > { %v7746_v40 = vpop.permute.xlu1 %4170  ;;  %v7748_v59 = vpop.permute.xlu0 %4175 }
0x1c4c   : > { %6455 = vmatmul.mubr.msk.bf16.vlgmr.msra.gmra.mxu0 %vm1092_vm1, %v3501_v45  ;;  %6463 = vmatmul.mubr.msk.bf16.vlgmr.msra.gmra.mxu1 %vm1092_vm1, %v3571_v21 }
0x1c4d   : > { %6467 = vmatpush3.bf16.msra.mxu0 %v6733_v39  ;;  %6475 = vmatpush3.bf16.msra.mxu1 %v6734_v19 }
0x1c4e   : > { %6468 = vmatprep.subr.bf16.mxu0 %v6856_v43  ;;  %6476 = vmatprep.subr.bf16.mxu1 %v6856_v43 }
0x1c4f   : > { %6470 = vmatprep.mubr.msk.bf16.mxu0 %vm6857_vm2, %v6856_v43  ;;  %6478 = vmatprep.mubr.msk.bf16.mxu1 %vm6857_vm2, %v6856_v43  ;;  %v7755_v60 = vpop.permute.xlu1 %4077  ;;  %v7757_v52 = vpop.permute.xlu0 %4082 }
0x1c51   : > { %6469 = vmatpush3.bf16.msra.mxu0 %v6735_v26  ;;  %6477 = vmatpush3.bf16.msra.mxu1 %v6736_v27 }
0x1c52   : > { %6482 = vmatprep.subr.bf16.mxu0 %v6856_v43  ;;  %6490 = vmatprep.subr.bf16.mxu1 %v6856_v43 }
0x1c53   : > { %v7759_v62 = vpop.permute.xlu1 %4087  ;;  %v7761_v0 = vpop.permute.xlu0 %4092 }
0x1c54   : > { %6471 = vmatmul.mubr.msk.bf16.vlgmr.msra.gmra.mxu0 %vm1092_vm1, %v3637_v63  ;;  %6479 = vmatmul.mubr.msk.bf16.vlgmr.msra.gmra.mxu1 %vm1092_vm1, %v3707_v23 }
0x1c55   : > { %6483 = vmatpush3.bf16.msra.mxu0 %v6737_v42  ;;  %6491 = vmatpush3.bf16.msra.mxu1 %v6738_v36 }
0x1c56   : > { %6484 = vmatprep.subr.bf16.mxu0 %v6856_v43  ;;  %6492 = vmatprep.subr.bf16.mxu1 %v6856_v43 }
0x1c57   : > { %6486 = vmatprep.mubr.msk.bf16.mxu0 %vm6857_vm2, %v6856_v43  ;;  %6494 = vmatprep.mubr.msk.bf16.mxu1 %vm6857_vm2, %v6856_v43  ;;  %v7767_v5 = vpop.permute.xlu1 %4378  ;;  %v7769_v4 = vpop.permute.xlu0 %4383 }
0x1c59   : > { %6485 = vmatpush3.bf16.msra.mxu0 %v6739_v9  ;;  %6493 = vmatpush3.bf16.msra.mxu1 %v6740_v18 }
0x1c5a   : > { %6498 = vmatprep.subr.bf16.mxu0 %v6856_v43 }
0x1c5b   : > { %v7771_v3 = vpop.permute.xlu1 %4388  ;;  %v7773_v7 = vpop.permute.xlu0 %4393 }
0x1c5c   : > { %6487 = vmatmul.mubr.msk.bf16.vlgmr.msra.gmra.mxu0 %vm1092_vm1, %v3773_v29  ;;  %6495 = vmatmul.mubr.msk.bf16.vlgmr.msra.gmra.mxu1 %vm1092_vm1, %v3839_v51 }
0x1c5d   : > { %6499 = vmatpush3.bf16.msra.mxu0 %v6741_v22  ;;  %6502 = vmatprep.mubr.msk.bf16.mxu0 %vm6857_vm2, %v6856_v43 }
0x1c5e   : > { %6500 = vmatprep.subr.bf16.mxu0 %v6856_v43  ;;  %v6743_v43 = vld [vmem:[%s8184_s22 + $0x8] sm:$0xff]  }
0x1c5f   : > { %6506 = vmatprep.subr.bf16.mxu1 %v6743_v43  ;;  %v7775_v8 = vpop.permute.xlu1 %4097  ;;  %v7777_v10 = vpop.permute.xlu0 %4102 }
0x1c60   : > { %6507 = vmatpush3.bf16.msra.mxu1 %v6743_v43 }
0x1c61   : > { %6501 = vmatpush3.bf16.msra.mxu0 %v6742_v34  ;;  %6526 = vmatprep.subr.bf16.mxu1 %v7752_v50 }
0x1c62   : > { %6516 = vmatprep.subr.bf16.mxu0 %v6744_v24 }
0x1c63   : > { %v7779_v53 = vpop.permute.xlu1 %4107  ;;  %v7781_v28 = vpop.permute.xlu0 %4112 }
0x1c64   : > { %6503 = vmatmul.mubr.msk.bf16.vlgmr.msra.gmra.mxu0 %vm1092_vm1, %v3905_v56 }
0x1c65   : > { %6517 = vmatpush3.bf16.msra.mxu0 %v6744_v24 }
0x1c66   : > { %6536 = vmatprep.subr.bf16.mxu0 %v7764_v1 }
0x1c67   : > { %v7783_v37 = vpop.permute.xlu1 %4398  ;;  %v7785_v38 = vpop.permute.xlu0 %4403 }
0x1c6b   : > { %v7787_v12 = vpop.permute.xlu1 %4408  ;;  %v7789_v13 = vpop.permute.xlu0 %4413 }
0x1c6f   : > { %v7791_v15 = vpop.permute.xlu1 %4533  ;;  %v7793_v11 = vpop.permute.xlu0 %4538 }
0x1c73   : > { %v7795_v16 = vpop.permute.xlu1 %4543  ;;  %v7797_v17 = vpop.permute.xlu0 %4548 }
0x1c77   : > { %v7799_v14 = vpop.permute.xlu1 %4688  ;;  %v7801_v39 = vpop.permute.xlu0 %4693 }
0x1c7b   : > { %v7803_v19 = vpop.permute.xlu1 %4698  ;;  %v7805_v20 = vpop.permute.xlu0 %4703 }
0x1c7c   : > { %8185 = vst [vmem:[#allocation15_spill] sm:$0xff] %v7803_v19  ;;  %8186 = vst [vmem:[#allocation16_spill] sm:$0xff] %v7805_v20 }
0x1c7f   : > { %v7807_v49 = vpop.permute.xlu1 %4553  ;;  %v7809_v54 = vpop.permute.xlu0 %4558 }
0x1c83   : > { %v7811_v42 = vpop.permute.xlu1 %4563  ;;  %v7813_v36 = vpop.permute.xlu0 %4568 }
0x1c84   : > { %8187 = vst [vmem:[#allocation17_spill] sm:$0xff] %v7813_v36 }
0x1c87   : > { %v7815_v41 = vpop.permute.xlu1 %4708  ;;  %v7817_v47 = vpop.permute.xlu0 %4713 }
0x1c88   : > { %8188 = vst [vmem:[#allocation18_spill] sm:$0xff] %v7815_v41  ;;  %8189 = vst [vmem:[#allocation19_spill] sm:$0xff] %v7817_v47 }
0x1d04   : > { %v3432_v45 = vpop.f32.mrf.mxu0  ;;  %v3488_v21 = vpop.f32.mrf.mxu1 }
0x1d05   : > { %v3489_v22 = vadd.f32 %v3488_v21, %v3432_v45 }
0x1d06   : > { %v6440_v26 = vpop.f32.mrf.mxu0  ;;  %v6448_v27 = vpop.f32.mrf.mxu1 }
0x1d07   : > { %v7819_v26 = vpop.permute.xlu1 %4718  ;;  %v7821_v27 = vpop.permute.xlu0 %4723 }
0x1d08   : > { %v3435_v31 = vpop.f32.mrf.mxu0  ;;  %v3491_v32 = vpop.f32.mrf.mxu1  ;;  %8190 = vst [vmem:[#allocation20_spill] sm:$0xff] %v7819_v26  ;;  %8191 = vst [vmem:[#allocation21_spill] sm:$0xff] %v7821_v27  ;;  %v5922_v27 = vld [vmem:[%s8194_s23] ss:$0 sm:$0xff] }
0x1d09   : > { %v3492_v56 = vadd.f32 %v3491_v32, %v3435_v31 }
0x1d0a   : > { %v6441_v33 = vpop.f32.mrf.mxu0  ;;  %v6449_v30 = vpop.f32.mrf.mxu1 }
0x1d0c   : > { %v3556_v63 = vpop.f32.mrf.mxu0  ;;  %v3626_v23 = vpop.f32.mrf.mxu1 }
0x1d0d   : > { %v3563_v34 = vadd.f32 %v3556_v63, %v3489_v22  ;;  %v7823_v63 = vpop.permute.xlu1 %4843  ;;  %v7825_v22 = vpop.permute.xlu0 %4848 }
0x1d0e   : > { %v6456_v9 = vpop.f32.mrf.mxu0  ;;  %v6464_v18 = vpop.f32.mrf.mxu1  ;;  %8192 = vst [vmem:[#allocation22_spill] sm:$0xff] %v7823_v63  ;;  %8193 = vst [vmem:[#allocation23_spill] sm:$0xff] %v7825_v22 }
0x1d0f   : > { %v3633_v33 = vadd.f32 %v3626_v23, %v3563_v34 }
0x1d10   : > { %v3559_v61 = vpop.f32.mrf.mxu0  ;;  %v3629_v44 = vpop.f32.mrf.mxu1 }
0x1d11   : > { %v3564_v30 = vadd.f32 %v3559_v61, %v3492_v56 }
0x1d12   : > { %v6457_v29 = vpop.f32.mrf.mxu0  ;;  %v6465_v51 = vpop.f32.mrf.mxu1 }
0x1d13   : > { %v3634_v45 = vadd.f32 %v3629_v44, %v3564_v30 }
0x1d14   : > { %v3692_v46 = vpop.f32.mrf.mxu0  ;;  %v3762_v55 = vpop.f32.mrf.mxu1 }
0x1d15   : > { %v3699_v41 = vadd.f32 %v3692_v46, %v3633_v33  ;;  %v7829_v33 = vpop.permute.xlu0 %4858 }
0x1d16   : > { %v6472_v43 = vpop.f32.mrf.mxu0  ;;  %v6480_v24 = vpop.f32.mrf.mxu1  ;;  %8196 = vst [vmem:[#allocation25_spill] sm:$0xff] %v7829_v33 }
0x1d17   : > { %v3769_v31 = vadd.f32 %v3762_v55, %v3699_v41  ;;  %v4004_v41 = vsub.s32 4, %v7356_v48 }
0x1d18   : > { %v3695_v9 = vpop.f32.mrf.mxu0  ;;  %v3765_v18 = vpop.f32.mrf.mxu1 }
0x1d19   : > { %v3700_v32 = vadd.f32 %v3695_v9, %v3634_v45 }
0x1d1a   : > { %v6473_v20 = vpop.f32.mrf.mxu0  ;;  %v6481_v47 = vpop.f32.mrf.mxu1 }
0x1d1b   : > { %v3770_v34 = vadd.f32 %v3765_v18, %v3700_v32  ;;  %v7827_v20 = vpop.permute.xlu1 %4853  ;;  %v3982_v18 = vsub.s32 0, %v7356_v48  ;;  %v3986_v32 = vsub.s32 1, %v7356_v48 }
0x1d1c   : > { %v3828_v21 = vpop.f32.mrf.mxu0  ;;  %v3894_v29 = vpop.f32.mrf.mxu1  ;;  %8195 = vst [vmem:[#allocation24_spill] sm:$0xff] %v7827_v20 }
0x1d1d   : > { %v3835_v24 = vadd.f32 %v3828_v21, %v3769_v31  ;;  %v4008_v21 = vsub.s32 5, %v7356_v48 }
0x1d1e   : > { %v6488_v51 = vpop.f32.mrf.mxu0  ;;  %v6496_v43 = vpop.f32.mrf.mxu1 }
0x1d1f   : > { %v3901_v44 = vadd.f32 %v3894_v29, %v3835_v24  ;;  %v3990_v29 = vsub.s32 2, %v7356_v48  ;;  %v4012_v51 = vsub.s32 6, %v7356_v48  ;;  %v7838_v43 = vpop.permute.xlu1 %4998 }
0x1d20   : > { %v3831_v23 = vpop.f32.mrf.mxu0  ;;  %v3897_v61 = vpop.f32.mrf.mxu1  ;;  %8197 = vst [vmem:[#allocation26_spill] sm:$0xff] %v7838_v43 }
0x1d21   : > { %v3836_v47 = vadd.f32 %v3831_v23, %v3770_v34  ;;  %v7840_v34 = vpop.permute.xlu0 %5003 }
0x1d22   : > { %v6489_v56 = vpop.f32.mrf.mxu0  ;;  %v6497_v46 = vpop.f32.mrf.mxu1  ;;  %8198 = vst [vmem:[#allocation27_spill] sm:$0xff] %v7840_v34 }
0x1d23   : > { %v3902_v9 = vadd.f32 %v3897_v61, %v3836_v47  ;;  %v4016_v61 = vsub.s32 7, %v7356_v48 }
0x1d24   : > { %v3960_v30 = vpop.f32.mrf.mxu0 }
0x1d25   : > { %v3967_v26 = vadd.f32 %v3960_v30, %v3901_v44 }
0x1d26   : > { %v6504_v55 = vpop.f32.mrf.mxu0 }
0x1d27   : > { %v3976_v45 = vadd.f32 %v5922_v27, %v3967_v26  ;;  %v3994_v26 = vsub.s32 3, %v7356_v48 }
0x1d28   : > { %v3963_v31 = vpop.f32.mrf.mxu0 }
0x1d29   : > { %v3978_v24 = vmax.f32 %v3976_v45, 0.0  ;;  %v3968_v23 = vadd.f32 %v3963_v31, %v3902_v9 }
0x1d2a   : > { %v6505_v56 = vpop.f32.mrf.mxu0 }
0x1d2b   : > { %v4005_v46 = vrot.slane %v3978_v24, %v4004_v41  ;;  %v4009_v44 = vrot.slane %v3978_v24, %v4008_v21  ;;  %v3977_v47 = vadd.f32 %v5922_v27, %v3968_v23  ;;  %v3983_v30 = vrot.slane %v3978_v24, %v3982_v18  ;;  %v7848_v27 = vpop.permute.xlu1 %5008  ;;  %v7850_v23 = vpop.permute.xlu0 %5013 }
0x1d2c   : > { %v3987_v55 = vrot.slane %v3978_v24, %v3986_v32  ;;  %v3991_v20 = vrot.slane %v3978_v24, %v3990_v29  ;;  %v4013_v33 = vrot.slane %v3978_v24, %v4012_v51  ;;  %v3995_v45 = vrot.slane %v3978_v24, %v3994_v26 }
0x1d2d   : > { %v3979_v19 = vmax.f32 %v3977_v47, 0.0  ;;  %v4018_v9 = vsel %vm3996_vm9, %v4005_v46, %v4009_v44  ;;  %v4017_v56 = vrot.slane %v3978_v24, %v4016_v61 }
0x1d2e   : > { %v3997_v31 = vsel %vm3996_vm9, %v3983_v30, %v3987_v55  ;;  %v4019_v34 = vsel %vm3998_vm10, %v4018_v9, %v4013_v33 }
0x1d2f   : > { %v3999_v43 = vsel %vm3998_vm10, %v3997_v31, %v3991_v20  ;;  %v4043_v22 = vrot.slane %v3979_v19, %v4004_v41  ;;  %v4047_v63 = vrot.slane %v3979_v19, %v4008_v21  ;;  %v4051_v36 = vrot.slane %v3979_v19, %v4012_v51 }
0x1d30   : > { %v7853_v47 = vsel %vm4000_vm11, %v3999_v43, %v3995_v45  ;;  %v7856_v46 = vsel %vm4000_vm11, %v4019_v34, %v4017_v56  ;;  %v4024_v44 = vrot.slane %v3979_v19, %v3982_v18  ;;  %v4055_v30 = vrot.slane %v3979_v19, %v4016_v61 }
0x1d31   : > { %v4056_v24 = vsel %vm3996_vm9, %v4043_v22, %v4047_v63  ;;  %v4180_v20 = vmul.f32 %v7737_v57, %v7853_v47  ;;  %v4181_v33 = vmul.f32 %v7739_v58, %v7856_v46  ;;  %v4028_v21 = vrot.slane %v3979_v19, %v3986_v32 }
0x1d32   : > { %v4057_v41 = vsel %vm3998_vm10, %v4056_v24, %v4051_v36  ;;  %v4032_v51 = vrot.slane %v3979_v19, %v3990_v29  ;;  %v4179_v34 = vmul.f32 %v7733_v25, %v7853_v47  ;;  %v4036_v18 = vrot.slane %v3979_v19, %v3994_v26  ;;  %v7886_v29 = vpop.permute.xlu1 %4863 }
0x1d33   : > { %v7865_v43 = vsel %vm4000_vm11, %v4057_v41, %v4055_v30  ;;  %v7870_v61 = vrot.slane %v7853_v47, 7  ;;  %v4037_v63 = vsel %vm3996_vm9, %v4024_v44, %v4028_v21  ;;  %v7879_v36 = vrot.slane %v7856_v46, 7  ;;  %v6747_v41 = vld [vmem:[%s8184_s22 + $0x20] sm:$0xff]  }
0x1d34   : > { %v4178_v57 = vmul.f32 %v7735_v35, %v7865_v43  ;;  %v7876_v58 = vrot.slane %v7865_v43, 7  ;;  %v4187_v22 = vpack.c.bf16 %v4181_v33, %v4180_v20  ;;  %v4038_v32 = vsel %vm3998_vm10, %v4037_v63, %v4032_v51  ;;  %v7888_v35 = vpop.permute.xlu0 %4868  ;;  %v6748_v51 = vld [vmem:[%s8184_s22 + $0x28] sm:$0xff]  }
0x1d35   : > { %v4182_v25 = vmul.f32 %v7742_v2, %v7856_v46  ;;  %v4117_v19 = vmul.f32 %v7759_v62, %v7870_v61  ;;  %v7891_v55 = vsel %vm4000_vm11, %v4038_v32, %v4036_v18  ;;  %v7909_v31 = vsel %vm2834_vm6, %v7870_v61, %v7879_v36 }
0x1d36   : > { %v4186_v26 = vpack.c.bf16 %v4179_v34, %v4178_v57  ;;  %v7897_v9 = vsel %vm2834_vm6, %v7876_v58, %v7870_v61  ;;  %v4115_v2 = vmul.f32 %v7755_v60, %v7876_v58  ;;  %v4183_v62 = vmul.f32 %v7744_v6, %v7891_v55  ;;  %v7952_v34 = vpop.permute.xlu1 %4873 }
0x1d37   : > { %v4116_v45 = vmul.f32 %v7757_v52, %v7897_v9  ;;  %v7912_v56 = vrot.slane %v7891_v55, 7  ;;  %v4118_v60 = vmul.f32 %v7761_v0, %v7909_v31  ;;  %v7925_v30 = vrot.slane %v7853_v47, 1 }
0x1d38   : > { %6508 = vmatprep.mubr.msk.bf16.mxu1 %vm1208_vm3, %v4186_v26  ;;  %v4188_v6 = vpack.c.bf16 %v4183_v62, %v4182_v25  ;;  %v4119_v0 = vmul.f32 %v7775_v8, %v7879_v36  ;;  %v7933_v33 = vrot.slane %v7865_v43, 1  ;;  %v4184_v21 = vmul.f32 %v7746_v40, %v7891_v55  ;;  %v7954_v18 = vpop.permute.xlu0 %4878 }
0x1d39   : > { %6509 = vmatmul.mubr.msk.bf16.vlgmr.msra.gmra.mxu1 %vm1208_vm3, %v4187_v22  ;;  %v4123_v44 = vpack.c.bf16 %v4116_v45, %v4115_v2  ;;  %v7922_v52 = vsel %vm2834_vm6, %v7879_v36, %v7912_v56  ;;  %v4124_v24 = vpack.c.bf16 %v4118_v60, %v4117_v19  ;;  %v7946_v8 = vsel %vm2834_vm6, %v7912_v56, %v7876_v58 }
0x1d3a   : > { %6527 = vmatpush3.bf16.msra.mxu1 %v7752_v50  ;;  %v4120_v20 = vmul.f32 %v7777_v10, %v7922_v52  ;;  %6512 = vmatprep.mubr.msk.bf16.mxu1 %vm1208_vm3, %v4188_v6  ;;  %v4185_v50 = vmul.f32 %v7748_v59, %v7865_v43  ;;  %v7949_v10 = vrot.slane %v7856_v46, 1  ;;  %v7961_v59 = vsel %vm2997_vm7, %v7933_v33, %v7925_v30  ;;  %v7997_v62 = vpop.permute.xlu1 %5018 }
0x1d3b   : > { %6518 = vmatprep.mubr.msk.bf16.mxu0 %vm1208_vm3, %v4123_v44  ;;  %v4416_v57 = vmul.f32 %v7767_v5, %v7961_v59  ;;  %v4417_v63 = vmul.f32 %v7769_v4, %v7925_v30  ;;  %v4121_v22 = vmul.f32 %v7779_v53, %v7912_v56  ;;  %v4122_v32 = vmul.f32 %v7781_v28, %v7946_v8 }
0x1d3c   : > { %6519 = vmatmul.mubr.msk.bf16.vlgmr.msra.gmra.mxu0 %vm1208_vm3, %v4124_v24  ;;  %v4125_v40 = vpack.c.bf16 %v4120_v20, %v4119_v0  ;;  %v7977_v25 = vsel %vm2997_vm7, %v7925_v30, %v7949_v10  ;;  %v4419_v5 = vmul.f32 %v7773_v7, %v7949_v10  ;;  %6546 = vmatprep.subr.bf16.mxu1 %v6747_v41  ;;  %v7982_v4 = vrot.slane %v7891_v55, 1  ;;  %v6749_v20 = vld [vmem:[%s8184_s22 + $0x30] sm:$0xff]  }
0x1d3d   : > { %6537 = vmatpush3.bf16.msra.mxu0 %v7764_v1  ;;  %v4189_v53 = vpack.c.bf16 %v4185_v50, %v4184_v21  ;;  %v4571_v1 = vmul.f32 %v7791_v15, %v7897_v9  ;;  %v4418_v28 = vmul.f32 %v7771_v3, %v7977_v25  ;;  %v4424_v19 = vpack.c.bf16 %v4417_v63, %v4416_v57  ;;  %v7999_v15 = vpop.permute.xlu0 %5023 }
0x1d3e   : > { %6522 = vmatprep.mubr.msk.bf16.mxu0 %vm1208_vm3, %v4125_v40  ;;  %6556 = vmatprep.subr.bf16.mxu0 %v6748_v51  ;;  %v4572_v26 = vmul.f32 %v7793_v11, %v7870_v61  ;;  %v7995_v2 = vsel %vm2997_vm7, %v7949_v10, %v7982_v4  ;;  %v4126_v3 = vpack.c.bf16 %v4122_v32, %v4121_v22  ;;  %v8199_v22 = vld [vmem:[#allocation17_spill] sm:$0xff] }
0x1d3f   : > { %v4425_v7 = vpack.c.bf16 %v4419_v5, %v4418_v28  ;;  %v4420_v11 = vmul.f32 %v7783_v37, %v7995_v2  ;;  %v4421_v60 = vmul.f32 %v7785_v38, %v7982_v4  ;;  %v4573_v6 = vmul.f32 %v7795_v16, %v7909_v31  ;;  %v8017_v37 = vpop.permute.xlu1 %5028  ;;  %v8200_v5 = vld [vmem:[#allocation22_spill] sm:$0xff] }
0x1d40   : > { %v4579_v45 = vpack.c.bf16 %v4572_v26, %v4571_v1  ;;  %v4574_v44 = vmul.f32 %v7797_v17, %v7879_v36  ;;  %v4575_v24 = vmul.f32 %v7807_v49, %v7922_v52  ;;  %v4576_v0 = vmul.f32 %v7809_v54, %v7912_v56  ;;  %v6750_v49 = vld [vmem:[%s8184_s22 + $0x38] sm:$0xff]   ;;  %v8203_v26 = vld [vmem:[#allocation16_spill] sm:$0xff] }
0x1d41   : > { %6513 = vmatmul.mubr.msk.bf16.gmra.mxu1 %vm1208_vm3, %v4189_v53  ;;  %v8019_v21 = vpop.permute.xlu0 %5033  ;;  %v4426_v38 = vpack.c.bf16 %v4421_v60, %v4420_v11  ;;  %v8025_v16 = vsel %vm2997_vm7, %v7982_v4, %v7933_v33  ;;  %v4423_v40 = vmul.f32 %v7789_v13, %v7933_v33  ;;  %v4726_v48 = vmul.f32 %v7799_v14, %v7853_v47  ;;  %v8201_v14 = vld [vmem:[#allocation23_spill] sm:$0xff]  ;;  %v8204_v11 = vld [vmem:[#allocation18_spill] sm:$0xff] }
0x1d42   : > { %6528 = vmatprep.mubr.msk.bf16.mxu1 %vm1208_vm3, %v4424_v19  ;;  %v4580_v17 = vpack.c.bf16 %v4574_v44, %v4573_v6  ;;  %v4581_v54 = vpack.c.bf16 %v4576_v0, %v4575_v24  ;;  %v4422_v50 = vmul.f32 %v7787_v12, %v8025_v16  ;;  %v4727_v57 = vmul.f32 %v7801_v39, %v7853_v47  ;;  %v8205_v6 = vld [vmem:[#allocation19_spill] sm:$0xff]  ;;  %v8206_v24 = vld [vmem:[#allocation25_spill] sm:$0xff] }
0x1d43   : > { %v4577_v12 = vmul.f32 %v7811_v42, %v7946_v8  ;;  %v4578_v13 = vmul.f32 %v8199_v22, %v7876_v58  ;;  %v4881_v53 = vmul.f32 %v8200_v5, %v7925_v30  ;;  %v4882_v1 = vmul.f32 %v8201_v14, %v7977_v25  ;;  %v8202_v42 = vld [vmem:[#allocation15_spill] sm:$0xff]  ;;  %v8208_v5 = vld [vmem:[#allocation20_spill] sm:$0xff]  ;;  %v8210_v14 = vld [vmem:[#allocation26_spill] sm:$0xff] }
0x1d44   : > { %6523 = vmatmul.mubr.msk.bf16.gmra.mxu0 %vm1208_vm3, %v4126_v3  ;;  %v4427_v32 = vpack.c.bf16 %v4423_v40, %v4422_v50  ;;  %v4734_v39 = vpack.c.bf16 %v4727_v57, %v4726_v48  ;;  %v4728_v19 = vmul.f32 %v8202_v42, %v7856_v46  ;;  %v4730_v60 = vmul.f32 %v8204_v11, %v7891_v55  ;;  %v6751_v50 = vld [vmem:[%s8184_s22 + $0x40] sm:$0xff]   ;;  %v8207_v40 = vld [vmem:[#allocation24_spill] sm:$0xff] }
0x1d45   : > { %6538 = vmatprep.mubr.msk.bf16.mxu0 %vm1208_vm3, %v4579_v45  ;;  %v5159_v63 = vpop.permute.xlu0 %5158  ;;  %v4889_v28 = vpack.c.bf16 %v4882_v1, %v4881_v53  ;;  %v4731_v44 = vmul.f32 %v8205_v6, %v7891_v55  ;;  %v4884_v0 = vmul.f32 %v8206_v24, %v7995_v2  ;;  %v4883_v48 = vmul.f32 %v8207_v40, %v7949_v10  ;;  %v8209_v53 = vld [vmem:[#allocation21_spill] sm:$0xff] }
0x1d46   : > { %v5036_v1 = vmul.f32 %v8210_v14, %v7870_v61 }
0x1d47   : > { %v4736_v57 = vpack.c.bf16 %v4731_v44, %v4730_v60 }
0x1d49   : > { %6529 = vmatmul.mubr.msk.bf16.vlgmr.msra.gmra.mxu1 %vm1208_vm3, %v4425_v7  ;;  %v4729_v7 = vmul.f32 %v8203_v26, %v7856_v46  ;;  %v5169_v45 = vpop.permute.xlu0 %5168  ;;  %v5192_v26 = vmul.f32 %v5159_v63, %v7856_v46  ;;  %v5038_v63 = vmul.f32 %v7848_v27, %v7879_v36 }
0x1d4a   : > { %6532 = vmatprep.mubr.msk.bf16.mxu1 %vm1208_vm3, %v4426_v38  ;;  %6547 = vmatpush3.bf16.msra.mxu1 %v6747_v41  ;;  %v5154_v41 = vpop.permute.xlu1 %5153  ;;  %v5194_v44 = vmul.f32 %v5169_v45, %v7891_v55 }
0x1d4b   : > { %6566 = vmatprep.subr.bf16.mxu1 %v6749_v20  ;;  %v4735_v38 = vpack.c.bf16 %v4729_v7, %v4728_v19  ;;  %v5191_v19 = vmul.f32 %v5154_v41, %v7853_v47  ;;  %v5041_v41 = vmul.f32 %v7999_v15, %v7946_v8  ;;  %v5042_v8 = vmul.f32 %v8017_v37, %v7876_v58 }
0x1d4c   : > { %6539 = vmatmul.mubr.msk.bf16.vlgmr.msra.gmra.mxu0 %vm1208_vm3, %v4580_v17  ;;  %v4885_v17 = vmul.f32 %v7886_v29, %v7982_v4  ;;  %v4732_v29 = vmul.f32 %v8208_v5, %v7865_v43 }
0x1d4d   : > { %6542 = vmatprep.mubr.msk.bf16.mxu0 %vm1208_vm3, %v4581_v54  ;;  %6557 = vmatpush3.bf16.msra.mxu0 %v6748_v51  ;;  %v4582_v51 = vpack.c.bf16 %v4578_v13, %v4577_v12  ;;  %v4886_v54 = vmul.f32 %v7888_v35, %v8025_v16  ;;  %v5314_v22 = vpop.permute.xlu0 %5313  ;;  %v4890_v13 = vpack.c.bf16 %v4884_v0, %v4883_v48 }
0x1d4e   : > { %6576 = vmatprep.subr.bf16.mxu0 %v6750_v49  ;;  %v5164_v3 = vpop.permute.xlu1 %5163  ;;  %v4733_v35 = vmul.f32 %v8209_v53, %v7865_v43  ;;  %v5347_v15 = vmul.f32 %v5314_v22, %v7949_v10 }
0x1d50   : > { %v4737_v42 = vpack.c.bf16 %v4733_v35, %v4732_v29 }
0x1d51   : > { %6533 = vmatmul.mubr.msk.bf16.gmra.mxu1 %vm1208_vm3, %v4427_v32  ;;  %v4891_v32 = vpack.c.bf16 %v4886_v54, %v4885_v17  ;;  %v5324_v11 = vpop.permute.xlu0 %5323 }
0x1d52   : > { %6548 = vmatprep.mubr.msk.bf16.mxu1 %vm1208_vm3, %v4734_v39  ;;  %v5309_v12 = vpop.permute.xlu1 %5308  ;;  %v8211_v39 = vld [vmem:[#allocation27_spill] sm:$0xff] }
0x1d54   : > { %6543 = vmatmul.mubr.msk.bf16.gmra.mxu0 %vm1208_vm3, %v4582_v51  ;;  %v5037_v51 = vmul.f32 %v8211_v39, %v7909_v31 }
0x1d55   : > { %6558 = vmatprep.mubr.msk.bf16.mxu0 %vm1208_vm3, %v4889_v28  ;;  %v4888_v28 = vmul.f32 %v7954_v18, %v7961_v59  ;;  %v5040_v18 = vmul.f32 %v7997_v62, %v7912_v56  ;;  %v5179_v6 = vpop.permute.xlu0 %5178  ;;  %v5193_v56 = vmul.f32 %v5164_v3, %v7856_v46  ;;  %v5043_v62 = vmul.f32 %v8019_v21, %v7897_v9 }
0x1d56   : > { %v5319_v7 = vpop.permute.xlu1 %5318  ;;  %v5044_v61 = vpack.c.bf16 %v5037_v51, %v5036_v1 }
0x1d57   : > { %v5046_v0 = vpack.c.bf16 %v5041_v41, %v5040_v18  ;;  %v5200_v27 = vpack.c.bf16 %v5194_v44, %v5193_v56  ;;  %v5348_v10 = vmul.f32 %v5319_v7, %v7995_v2 }
0x1d59   : > { %6549 = vmatmul.mubr.msk.bf16.vlgmr.msra.gmra.mxu1 %vm1208_vm3, %v4735_v38  ;;  %v5189_v3 = vpop.permute.xlu0 %5188  ;;  %v5047_v38 = vpack.c.bf16 %v5043_v62, %v5042_v8 }
0x1d5a   : > { %6552 = vmatprep.mubr.msk.bf16.mxu1 %vm1208_vm3, %v4736_v57  ;;  %6567 = vmatpush3.bf16.msra.mxu1 %v6749_v20  ;;  %v4887_v20 = vmul.f32 %v7952_v34, %v7933_v33  ;;  %v5199_v34 = vpack.c.bf16 %v5192_v26, %v5191_v19  ;;  %v5174_v60 = vpop.permute.xlu1 %5173  ;;  %v5198_v54 = vmul.f32 %v5189_v3, %v7853_v47 }
0x1d5b   : > { %6586 = vmatprep.subr.bf16.mxu1 %v6751_v50 }
0x1d5c   : > { %6559 = vmatmul.mubr.msk.bf16.vlgmr.msra.gmra.mxu0 %vm1208_vm3, %v4890_v13  ;;  %v4892_v31 = vpack.c.bf16 %v4888_v28, %v4887_v20 }
0x1d5d   : > { %6562 = vmatprep.mubr.msk.bf16.mxu0 %vm1208_vm3, %v4891_v32  ;;  %6577 = vmatpush3.bf16.msra.mxu0 %v6750_v49  ;;  %v5039_v49 = vmul.f32 %v7850_v23, %v7922_v52  ;;  %v5195_v23 = vmul.f32 %v5174_v60, %v7891_v55  ;;  %v5196_v52 = vmul.f32 %v5179_v6, %v7865_v43  ;;  %v5334_v37 = vpop.permute.xlu0 %5333 }
0x1d5e   : > { %v5346_v55 = vmul.f32 %v5309_v12, %v7977_v25  ;;  %v5184_v46 = vpop.permute.xlu1 %5183  ;;  %v5349_v25 = vmul.f32 %v5324_v11, %v7982_v4  ;;  %v5351_v21 = vmul.f32 %v5334_v37, %v7933_v33  ;;  %v6752_v4 = vld [vmem:[%s7012_s27] sm:$0xff]  }
0x1d5f   : > { %v5045_v24 = vpack.c.bf16 %v5039_v49, %v5038_v63  ;;  %v5201_v36 = vpack.c.bf16 %v5196_v52, %v5195_v23  ;;  %v5197_v45 = vmul.f32 %v5184_v46, %v7865_v43  ;;  %6596 = vmatprep.subr.bf16.mxu0 %v6752_v4 }
0x1d60   : > { %v5354_v17 = vpack.c.bf16 %v5347_v15, %v5346_v55 }
0x1d61   : > { %6553 = vmatmul.mubr.msk.bf16.gmra.mxu1 %vm1208_vm3, %v4737_v42  ;;  %v5202_v58 = vpack.c.bf16 %v5198_v54, %v5197_v45  ;;  %v5344_v57 = vpop.permute.xlu0 %5343 }
0x1d62   : > { %6568 = vmatprep.mubr.msk.bf16.mxu1 %vm1208_vm3, %v5044_v61  ;;  %v5329_v9 = vpop.permute.xlu1 %5328  ;;  %v5353_v2 = vmul.f32 %v5344_v57, %v7925_v30 }
0x1d63   : > { %v5350_v43 = vmul.f32 %v5329_v9, %v8025_v16 }
0x1d64   : > { %6563 = vmatmul.mubr.msk.bf16.gmra.mxu0 %vm1208_vm3, %v4892_v31 }
0x1d65   : > { %6578 = vmatprep.mubr.msk.bf16.mxu0 %vm1208_vm3, %v5199_v34  ;;  %v5356_v47 = vpack.c.bf16 %v5351_v21, %v5350_v43 }
0x1d66   : > { %v5339_v40 = vpop.permute.xlu1 %5338 }
0x1d67   : > { %v5352_v48 = vmul.f32 %v5339_v40, %v7961_v59 }
0x1d69   : > { %6569 = vmatmul.mubr.msk.bf16.vlgmr.msra.gmra.mxu1 %vm1208_vm3, %v5045_v24  ;;  %v5357_v12 = vpack.c.bf16 %v5353_v2, %v5352_v48 }
0x1d6a   : > { %6572 = vmatprep.mubr.msk.bf16.mxu1 %vm1208_vm3, %v5046_v0  ;;  %6587 = vmatpush3.bf16.msra.mxu1 %v6751_v50  ;;  %v5355_v50 = vpack.c.bf16 %v5349_v25, %v5348_v10 }
0x1d6c   : > { %6579 = vmatmul.mubr.msk.bf16.vlgmr.msra.gmra.mxu0 %vm1208_vm3, %v5200_v27 }
0x1d6d   : > { %6582 = vmatprep.mubr.msk.bf16.mxu0 %vm1208_vm3, %v5201_v36  ;;  %6597 = vmatpush3.bf16.msra.mxu0 %v6752_v4 }
0x1d71   : > { %6573 = vmatmul.mubr.msk.bf16.gmra.mxu1 %vm1208_vm3, %v5047_v38 }
0x1d72   : > { %6588 = vmatprep.mubr.msk.bf16.mxu1 %vm1208_vm3, %v5354_v17 }
0x1d74   : > { %6583 = vmatmul.mubr.msk.bf16.gmra.mxu0 %vm1208_vm3, %v5202_v58 }
0x1d79   : > { %6589 = vmatmul.mubr.msk.bf16.vlgmr.msra.gmra.mxu1 %vm1208_vm3, %v5355_v50 }
0x1d7a   : > { %6592 = vmatprep.mubr.msk.bf16.mxu1 %vm1208_vm3, %v5356_v47 }
0x1d81   : > { %6593 = vmatmul.mubr.msk.bf16.gmra.mxu1 %vm1208_vm3, %v5357_v12 }
0x1df9   : > { %v6510_v16 = vpop.f32.mrf.mxu1 }
0x1dfb   : > { %v4245_v33 = vpop.f32.mrf.mxu1 }
0x1dfc   : > { %v6520_v22 = vpop.f32.mrf.mxu0 }
0x1dfd   : > { %v6511_v13 = vpop.f32.mrf.mxu1  ;;  %v4337_v54 = vadd.f32 %v6520_v22, %v6510_v16 }
0x1dfe   : > { %v4328_v32 = vpop.f32.mrf.mxu0 }
0x1dff   : > { %v4248_v5 = vpop.f32.mrf.mxu1  ;;  %v4329_v38 = vadd.f32 %v4328_v32, %v4245_v33 }
0x1e00   : > { %v6521_v29 = vpop.f32.mrf.mxu0 }
0x1e01   : > { %v6514_v53 = vpop.f32.mrf.mxu1  ;;  %v4340_v9 = vadd.f32 %v6521_v29, %v6511_v13 }
0x1e02   : > { %v4331_v35 = vpop.f32.mrf.mxu0 }
0x1e03   : > { %v4261_v14 = vpop.f32.mrf.mxu1  ;;  %v4332_v21 = vadd.f32 %v4331_v35, %v4248_v5 }
0x1e04   : > { %v6524_v59 = vpop.f32.mrf.mxu0 }
0x1e05   : > { %v6515_v1 = vpop.f32.mrf.mxu1  ;;  %v4353_v22 = vadd.f32 %v6524_v59, %v6514_v53 }
0x1e06   : > { %v4344_v39 = vpop.f32.mrf.mxu0 }
0x1e07   : > { %v4264_v30 = vpop.f32.mrf.mxu1  ;;  %v4345_v33 = vadd.f32 %v4344_v39, %v4261_v14 }
0x1e08   : > { %v6525_v51 = vpop.f32.mrf.mxu0 }
0x1e09   : > { %v6530_v20 = vpop.f32.mrf.mxu1 }
0x1e0a   : > { %v4347_v28 = vpop.f32.mrf.mxu0  ;;  %v4516_v25 = vadd.f32 %v6530_v20, %v4337_v54 }
0x1e0b   : > { %v4483_v42 = vpop.f32.mrf.mxu1  ;;  %v4348_v5 = vadd.f32 %v4347_v28, %v4264_v30 }
0x1e0c   : > { %v6540_v19 = vpop.f32.mrf.mxu0  ;;  %v4514_v37 = vadd.f32 %v4483_v42, %v4329_v38  ;;  %v4356_v42 = vadd.f32 %v6525_v51, %v6515_v1 }
0x1e0d   : > { %v6531_v26 = vpop.f32.mrf.mxu1  ;;  %v4671_v12 = vadd.f32 %v6540_v19, %v4516_v25 }
0x1e0e   : > { %v4638_v7 = vpop.f32.mrf.mxu0  ;;  %v4517_v50 = vadd.f32 %v6531_v26, %v4340_v9 }
0x1e0f   : > { %v4486_v11 = vpop.f32.mrf.mxu1  ;;  %v4669_v48 = vadd.f32 %v4638_v7, %v4514_v37 }
0x1e10   : > { %v6541_v61 = vpop.f32.mrf.mxu0  ;;  %v4515_v57 = vadd.f32 %v4486_v11, %v4332_v21 }
0x1e11   : > { %v6534_v31 = vpop.f32.mrf.mxu1  ;;  %v4672_v32 = vadd.f32 %v6541_v61, %v4517_v50  ;;  %v6048_v50 = vld [vmem:[%s7007_s20] ss:$0 sm:$0xff] }
0x1e12   : > { %v4641_v49 = vpop.f32.mrf.mxu0  ;;  %v4520_v35 = vadd.f32 %v6534_v31, %v4353_v22 }
0x1e13   : > { %v4499_v34 = vpop.f32.mrf.mxu1  ;;  %v4670_v38 = vadd.f32 %v4641_v49, %v4515_v57 }
0x1e14   : > { %v6544_v18 = vpop.f32.mrf.mxu0  ;;  %v4518_v20 = vadd.f32 %v4499_v34, %v4345_v33 }
0x1e15   : > { %v6535_v41 = vpop.f32.mrf.mxu1  ;;  %v4675_v53 = vadd.f32 %v6544_v18, %v4520_v35 }
0x1e16   : > { %v4654_v63 = vpop.f32.mrf.mxu0  ;;  %v4521_v7 = vadd.f32 %v6535_v41, %v4356_v42 }
0x1e17   : > { %v4502_v60 = vpop.f32.mrf.mxu1  ;;  %v4673_v39 = vadd.f32 %v4654_v63, %v4518_v20 }
0x1e18   : > { %v6545_v6 = vpop.f32.mrf.mxu0  ;;  %v4519_v19 = vadd.f32 %v4502_v60, %v4348_v5 }
0x1e19   : > { %v6550_v44 = vpop.f32.mrf.mxu1  ;;  %v4676_v51 = vadd.f32 %v6545_v6, %v4521_v7 }
0x1e1a   : > { %v8128_v24 = vpop.f32.mrf.mxu0  ;;  %v4826_v13 = vadd.f32 %v6550_v44, %v4671_v12 }
0x1e1b   : > { %v4793_v23 = vpop.f32.mrf.mxu1  ;;  %v4674_v28 = vadd.f32 %v8128_v24, %v4519_v19 }
0x1e1c   : > { %v6560_v52 = vpop.f32.mrf.mxu0 }
0x1e1d   : > { %v6551_v0 = vpop.f32.mrf.mxu1  ;;  %v4981_v25 = vadd.f32 %v6560_v52, %v4826_v13 }
0x1e1e   : > { %v4948_v56 = vpop.f32.mrf.mxu0  ;;  %v4827_v54 = vadd.f32 %v6551_v0, %v4672_v32 }
0x1e1f   : > { %v4796_v27 = vpop.f32.mrf.mxu1 }
0x1e20   : > { %v6561_v36 = vpop.f32.mrf.mxu0  ;;  %v4825_v37 = vadd.f32 %v4796_v27, %v4670_v38 }
0x1e21   : > { %v6554_v8 = vpop.f32.mrf.mxu1  ;;  %v4982_v61 = vadd.f32 %v6561_v36, %v4827_v54 }
0x1e22   : > { %v4951_v62 = vpop.f32.mrf.mxu0  ;;  %v4830_v31 = vadd.f32 %v6554_v8, %v4675_v53 }
0x1e23   : > { %v4809_v55 = vpop.f32.mrf.mxu1  ;;  %v4980_v49 = vadd.f32 %v4951_v62, %v4825_v37 }
0x1e24   : > { %v8130_v15 = vpop.f32.mrf.mxu0  ;;  %v4828_v34 = vadd.f32 %v4809_v55, %v4673_v39 }
0x1e25   : > { %v6555_v46 = vpop.f32.mrf.mxu1  ;;  %v4985_v6 = vadd.f32 %v8130_v15, %v4830_v31 }
0x1e26   : > { %v4964_v3 = vpop.f32.mrf.mxu0  ;;  %v4831_v0 = vadd.f32 %v6555_v46, %v4676_v51 }
0x1e27   : > { %v4812_v45 = vpop.f32.mrf.mxu1  ;;  %v4983_v18 = vadd.f32 %v4964_v3, %v4828_v34  ;;  %v6049_v34 = vld [vmem:[%s7017_s4] ss:$0 sm:$0xff] }
0x1e28   : > { %v8132_v17 = vpop.f32.mrf.mxu0 }
0x1e29   : > { %8212 = vst [vmem:[#allocation17_spill] sm:$0xff] %v8132_v17  ;;  %v6570_v58 = vpop.f32.mrf.mxu1  ;;  %v4824_v17 = vadd.f32 %v4793_v23, %v4669_v48 }
0x1e2a   : > { %v8134_v10 = vpop.f32.mrf.mxu0  ;;  %v5136_v59 = vadd.f32 %v6570_v58, %v4981_v25 }
0x1e2b   : > { %v5103_v43 = vpop.f32.mrf.mxu1  ;;  %v4979_v11 = vadd.f32 %v4948_v56, %v4824_v17  ;;  %v4829_v56 = vadd.f32 %v4812_v45, %v4674_v28 }
0x1e2c   : > { %v6580_v47 = vpop.f32.mrf.mxu0 }
0x1e2d   : > { %v6571_v40 = vpop.f32.mrf.mxu1  ;;  %v5134_v23 = vadd.f32 %v5103_v43, %v4979_v11  ;;  %v5291_v63 = vadd.f32 %v6580_v47, %v5136_v59 }
0x1e2e   : > { %v5258_v2 = vpop.f32.mrf.mxu0  ;;  %v5137_v30 = vadd.f32 %v6571_v40, %v4982_v61  ;;  %v4984_v40 = vadd.f32 %v8134_v10, %v4829_v56 }
0x1e2f   : > { %v5106_v4 = vpop.f32.mrf.mxu1  ;;  %v5289_v60 = vadd.f32 %v5258_v2, %v5134_v23 }
0x1e30   : > { %v6581_v16 = vpop.f32.mrf.mxu0  ;;  %v5135_v52 = vadd.f32 %v5106_v4, %v4980_v49  ;;  %v8213_v43 = vld [vmem:[#allocation17_spill] sm:$0xff] }
0x1e31   : > { %v6574_v29 = vpop.f32.mrf.mxu1  ;;  %v5292_v17 = vadd.f32 %v6581_v16, %v5137_v30  ;;  %v4986_v21 = vadd.f32 %v8213_v43, %v4831_v0 }
0x1e32   : > { %v5261_v26 = vpop.f32.mrf.mxu0  ;;  %v5140_v48 = vadd.f32 %v6574_v29, %v4985_v6 }
0x1e33   : > { %v5119_v9 = vpop.f32.mrf.mxu1  ;;  %v5290_v24 = vadd.f32 %v5261_v26, %v5135_v52 }
0x1e34   : > { %v6584_v44 = vpop.f32.mrf.mxu0  ;;  %v5138_v8 = vadd.f32 %v5119_v9, %v4983_v18 }
0x1e35   : > { %v6575_v14 = vpop.f32.mrf.mxu1  ;;  %v5295_v22 = vadd.f32 %v6584_v44, %v5140_v48 }
0x1e36   : > { %v5274_v27 = vpop.f32.mrf.mxu0  ;;  %v5141_v57 = vadd.f32 %v6575_v14, %v4986_v21 }
0x1e37   : > { %v5122_v1 = vpop.f32.mrf.mxu1  ;;  %v5293_v15 = vadd.f32 %v5274_v27, %v5138_v8 }
0x1e38   : > { %v6585_v45 = vpop.f32.mrf.mxu0  ;;  %v5139_v32 = vadd.f32 %v5122_v1, %v4984_v40 }
0x1e39   : > { %v6590_v41 = vpop.f32.mrf.mxu1  ;;  %v5296_v20 = vadd.f32 %v6585_v45, %v5141_v57 }
0x1e3a   : > { %v5446_v62 = vadd.f32 %v6590_v41, %v5291_v63  ;;  %v5277_v13 = vpop.f32.mrf.mxu0 }
0x1e3b   : > { %v5413_v36 = vpop.f32.mrf.mxu1  ;;  %v5294_v9 = vadd.f32 %v5277_v13, %v5139_v32 }
0x1e3c   : > { %v5444_v58 = vadd.f32 %v5413_v36, %v5289_v60  ;;  %v5461_v4 = vadd.f32 %v6048_v50, %v5446_v62 }
0x1e3d   : > { %v6591_v55 = vpop.f32.mrf.mxu1 }
0x1e3e   : > { %v5447_v46 = vadd.f32 %v6591_v55, %v5292_v17  ;;  %v5459_v2 = vadd.f32 %v6048_v50, %v5444_v58  ;;  %v5469_v29 = vmax.f32 %v5461_v4, 0.0 }
0x1e3f   : > { %v5416_v47 = vpop.f32.mrf.mxu1 }
0x1e40   : > { %v5462_v3 = vadd.f32 %v6048_v50, %v5447_v46  ;;  %v5445_v12 = vadd.f32 %v5416_v47, %v5290_v24  ;;  %v5467_v54 = vmax.f32 %v5459_v2, 0.0 }
0x1e41   : > { %v6594_v33 = vpop.f32.mrf.mxu1 }
0x1e42   : > { %v5460_v16 = vadd.f32 %v6048_v50, %v5445_v12  ;;  %v5470_v42 = vmax.f32 %v5462_v3, 0.0  ;;  %v5450_v35 = vadd.f32 %v6594_v33, %v5295_v22 }
0x1e43   : > { %v5429_v38 = vpop.f32.mrf.mxu1 }
0x1e44   : > { %v5468_v5 = vmax.f32 %v5460_v16, 0.0  ;;  %v5448_v10 = vadd.f32 %v5429_v38, %v5293_v15  ;;  %v5476_v37 = vpack.c.bf16 %v5470_v42, %v5469_v29  ;;  %v5465_v61 = vadd.f32 %v6048_v50, %v5450_v35 }
0x1e45   : > { %v6595_v26 = vpop.f32.mrf.mxu1 }
0x1e46   : > { %v5475_v7 = vpack.c.bf16 %v5468_v5, %v5467_v54  ;;  %v5451_v11 = vadd.f32 %v6595_v26, %v5296_v20  ;;  %v5463_v25 = vadd.f32 %v6048_v50, %v5448_v10  ;;  %v5473_v1 = vmax.f32 %v5465_v61, 0.0 }
0x1e47   : > { %v5432_v19 = vpop.f32.mrf.mxu1 }
0x1e48   : > { %v5466_v14 = vadd.f32 %v6048_v50, %v5451_v11  ;;  %v5449_v39 = vadd.f32 %v5432_v19, %v5294_v9  ;;  %6598 = vmatprep.mubr.msk.bf16.mxu0 %vm1208_vm3, %v5475_v7  ;;  %v5471_v59 = vmax.f32 %v5463_v25, 0.0 }
0x1e49   : > { %6599 = vmatmul.mubr.msk.bf16.vlgmr.msra.gmra.mxu0 %vm1208_vm3, %v5476_v37 }
0x1e4a   : > { %v5464_v23 = vadd.f32 %v6048_v50, %v5449_v39  ;;  %v5474_v53 = vmax.f32 %v5466_v14, 0.0 }
0x1e4c   : > { %v5472_v44 = vmax.f32 %v5464_v23, 0.0  ;;  %v5478_v49 = vpack.c.bf16 %v5474_v53, %v5473_v1 }
0x1e4e   : > { %v5477_v51 = vpack.c.bf16 %v5472_v44, %v5471_v59 }
0x1e50   : > { %6602 = vmatprep.mubr.msk.bf16.mxu0 %vm1208_vm3, %v5477_v51 }
0x1e51   : > { %6603 = vmatmul.mubr.msk.bf16.gmra.mxu0 %vm1208_vm3, %v5478_v49 }
0x1f09   : > { %v6600_v30 = vpop.f32.mrf.mxu0 }
0x1f0a   : > { %v5549_v28 = vadd.f32 %v6600_v30, %v6049_v34 }
0x1f0b   : > { %v5540_v31 = vpop.f32.mrf.mxu0 }
0x1f0c   : > { %5573 = vst [vmem:[%s930_s2 + $0x10] sm:$0xff] %v5549_v28  ;;  %v5541_v41 = vadd.f32 %v6049_v34, %v5540_v31 }
0x1f0d   : > { %v6601_v0 = vpop.f32.mrf.mxu0 }
0x1f0e   : > { %5571 = vst [vmem:[%s930_s2] sm:$0xff] %v5541_v41  ;;  %v5552_v60 = vadd.f32 %v6601_v0, %v6049_v34 }
0x1f0f   : > { %v5543_v52 = vpop.f32.mrf.mxu0 }
0x1f10   : > { %5574 = vst [vmem:[%s930_s2 + $0x18] sm:$0xff] %v5552_v60  ;;  %v5544_v56 = vadd.f32 %v6049_v34, %v5543_v52 }
0x1f11   : > { %v6604_v63 = vpop.f32.mrf.mxu0 }
0x1f12   : > { %5572 = vst [vmem:[%s930_s2 + $0x8] sm:$0xff] %v5544_v56  ;;  %v5565_v27 = vadd.f32 %v6604_v63, %v6049_v34 }
0x1f13   : > { %v5556_v36 = vpop.f32.mrf.mxu0 }
0x1f14   : > { %5577 = vst [vmem:[%s930_s2 + $0x30] sm:$0xff] %v5565_v27  ;;  %v5557_v18 = vadd.f32 %v6049_v34, %v5556_v36 }
0x1f15   : > { %v6605_v17 = vpop.f32.mrf.mxu0 }
0x1f16   : > { %5575 = vst [vmem:[%s930_s2 + $0x20] sm:$0xff] %v5557_v18  ;;  %v5568_v58 = vadd.f32 %v6605_v17, %v6049_v34 }
0x1f17   : > { %v5559_v6 = vpop.f32.mrf.mxu0 }
0x1f18   : > { %5578 = vst [vmem:[%s930_s2 + $0x38] sm:$0xff] %v5568_v58  ;;  %v5560_v62 = vadd.f32 %v6049_v34, %v5559_v6 }
0x1f1a   : > { %5576 = vst [vmem:[%s930_s2 + $0x28] sm:$0xff] %v5560_v62 }
0x1f1b PF: > { %s71_s15 = sadd.s32 1, %s6823_s15  }
0x1f1c   : > { %p68_p4 = scmp.ge.s32.totalorder %s71_s15, 4  }
0x1f1e   :  { %70 = sbr.rel (!%p68_p4) target bundleno = 48 (0x30), region = 252 }

</bundles_post_ra>
